<compile_context>
chip_gen: v5e
topology: v5e:2x2
jax: 0.10.0
libtpu: 0.0.40
codegen_flags: <defaults>
</compile_context>

<pallas_src>
import functools
import math

import jax
import jax.numpy as jnp
from jax import lax
from jax.experimental import pallas as pl
from jax.experimental.pallas import tpu as pltpu


def _tpu_vmem_bytes():
    """Per-core VMEM capacity; conservative 64 MiB fallback (v7x per-TC)."""
    try:
        info = pltpu.get_tpu_info()
        v = getattr(info, "vmem_capacity_bytes", None)
        if v:
            return int(v)
    except Exception:
        pass
    return 64 * 1024 * 1024


def _convnext_kernel(xa_ref, xb_ref, cvec_ref, b1_ref, w1_ref, w2_ref, o_ref,
                     *, tT, K, dilation, pad, eps, fast_gelu):
    # xa_ref : (1, C, tT)   current time tile (padded coordinates)
    # xb_ref : (1, C, 128)  right halo = first 128 cols of the next tile
    # cvec_ref: (C, K+5)    packed per-channel params:
    #                       [dw_w(0..K-1) | dw_b | ln_w | ln_b | b2 | gamma]
    # b1_ref : (I, 1)       pwconv1 bias
    # w1_ref : (I, C)       pwconv1 weight (native torch layout)
    # w2_ref : (C, I)       pwconv2 weight (native torch layout)
    f32 = jnp.float32
    cvec = cvec_ref[...].astype(f32)                       # loaded/cast ONCE

    xa = xa_ref[0].astype(f32)                             # (C, tT)
    xb = xb_ref[0].astype(f32)                             # (C, 128)
    xw = jnp.concatenate([xa, xb], axis=1)                 # (C, tT + 128)
    C = xa.shape[0]

    # ---- depthwise Conv1d (groups == C): K-tap FIR along time (VPU) --------
    acc = jnp.zeros((C, tT), f32)
    for k in range(K):                                     # static unroll
        s = k * dilation
        acc = acc + xw[:, s:s + tT] * cvec[:, k:k + 1]
    acc = acc + cvec[:, K:K + 1]                           # dwconv bias

    # ---- LayerNorm over channels, eps = 1e-6 (single-pass statistics) ------
    inv_c = 1.0 / C
    mean = jnp.sum(acc, axis=0, keepdims=True) * inv_c              # (1, tT)
    ex2 = jnp.sum(acc * acc, axis=0, keepdims=True) * inv_c
    var = jnp.maximum(ex2 - mean * mean, 0.0)
    xn = (acc - mean) * lax.rsqrt(var + eps)
    xn = xn * cvec[:, K + 1:K + 2] + cvec[:, K + 2:K + 3]

    # ---- pwconv1 -> GELU -> pwconv2 (MXU, f32 accumulation) ----------------
    mm = w1_ref.dtype                                      # bf16 or f32 (set in wrapper)
    h = jnp.dot(w1_ref[...], xn.astype(mm),
                preferred_element_type=f32)                # (I, tT) f32
    h = h + b1_ref[...].astype(f32)                        # (I, 1) broadcast
    if fast_gelu:
        # tanh-approx GELU in the MXU operand dtype (bf16 VALU + EUP on v6e/v7x)
        hb = h.astype(mm)
        g = 0.5 * hb * (1.0 + jnp.tanh(0.7978845608028654
                                       * (hb + 0.044715 * (hb * hb * hb))))
    else:
        # exact erf GELU in f32 (matches torch.nn.GELU()), cast once for pwconv2
        g = (0.5 * h * (1.0 + lax.erf(h * (1.0 / math.sqrt(2.0))))).astype(mm)
    y = jnp.dot(w2_ref[...], g, preferred_element_type=f32)          # (C, tT)
    y = (y + cvec[:, K + 3:K + 4]) * cvec[:, K + 4:K + 5]            # +b2, *gamma

    # ---- residual: re-slice from the resident VMEM input blocks ------------
    # (not kept live across the MXU phase -> lower vreg/spill pressure)
    if pad == 0:
        resid = xa_ref[0].astype(f32)
    else:
        resid = jnp.concatenate([xa_ref[0][:, pad:], xb_ref[0][:, :pad]],
                                axis=1).astype(f32)
    o_ref[0] = (resid + y).astype(o_ref.dtype)             # lane-dense store


def convnext_block(x, params, *, dilation=1, kernel_size=7, time_tile=None,
                   use_bf16_mxu=True, fast_gelu=False):
    """ConvNeXtBlock forward.  x: (B, C, T) float32 (PyTorch NCL). Returns (B, C, T).

    params (native PyTorch layouts):
      dw_w (C,K)  dw_b (C,1)  ln_w (C,1)  ln_b (C,1)
      w1 (I,C)    b1 (I,1)    w2 (C,I)    b2 (C,1)    gamma (C,1)

    For production performance keep C and I multiples of 128 (MXU contraction
    dims); tiny C/I still run correctly but are VPU/DMA bound.
    """
    B, C, T = x.shape
    K = kernel_size
    assert K % 2 == 1, "residual add requires odd kernel_size"
    pad = (dilation * (K - 1)) // 2
    halo = dilation * (K - 1)
    assert halo <= 128, "conv halo must fit in one 128-lane halo block"

    I = params["w1"].shape[0]                              # intermediate_dim

    # Pack the six per-channel vectors into ONE (C, K+5) f32 array: a single
    # small constant VMEM block / DMA stream instead of six lane-padded ones.
    cvec = jnp.concatenate([
        params["dw_w"].astype(jnp.float32),                # cols 0..K-1
        params["dw_b"].astype(jnp.float32),                # col K
        params["ln_w"].astype(jnp.float32),                # col K+1
        params["ln_b"].astype(jnp.float32),                # col K+2
        params["b2"].astype(jnp.float32),                  # col K+3
        params["gamma"].astype(jnp.float32),               # col K+4
    ], axis=1)
    P = cvec.shape[1]

    # Matmul weights: cast ONCE here (not per grid step in the kernel).
    wdt = jnp.bfloat16 if use_bf16_mxu else jnp.float32
    w1 = params["w1"].astype(wdt)                          # (I, C)
    w2 = params["w2"].astype(wdt)                          # (C, I)
    b1 = params["b1"].astype(jnp.float32)                  # (I, 1)

    # ---- generation-aware tile / VMEM budgeting -----------------------------
    vmem_cap = _tpu_vmem_bytes()
    t_round = ((T + 127) // 128) * 128
    if time_tile is None:
        # double-buffered weights + lane-padded bias blocks
        wbytes = 2 * (2 * I * C * w1.dtype.itemsize + (I + C) * 128 * 4)
        budget = max(int(0.55 * vmem_cap) - wbytes, 2 * 1024 * 1024)
        # dominant per-time-column f32 cost: (I,tT) GELU intermediate + ~10
        # C-wide f32 streams (double-buffered in/out blocks, acc, xn, window).
        bytes_per_col = 4 * I + 40 * C
        time_tile = max(256, min(int(budget // max(bytes_per_col, 1)), 2048))
    tT = max(128, min((int(time_tile) // 128) * 128, t_round))
    nT = -(-T // tT)                                       # ceil(T / tT)
    L = nT * tT
    Lp = L + 128                                           # + one 128-lane halo block

    # Only wrapper-side data movement: zero-pad the time axis (left conv halo
    # + rounding + right halo block).  No transposes.
    x_pad = jnp.pad(x, ((0, 0), (0, 0), (pad, Lp - pad - T)))     # (B, C, Lp)

    kernel = functools.partial(_convnext_kernel, tT=tT, K=K, dilation=dilation,
                               pad=pad, eps=1e-6, fast_gelu=fast_gelu)
    tb = tT // 128
    const2 = lambda b, j: (0, 0)

    out = pl.pallas_call(
        kernel,
        out_shape=jax.ShapeDtypeStruct((B, C, L), x.dtype),
        grid=(B, nT),
        in_specs=[
            pl.BlockSpec((1, C, tT), lambda b, j: (b, 0, j)),              # time tile
            pl.BlockSpec((1, C, 128), lambda b, j: (b, 0, (j + 1) * tb)),  # right halo
            pl.BlockSpec((C, P), const2),                                  # packed per-ch params
            pl.BlockSpec((I, 1), const2),                                  # pwconv1 bias
            pl.BlockSpec((I, C), const2),                                  # pwconv1 weight
            pl.BlockSpec((C, I), const2),                                  # pwconv2 weight
        ],
        out_specs=pl.BlockSpec((1, C, tT), lambda b, j: (b, 0, j)),
        compiler_params=pltpu.CompilerParams(
            dimension_semantics=("parallel", "parallel"),
            vmem_limit_bytes=int(min(0.75 * vmem_cap, 100 * 1024 * 1024))),
    )(x_pad, x_pad, cvec, b1, w1, w2)

    return out if L == T else out[:, :, :T]


def _reference(x, params, *, dilation=1, kernel_size=7):
    """Pure-JAX f32 reference matching the PyTorch forward (HIGHEST-precision matmuls)."""
    B, C, T = x.shape
    pad = (dilation * (kernel_size - 1)) // 2
    xp = jnp.pad(x, ((0, 0), (0, 0), (pad, pad)))
    acc = jnp.zeros_like(x)
    for k in range(kernel_size):
        s = k * dilation
        acc = acc + xp[:, :, s:s + T] * params["dw_w"][None, :, k:k + 1]
    acc = acc + params["dw_b"][None]                        # (1, C, 1)
    xt = jnp.transpose(acc, (0, 2, 1))                      # (B, T, C)
    mean = jnp.mean(xt, -1, keepdims=True)
    var = jnp.mean((xt - mean) ** 2, -1, keepdims=True)
    xn = (xt - mean) / jnp.sqrt(var + 1e-6)
    xn = xn * params["ln_w"][:, 0] + params["ln_b"][:, 0]
    h = jnp.einsum("btc,ic->bti", xn, params["w1"],
                   precision=lax.Precision.HIGHEST) + params["b1"][:, 0]
    h = 0.5 * h * (1.0 + lax.erf(h / math.sqrt(2.0)))
    y = jnp.einsum("bti,ci->btc", h, params["w2"],
                   precision=lax.Precision.HIGHEST) + params["b2"][:, 0]
    y = y * params["gamma"][:, 0]
    return x + jnp.transpose(y, (0, 2, 1))


if __name__ == "__main__":
    # Small-but-representative shapes: dim=64, intermediate_dim=128, batch=2,
    # T=500 (exercises the non-multiple-of-tile tail), kernel_size=7, dilation=1.
    B, C, T, I = 2, 64, 500, 128
    K, dilation = 7, 1
    layer_scale_init_value = 0.5

    key = jax.random.PRNGKey(0)
    ks = jax.random.split(key, 10)
    params = {
        "dw_w": jax.random.normal(ks[0], (C, K), jnp.float32) * 0.2,
        "dw_b": jax.random.normal(ks[1], (C, 1), jnp.float32) * 0.1,
        "ln_w": 1.0 + 0.1 * jax.random.normal(ks[2], (C, 1), jnp.float32),
        "ln_b": 0.1 * jax.random.normal(ks[3], (C, 1), jnp.float32),
        "w1": jax.random.normal(ks[4], (I, C), jnp.float32) * 0.1,
        "b1": jax.random.normal(ks[5], (I, 1), jnp.float32) * 0.1,
        "w2": jax.random.normal(ks[6], (C, I), jnp.float32) * 0.1,
        "b2": jax.random.normal(ks[7], (C, 1), jnp.float32) * 0.1,
        "gamma": jnp.full((C, 1), layer_scale_init_value, jnp.float32),
    }
    x = jax.random.normal(ks[8], (B, C, T), jnp.float32)

    ref = _reference(x, params, dilation=dilation, kernel_size=K)

    # f32-MXU path with an explicit small tile: exercises multi-tile halo + tail slicing.
    out_f32 = convnext_block(x, params, dilation=dilation, kernel_size=K,
                             time_tile=256, use_bf16_mxu=False)
    out_f32 = jax.block_until_ready(out_f32)
    assert out_f32.shape == (B, C, T)
    assert jnp.allclose(out_f32, ref, rtol=2e-2, atol=2e-2), "f32 path mismatch"

    # bf16-MXU path with generation-aware auto tile (weights cast once in wrapper).
    out_bf16 = convnext_block(x, params, dilation=dilation, kernel_size=K,
                              use_bf16_mxu=True)
    out_bf16 = jax.block_until_ready(out_bf16)
    assert out_bf16.shape == (B, C, T)
    assert jnp.allclose(out_bf16, ref, rtol=5e-2, atol=5e-2), "bf16 path mismatch"

    print("KERNEL_OK")
</pallas_src>

<mosaic_0001>
module attributes {stable_mosaic.version = 11 : i64} {
  func.func @_convnext_kernel(%arg0: i32, %arg1: i32, %arg2: memref<1x64x256xf32, #tpu.memory_space<vmem>>, %arg3: memref<1x64x128xf32, #tpu.memory_space<vmem>>, %arg4: memref<64x12xf32, #tpu.memory_space<vmem>>, %arg5: memref<128x1xf32, #tpu.memory_space<vmem>>, %arg6: memref<128x64xf32, #tpu.memory_space<vmem>>, %arg7: memref<64x128xf32, #tpu.memory_space<vmem>>, %arg8: memref<1x64x256xf32, #tpu.memory_space<vmem>>) attributes {dimension_semantics = [#tpu.dimension_semantics<parallel>, #tpu.dimension_semantics<parallel>], iteration_bounds = array<i64: 2, 2>, scalar_prefetch = 0 : i64, scratch_operands = 0 : i64, tpu.core_type = #tpu.core_type<tc>, window_params = [{transform_indices = @transform_0, window_bounds = array<i64: 1, 64, 256>}, {transform_indices = @transform_1, window_bounds = array<i64: 1, 64, 128>}, {pipeline_mode = #tpu.pipeline_mode<synchronous>, transform_indices = @transform_2, window_bounds = array<i64: 64, 12>}, {pipeline_mode = #tpu.pipeline_mode<synchronous>, transform_indices = @transform_3, window_bounds = array<i64: 128, 1>}, {pipeline_mode = #tpu.pipeline_mode<synchronous>, transform_indices = @transform_4, window_bounds = array<i64: 128, 64>}, {pipeline_mode = #tpu.pipeline_mode<synchronous>, transform_indices = @transform_5, window_bounds = array<i64: 64, 128>}, {transform_indices = @transform_6, window_bounds = array<i64: 1, 64, 256>}]} {
    %c0 = arith.constant 0 : index
    %c0_0 = arith.constant 0 : index
    %0 = vector.load %arg4[%c0, %c0_0] : memref<64x12xf32, #tpu.memory_space<vmem>>, vector<64x12xf32>
    %c0_1 = arith.constant 0 : index
    %c0_2 = arith.constant 0 : index
    %c0_3 = arith.constant 0 : index
    %1 = vector.load %arg2[%c0_1, %c0_2, %c0_3] : memref<1x64x256xf32, #tpu.memory_space<vmem>>, vector<1x64x256xf32>
    %2 = vector.shape_cast %1 : vector<1x64x256xf32> to vector<64x256xf32>
    %c0_4 = arith.constant 0 : index
    %c0_5 = arith.constant 0 : index
    %c0_6 = arith.constant 0 : index
    %3 = vector.load %arg3[%c0_4, %c0_5, %c0_6] : memref<1x64x128xf32, #tpu.memory_space<vmem>>, vector<1x64x128xf32>
    %4 = vector.shape_cast %3 : vector<1x64x128xf32> to vector<64x128xf32>
    %5 = tpu.concatenate %2, %4 in 1 : vector<64x256xf32>, vector<64x128xf32> -> vector<64x384xf32>
    %cst = arith.constant 0.000000e+00 : f32
    %6 = vector.broadcast %cst : f32 to vector<64x256xf32>
    %7 = vector.extract_strided_slice %5 {offsets = [0, 0], sizes = [64, 256], strides = [1, 1]} : vector<64x384xf32> to vector<64x256xf32>
    %8 = vector.extract_strided_slice %0 {offsets = [0, 0], sizes = [64, 1], strides = [1, 1]} : vector<64x12xf32> to vector<64x1xf32>
    %9 = vector.broadcast %8 : vector<64x1xf32> to vector<64x256xf32>
    %10 = arith.mulf %7, %9 : vector<64x256xf32>
    %11 = arith.addf %6, %10 : vector<64x256xf32>
    %12 = vector.extract_strided_slice %5 {offsets = [0, 1], sizes = [64, 256], strides = [1, 1]} : vector<64x384xf32> to vector<64x256xf32>
    %13 = vector.extract_strided_slice %0 {offsets = [0, 1], sizes = [64, 1], strides = [1, 1]} : vector<64x12xf32> to vector<64x1xf32>
    %14 = vector.broadcast %13 : vector<64x1xf32> to vector<64x256xf32>
    %15 = arith.mulf %12, %14 : vector<64x256xf32>
    %16 = arith.addf %11, %15 : vector<64x256xf32>
    %17 = vector.extract_strided_slice %5 {offsets = [0, 2], sizes = [64, 256], strides = [1, 1]} : vector<64x384xf32> to vector<64x256xf32>
    %18 = vector.extract_strided_slice %0 {offsets = [0, 2], sizes = [64, 1], strides = [1, 1]} : vector<64x12xf32> to vector<64x1xf32>
    %19 = vector.broadcast %18 : vector<64x1xf32> to vector<64x256xf32>
    %20 = arith.mulf %17, %19 : vector<64x256xf32>
    %21 = arith.addf %16, %20 : vector<64x256xf32>
    %22 = vector.extract_strided_slice %5 {offsets = [0, 3], sizes = [64, 256], strides = [1, 1]} : vector<64x384xf32> to vector<64x256xf32>
    %23 = vector.extract_strided_slice %0 {offsets = [0, 3], sizes = [64, 1], strides = [1, 1]} : vector<64x12xf32> to vector<64x1xf32>
    %24 = vector.broadcast %23 : vector<64x1xf32> to vector<64x256xf32>
    %25 = arith.mulf %22, %24 : vector<64x256xf32>
    %26 = arith.addf %21, %25 : vector<64x256xf32>
    %27 = vector.extract_strided_slice %5 {offsets = [0, 4], sizes = [64, 256], strides = [1, 1]} : vector<64x384xf32> to vector<64x256xf32>
    %28 = vector.extract_strided_slice %0 {offsets = [0, 4], sizes = [64, 1], strides = [1, 1]} : vector<64x12xf32> to vector<64x1xf32>
    %29 = vector.broadcast %28 : vector<64x1xf32> to vector<64x256xf32>
    %30 = arith.mulf %27, %29 : vector<64x256xf32>
    %31 = arith.addf %26, %30 : vector<64x256xf32>
    %32 = vector.extract_strided_slice %5 {offsets = [0, 5], sizes = [64, 256], strides = [1, 1]} : vector<64x384xf32> to vector<64x256xf32>
    %33 = vector.extract_strided_slice %0 {offsets = [0, 5], sizes = [64, 1], strides = [1, 1]} : vector<64x12xf32> to vector<64x1xf32>
    %34 = vector.broadcast %33 : vector<64x1xf32> to vector<64x256xf32>
    %35 = arith.mulf %32, %34 : vector<64x256xf32>
    %36 = arith.addf %31, %35 : vector<64x256xf32>
    %37 = vector.extract_strided_slice %5 {offsets = [0, 6], sizes = [64, 256], strides = [1, 1]} : vector<64x384xf32> to vector<64x256xf32>
    %38 = vector.extract_strided_slice %0 {offsets = [0, 6], sizes = [64, 1], strides = [1, 1]} : vector<64x12xf32> to vector<64x1xf32>
    %39 = vector.broadcast %38 : vector<64x1xf32> to vector<64x256xf32>
    %40 = arith.mulf %37, %39 : vector<64x256xf32>
    %41 = arith.addf %36, %40 : vector<64x256xf32>
    %42 = vector.extract_strided_slice %0 {offsets = [0, 7], sizes = [64, 1], strides = [1, 1]} : vector<64x12xf32> to vector<64x1xf32>
    %43 = vector.broadcast %42 : vector<64x1xf32> to vector<64x256xf32>
    %44 = arith.addf %41, %43 : vector<64x256xf32>
    %cst_7 = arith.constant dense<0.000000e+00> : vector<256xf32>
    %45 = vector.multi_reduction <add>, %44, %cst_7 [0] : vector<64x256xf32> to vector<256xf32>
    %46 = vector.shape_cast %45 : vector<256xf32> to vector<1x256xf32>
    %cst_8 = arith.constant 1.562500e-02 : f32
    %47 = vector.broadcast %cst_8 : f32 to vector<1x256xf32>
    %48 = arith.mulf %46, %47 : vector<1x256xf32>
    %49 = arith.mulf %44, %44 : vector<64x256xf32>
    %cst_9 = arith.constant dense<0.000000e+00> : vector<256xf32>
    %50 = vector.multi_reduction <add>, %49, %cst_9 [0] : vector<64x256xf32> to vector<256xf32>
    %51 = vector.shape_cast %50 : vector<256xf32> to vector<1x256xf32>
    %cst_10 = arith.constant 1.562500e-02 : f32
    %52 = vector.broadcast %cst_10 : f32 to vector<1x256xf32>
    %53 = arith.mulf %51, %52 : vector<1x256xf32>
    %54 = arith.mulf %48, %48 : vector<1x256xf32>
    %55 = arith.subf %53, %54 : vector<1x256xf32>
    %cst_11 = arith.constant 0.000000e+00 : f32
    %56 = vector.broadcast %cst_11 : f32 to vector<1x256xf32>
    %57 = arith.maximumf %55, %56 : vector<1x256xf32>
    %58 = vector.broadcast %48 : vector<1x256xf32> to vector<64x256xf32>
    %59 = arith.subf %44, %58 : vector<64x256xf32>
    %cst_12 = arith.constant 9.99999997E-7 : f32
    %60 = vector.broadcast %cst_12 : f32 to vector<1x256xf32>
    %61 = arith.addf %57, %60 : vector<1x256xf32>
    %62 = math.rsqrt %61 : vector<1x256xf32>
    %63 = vector.broadcast %62 : vector<1x256xf32> to vector<64x256xf32>
    %64 = arith.mulf %59, %63 : vector<64x256xf32>
    %65 = vector.extract_strided_slice %0 {offsets = [0, 8], sizes = [64, 1], strides = [1, 1]} : vector<64x12xf32> to vector<64x1xf32>
    %66 = vector.broadcast %65 : vector<64x1xf32> to vector<64x256xf32>
    %67 = arith.mulf %64, %66 : vector<64x256xf32>
    %68 = vector.extract_strided_slice %0 {offsets = [0, 9], sizes = [64, 1], strides = [1, 1]} : vector<64x12xf32> to vector<64x1xf32>
    %69 = vector.broadcast %68 : vector<64x1xf32> to vector<64x256xf32>
    %70 = arith.addf %67, %69 : vector<64x256xf32>
    %c0_13 = arith.constant 0 : index
    %c0_14 = arith.constant 0 : index
    %71 = vector.load %arg6[%c0_13, %c0_14] : memref<128x64xf32, #tpu.memory_space<vmem>>, vector<128x64xf32>
    %cst_15 = arith.constant dense<0.000000e+00> : vector<128x256xf32>
    %72 = tpu.matmul %71, %70, %cst_15 {dimension_numbers = #tpu.dot_dimension_numbers<[1], [0], [0], [1], [0, 0, 1, 1], [], []>} : vector<128x64xf32>, vector<64x256xf32>, vector<128x256xf32> -> vector<128x256xf32>
    %c0_16 = arith.constant 0 : index
    %c0_17 = arith.constant 0 : index
    %73 = vector.load %arg5[%c0_16, %c0_17] : memref<128x1xf32, #tpu.memory_space<vmem>>, vector<128x1xf32>
    %74 = vector.broadcast %73 : vector<128x1xf32> to vector<128x256xf32>
    %75 = arith.addf %72, %74 : vector<128x256xf32>
    %cst_18 = arith.constant 5.000000e-01 : f32
    %76 = vector.broadcast %cst_18 : f32 to vector<128x256xf32>
    %77 = arith.mulf %76, %75 : vector<128x256xf32>
    %cst_19 = arith.constant 0.707106769 : f32
    %78 = vector.broadcast %cst_19 : f32 to vector<128x256xf32>
    %79 = arith.mulf %75, %78 : vector<128x256xf32>
    %80 = math.erf %79 : vector<128x256xf32>
    %cst_20 = arith.constant 1.000000e+00 : f32
    %81 = vector.broadcast %cst_20 : f32 to vector<128x256xf32>
    %82 = arith.addf %81, %80 : vector<128x256xf32>
    %83 = arith.mulf %77, %82 : vector<128x256xf32>
    %c0_21 = arith.constant 0 : index
    %c0_22 = arith.constant 0 : index
    %84 = vector.load %arg7[%c0_21, %c0_22] : memref<64x128xf32, #tpu.memory_space<vmem>>, vector<64x128xf32>
    %cst_23 = arith.constant dense<0.000000e+00> : vector<64x256xf32>
    %85 = tpu.matmul %84, %83, %cst_23 {dimension_numbers = #tpu.dot_dimension_numbers<[1], [0], [0], [1], [0, 0, 1, 1], [], []>} : vector<64x128xf32>, vector<128x256xf32>, vector<64x256xf32> -> vector<64x256xf32>
    %86 = vector.extract_strided_slice %0 {offsets = [0, 10], sizes = [64, 1], strides = [1, 1]} : vector<64x12xf32> to vector<64x1xf32>
    %87 = vector.broadcast %86 : vector<64x1xf32> to vector<64x256xf32>
    %88 = arith.addf %85, %87 : vector<64x256xf32>
    %89 = vector.extract_strided_slice %0 {offsets = [0, 11], sizes = [64, 1], strides = [1, 1]} : vector<64x12xf32> to vector<64x1xf32>
    %90 = vector.broadcast %89 : vector<64x1xf32> to vector<64x256xf32>
    %91 = arith.mulf %88, %90 : vector<64x256xf32>
    %c0_24 = arith.constant 0 : index
    %c0_25 = arith.constant 0 : index
    %c0_26 = arith.constant 0 : index
    %92 = vector.load %arg2[%c0_24, %c0_25, %c0_26] : memref<1x64x256xf32, #tpu.memory_space<vmem>>, vector<1x64x256xf32>
    %93 = vector.shape_cast %92 : vector<1x64x256xf32> to vector<64x256xf32>
    %94 = vector.extract_strided_slice %93 {offsets = [0, 3], sizes = [64, 253], strides = [1, 1]} : vector<64x256xf32> to vector<64x253xf32>
    %c0_27 = arith.constant 0 : index
    %c0_28 = arith.constant 0 : index
    %c0_29 = arith.constant 0 : index
    %95 = vector.load %arg3[%c0_27, %c0_28, %c0_29] : memref<1x64x128xf32, #tpu.memory_space<vmem>>, vector<1x64x128xf32>
    %96 = vector.shape_cast %95 : vector<1x64x128xf32> to vector<64x128xf32>
    %97 = vector.extract_strided_slice %96 {offsets = [0, 0], sizes = [64, 3], strides = [1, 1]} : vector<64x128xf32> to vector<64x3xf32>
    %98 = tpu.concatenate %94, %97 in 1 : vector<64x253xf32>, vector<64x3xf32> -> vector<64x256xf32>
    %99 = arith.addf %98, %91 : vector<64x256xf32>
    %c0_30 = arith.constant 0 : index
    %c0_31 = arith.constant 0 : index
    %c0_32 = arith.constant 0 : index
    %100 = vector.load %arg8[%c0_30, %c0_31, %c0_32] : memref<1x64x256xf32, #tpu.memory_space<vmem>>, vector<1x64x256xf32>
    %101 = vector.shape_cast %100 : vector<1x64x256xf32> to vector<64x256xf32>
    %102 = vector.shape_cast %99 : vector<64x256xf32> to vector<1x64x256xf32>
    tpu.vector_store %arg8[%c0_30, %c0_31, %c0_32], %102 {strides = array<i32>} : memref<1x64x256xf32, #tpu.memory_space<vmem>>, vector<1x64x256xf32>,
    return
  }
  func.func @transform_0(%arg0: i32, %arg1: i32) -> (i32, i32, i32) {
    %c0_i32 = arith.constant 0 : i32
    %c0_i32_0 = arith.constant 0 : i32
    return %arg0, %c0_i32, %arg1 : i32, i32, i32
  }
  func.func @transform_1(%arg0: i32, %arg1: i32) -> (i32, i32, i32) {
    %c1_i32 = arith.constant 1 : i32
    %0 = arith.addi %arg1, %c1_i32 : i32
    %c2_i32 = arith.constant 2 : i32
    %1 = arith.muli %0, %c2_i32 : i32
    %c0_i32 = arith.constant 0 : i32
    %c0_i32_0 = arith.constant 0 : i32
    return %arg0, %c0_i32, %1 : i32, i32, i32
  }
  func.func @transform_2(%arg0: i32, %arg1: i32) -> (i32, i32) {
    %c0_i32 = arith.constant 0 : i32
    %c0_i32_0 = arith.constant 0 : i32
    %c0_i32_1 = arith.constant 0 : i32
    return %c0_i32, %c0_i32_0 : i32, i32
  }
  func.func @transform_3(%arg0: i32, %arg1: i32) -> (i32, i32) {
    %c0_i32 = arith.constant 0 : i32
    %c0_i32_0 = arith.constant 0 : i32
    %c0_i32_1 = arith.constant 0 : i32
    return %c0_i32, %c0_i32_0 : i32, i32
  }
  func.func @transform_4(%arg0: i32, %arg1: i32) -> (i32, i32) {
    %c0_i32 = arith.constant 0 : i32
    %c0_i32_0 = arith.constant 0 : i32
    %c0_i32_1 = arith.constant 0 : i32
    return %c0_i32, %c0_i32_0 : i32, i32
  }
  func.func @transform_5(%arg0: i32, %arg1: i32) -> (i32, i32) {
    %c0_i32 = arith.constant 0 : i32
    %c0_i32_0 = arith.constant 0 : i32
    %c0_i32_1 = arith.constant 0 : i32
    return %c0_i32, %c0_i32_0 : i32, i32
  }
  func.func @transform_6(%arg0: i32, %arg1: i32) -> (i32, i32, i32) {
    %c0_i32 = arith.constant 0 : i32
    %c0_i32_0 = arith.constant 0 : i32
    return %arg0, %c0_i32, %arg1 : i32, i32, i32
  }
}

</mosaic_0001>

<bundles_post_ra>
// kernel: tpu_custom_call.1
= control target key start
LH: loop header
LB: loop body
LE: loop exit
PB: predicated region body
PF: predicated region fallthrough
CT: control target
= control target key end

     0   :  { %s7781_s0 = inlined_call_operand.hbm [shape: f32[2,64,640], index: 0, kind: input, shape index: {}]   ;;  %s7782_s1 = inlined_call_operand.hbm [shape: f32[2,64,640], index: 1, kind: input, shape index: {}]   ;;  %s7783_s2 = inlined_call_operand.vmem [shape: f32[64,12], index: 2, kind: input, shape index: {}]   ;;  %s7784_s3 = inlined_call_operand.vmem [shape: f32[128,1], index: 3, kind: input, shape index: {}]   ;;  %s7785_s4 = inlined_call_operand.vmem [shape: f32[128,64], index: 4, kind: input, shape index: {}]   ;;  %s7786_s5 = inlined_call_operand.vmem [shape: f32[64,128], index: 5, kind: input, shape index: {}]   ;;  %s7787_s6 = inlined_call_operand.hbm [shape: f32[2,64,512], index: 6, kind: output, shape index: {}]  }
   0x1   :  { %7880 = sst [smem:[#allocation103_spill]] %s7781_s0 }
   0x2   :  { %7881 = sst [smem:[#allocation104_spill]] %s7786_s5 }
   0x3   :  { %7882 = sst [smem:[#allocation105_spill]] %s7787_s6 }
   0x4   :  { %11 = vsyncpa [#allocation3], 0 }
   0x5   :  { %13 = vsyncpa [#allocation3 + $0x1], 0 }
   0x6   :  { %14 = vsyncpa [#allocation6], 0 }
   0x7   :  { %16 = vsyncpa [#allocation6 + $0x1], 0 }
   0x8   :  { %17 = vsyncpa [#allocation4], 0 }
   0x9   :  { %19 = vsyncpa [#allocation4 + $0x1], 0  ;;  %s4599_s21 = smov 0   ;;  %s4601_s22 = smov 0  }
   0xa   :  { %s4603_s23 = smov 0   ;;  %s4605_s24 = smov 0  }
   0xb   :  { %s4607_s25 = smov 0   ;;  %s4609_s26 = smov 0  }
   0xc   :  { %s4611_s27 = smov 0   ;;  %s4613_s28 = smov 0  }
   0xd   :  { %s4615_s29 = smov 0   ;;  %s4617_s30 = smov 0  }
   0xe   :  { %s4619_s7 = smov 0  }
   0xf LB: > { %7883 = sst [smem:[#allocation11_spill]] %s4506_s24  ;;  %s7788_s8 = sadd.s32 4294967295, %s4534_s7   ;;  %s4534_s7 = sphi %s4619_s7, %s25_s7   ;;  %s4530_s30 = sphi %s4617_s30, %s8262_s30   ;;  %s4526_s29 = sphi %s4615_s29, %s8254_s29   ;;  %s4522_s28 = sphi %s4613_s28, %s8261_s28   ;;  %s4518_s27 = sphi %s4611_s27, %s8253_s27   ;;  %s4514_s26 = sphi %s4609_s26, %s8252_s26   ;;  %s4510_s25 = sphi %s4607_s25, %s8260_s25   ;;  %s4506_s24 = sphi %s4605_s24, %s8259_s24   ;;  %s4502_s23 = sphi %s4603_s23, %s8258_s23   ;;  %s4498_s22 = sphi %s4601_s22, %s8257_s22   ;;  %s4494_s21 = sphi %s4599_s21, %s8256_s21  }
  0x10   : > { %7884 = sst [smem:[#allocation12_spill]] %s4514_s26  ;;  %s34_s10 = sadd.s32 1, %s4526_s29 }
  0x11   : > { %7885 = sst [smem:[#allocation13_spill]] %s4518_s27  ;;  %s37_s11 = sadd.s32 1, %s4530_s30 }
  0x12   : > { %7886 = sst [smem:[#allocation14_spill]] %s4522_s28  ;;  %p35_p0 = scmp.ge.s32.totalorder %s34_s10, 2 }
  0x13   : > { %7887 = sst [smem:[#allocation15_spill]] %s4526_s29  ;;  %s46_s12 = sadd.s32 1, %s4514_s26 }
  0x14   : > { %p53_p1 = scmp.ne.s32.totalorder %s4514_s26, %s4510_s25  ;;  %p54_p2 = scmp.eq.s32.totalorder %s4534_s7, 0 }
  0x15   : > { %s8264_s10 = smov (%p35_p0, %s34_s10), 0  ;;  %s8266_s11 = smov (!%p35_p0, %s37_s11), %s4530_s30 }
  0x16   : > { %7888 = sst [smem:[#allocation16_spill]] %s8264_s10  ;;  %s42_s13 = ssub.s32 %s4526_s29, %s8264_s10 }
  0x17   : > { %p4672_p3 = por %p54_p2, %p53_p1  ;;  %p39_p4 = scmp.ge.s32.totalorder %s8266_s11, 2 }
  0x18   : > { %p59_p5 = scmp.ne.s32.totalorder %s4510_s25, %s4506_s24  ;;  %p4680_p6 = scmp.eq.s32.totalorder %s7788_s8, 0 }
  0x19   : > { %s4685_s16 = sshll.u32 %s4526_s29, 1  ;;  %s8268_s11 = smov (%p39_p4, %s8266_s11), 0 }
  0x1a   : > { %7891 = sst [smem:[#allocation17_spill]] %s8268_s11  ;;  %p4694_p7 = por %p4680_p6, %p59_p5 }
  0x1b   : > { %s4039_s18 = sadd.s32 2, %s4685_s16  ;;  %s41_s19 = ssub.s32 %s4530_s30, %s8268_s11 }
  0x1c   : > { %s4040_s20 = sshll.u32 %s8264_s10, 1  ;;  %s43_s9 = sor.u32 %s42_s13, %s41_s19 }
  0x1d   : > { %s4041_s8 = sadd.s32 2, %s4040_s20  ;;  %p44_p8 = scmp.eq.s32.totalorder %s43_s9, 0 }
  0x1e   : > { %s74_s29 = ssub.s32 %s4039_s18, %s4041_s8  ;;  %s78_s28 = sadd.s32 1, %s4502_s23 }
  0x1f   : > { %s75_s6 = sor.u32 %s74_s29, %s41_s19  ;;  %p85_p10 = scmp.ne.s32.totalorder %s4502_s23, %s4498_s22 }
  0x20   : > { %s4704_s27 = scalar_select %p44_p8, %s4514_s26, %s46_s12  }
  0x21   : > { %p76_p9 = scmp.eq.s32.totalorder %s75_s6, 0  ;;  %p91_p11 = scmp.ne.s32.totalorder %s4498_s22, %s4494_s21 }
  0x22   : > { %7893 = sst [smem:[#allocation18_spill]] %s4704_s27  ;;  %s7894_s5 = sadd.s32 4294967295, %s4534_s7  }
  0x23   : > { %p201_p12 = scmp.eq.s32.totalorder %s7894_s5, 3  ;;  %p4717_p13 = por %p85_p10, %p54_p2 }
  0x24   : > { %s4713_s11 = scalar_select %p76_p9, %s4502_s23, %s78_s28  }
  0x25   : > { %p4723_p0 = por %p91_p11, %p4680_p6  ;;  %p4730_p4 = por %p201_p12, %p53_p1 }
  0x26   : > { %7895 = sst [smem:[#allocation19_spill]] %s4713_s11  ;;  %s7900_s6 = sadd.s32 4294967294, %s4534_s7  }
  0x27   : > { %s7898_s29 = scalar_select %p4730_p4, 1, 0 }
  0x28   : > { %p207_p8 = scmp.eq.s32.totalorder %s7900_s6, 3  ;;  %p3952_p2 = scmp.ge.s32.totalorder %s4534_s7, 4 }
  0x29   : > { %7899 = sst [smem:[#allocation20_spill]] %s7898_s29 }
  0x2a   : > { %p4739_p9 = por %p207_p8, %p59_p5  ;;  %235 = sbr.rel (%p3952_p2) target bundleno = 83 (0x53), region = 32 }
  0x2c   : > { %s7901_s5 = scalar_select %p4739_p9, 1, 0 }
  0x2e   : > { %7902 = sst [smem:[#allocation21_spill]] %s7901_s5 }
  0x2f   : > { %238 = sbr.rel (!%p4672_p3) target bundleno = 75 (0x4b), region = 36  ;;  %s239_s21 = sand.u32 (%p4672_p3), 1, %s4514_s26  }
  0x30   : > { %s3953_s28 = sshll.u32 (%p4672_p3), %s239_s21, 7  ;;  %s4747_s8 = scalar_lea.sflag (%p4672_p3), [#allocation3], %s239_s21 }
  0x31   : > { %s243_s12 = scalar_lea.vmem (%p4672_p3), [#allocation2], %s3953_s28  ;;  %s4044_s13 = smul.u32 (%p4672_p3), 40, %s4530_s30 }
  0x32   : > { %s4750_s15 = sshll.u32 (%p4672_p3), %s243_s12, 4  ;;  %s7903_s0 = sld [smem:[#allocation103_spill]] (%p4672_p3)  ;;  %s262_s15 = int_to_ptr.vmem [resolvable:$true] %s4750_s15 }
  0x33   : > { %s254_s18 = sadd.s32 (%p4672_p3), %s4044_s13, %s4685_s16 }
  0x34   : > { %s3957_s19 = sshll.u32 %s254_s18, 3 }
  0x38   : > { %s256_s14 = scalar_lea.hbm %s7903_s0, %s3957_s19  ;;  %s4350_s28 = scalar_lea.hbm %s7903_s0, 640 }
  0x39   : > { %s259_s27 = sshll.u32 %s256_s14, 4  ;;  %s260_s27 = int_to_ptr.hbm [resolvable:$true] %s259_s27 }
  0x3a   : > { %s4339_s11 = sshra.s32 %s260_s27, 4  ;;  %s4340_s11 = int_to_ptr.hbm [resolvable:$true] %s4339_s11 }
  0x3b   : > { %s4346_s26 = scalar_lea.hbm %s4340_s11, 128 }
  0x3c   : > { %p4347_p1 = scmp.ne.s32.totalorder %s4340_s11, %s4346_s26  ;;  %p4352_p3 = scmp.lt.s32.totalorder %s4350_s28, %s4346_s26 }
  0x3e   : > { %p4354_p5 = pnand %p4352_p3, %p4347_p1 }
  0x40   : > { %4357 = shalt.err (!%p4354_p5)
}
  0x41   : > { %s4358_s12 = sshra.s32 %s262_s15, 4  ;;  %s4536_s18 = smov [#allocation2]   ;;  %s4359_s12 = int_to_ptr.vmem [resolvable:$true] %s4358_s12 }
  0x42   : > { %s4365_s13 = scalar_lea.vmem %s4359_s12, 128  ;;  %s4369_s19 = scalar_lea.vmem %s4536_s18, 256 }
  0x43   : > { %p4366_p6 = scmp.ne.s32.totalorder %s4359_s12, %s4365_s13  ;;  %p4371_p10 = scmp.lt.s32.totalorder %s4369_s19, %s4365_s13 }
  0x45   : > { %p4373_p11 = pnand %p4371_p10, %p4366_p6 }
  0x47   : > { %4376 = shalt.err (!%p4373_p11)
}
  0x48   : > { %s4537_s20 = smov 640   ;;  %s4538_s11 = smov 256  }
  0x49   : > { %s4539_s5 = smov 16  }
  0x4a   : > { %267 = dma.hbm_to_vmem [thread:$0]  %s260_s27, 2048, %s262_s15, %s4747_s8, %s4537_s20, %s4538_s11, %s4539_s5  }
  0x4b PF: > { %s271_s26 = sand.u32 1, %s4502_s23   ;;  %s3872_s6 = smul.u32 40, %s4530_s30 }
  0x4c   : > { %s3961_s14 = sshll.u32 %s271_s26, 6  ;;  %s272_s27 = scalar_lea.sflag [#allocation6], %s271_s26 }
  0x4d   : > { %s3873_s21 = sadd.s32 %s4685_s16, %s3872_s6  ;;  %s275_s12 = scalar_lea.vmem [#allocation5], %s3961_s14 }
  0x4e   : > { %s3963_s28 = sshll.u32 %s3873_s21, 3  ;;  %s286_s13 = sshll.u32 %s275_s12, 4  ;;  %s287_s13 = int_to_ptr.vmem [resolvable:$true] %s286_s13 }
  0x4f   : > { %s3875_s0 = scalar_lea.hbm %s7782_s1, %s3963_s28  ;;  %s4540_s8 = smov 640  }
  0x50   : > { %s3876_s24 = scalar_lea.hbm %s3875_s0, 16  ;;  %s4541_s15 = smov 128  }
  0x51   : > { %s284_s29 = sshll.u32 %s3876_s24, 4  ;;  %s4542_s20 = smov 8   ;;  %s285_s29 = int_to_ptr.hbm [resolvable:$true] %s284_s29 }
  0x52   : > { %4045 = dma.hbm_to_vmem [thread:$0]  (%p4717_p13), %s285_s29, 1024, %s287_s13, %s272_s27, %s4540_s8, %s4541_s15, %s4542_s20  }
  0x53 PF: > { %p3964_p12 = scmp.ge.s32.totalorder %s4534_s7, 1  ;;  %p294_p8 = scmp.lt.s32.totalorder %s4534_s7, 5 }
  0x55   : > { %p295_p2 = pnand %p3964_p12, %p294_p8 }
  0x57   : > { %298 = sbr.rel (%p295_p2) target bundleno = 1929 (0x789), region = 44 }
  0x5c   : > { %s4776_s16 = sand.u32 1, %s4510_s25  }
  0x5d   : > { %s3965_s0 = sshll.u32 %s4776_s16, 7  ;;  %s301_s24 = scalar_lea.sflag [#allocation3], %s4776_s16 }
  0x5e   : > { %s4782_s11 = scalar_lea.vmem [#allocation2], %s3965_s0 }
  0x5f   : > { %4479 = dma.done.wait (%p4694_p7), %s301_s24, 2048  }
  0x60   : > { %4481 = vsyncadd (%p4694_p7), %s301_s24, 4294965248  ;;  %s310_s10 = sand.u32 1, %s4498_s22  }
  0x61   : > { %s3966_s29 = sshll.u32 %s310_s10, 6  ;;  %s311_s5 = scalar_lea.sflag [#allocation6], %s310_s10 }
  0x62   : > { %s4789_s26 = scalar_lea.vmem [#allocation5], %s3966_s29 }
  0x63   : > { %4483 = dma.done.wait (%p4723_p0), %s311_s5, 1024  }
  0x64   : > { %4485 = vsyncadd (%p4723_p0), %s311_s5, 4294966272  ;;  %v7799_v0 = vmov 0   ;;  %v4801_v1 = vld [vmem:[%s7783_s2 + $0x20] sm:$0xff]  ;;  %v4806_v2 = vld [vmem:[%s7783_s2 + $0x10] sm:$0xff]  ;;  %v4544_v9 = vmov 1   ;;  %v4545_v10 = vmov 2  }
  0x65   : > { %4171 = vset.pattern.permute.xlu2 %v7799_v0  ;;  %4170 = vset.pattern.permute.xlu1 %v7799_v0  ;;  %v4811_v3 = vld [vmem:[%s7783_s2] sm:$0xff]  ;;  %v4819_v4 = vld [vmem:[%s7783_s2 + $0x28] sm:$0xff]  ;;  %v4824_v5 = vld [vmem:[%s7783_s2 + $0x18] sm:$0xff]  ;;  %s4546_s29 = smov 127   ;;  %s4547_s5 = smov 126   ;;  %vm589_vm0 = vcmask 1039360  }
  0x66   : > { %4169 = vset.pattern.permute.xlu0 %v7799_v0  ;;  %411 = vperm.xlu2 %4171, %v4801_v1   ;;  %v4829_v6 = vld [vmem:[%s7783_s2 + $0x8] sm:$0xff]  ;;  %v4837_v7 = vld [vmem:[%s7783_s2 + $0x38] sm:$0xff]  ;;  %v4842_v8 = vld [vmem:[%s7783_s2 + $0x30] sm:$0xff]  ;;  %s4549_s17 = smov 125   ;;  %s4551_s6 = smov 124   ;;  %vm1297_vm1 = vcmask 1006592  }
  0x67   : > { %401 = vperm.xlu1 %4170, %v4806_v2   ;;  %391 = vperm.xlu0 %4169, %v4811_v3   ;;  %v4865_v13 = vld [vmem:[%s4789_s26] sm:$0xff]  ;;  %v4868_v14 = vld [vmem:[%s4782_s11 + $0x8] sm:$0xff]  ;;  %v4895_v27 = vld [vmem:[%s4782_s11 + $0x10] sm:$0xff]  ;;  %s4554_s14 = smov 123   ;;  %s4555_s21 = smov 122   ;;  %vm766_vm2 = vcmask 1031168  }
  0x68   : > { %v4871_v16 = vld [vmem:[%s4782_s11] sm:$0xff]  ;;  %v4892_v26 = vld [vmem:[%s4789_s26 + $0x8] sm:$0xff]  ;;  %v4898_v28 = vld [vmem:[%s4782_s11 + $0x18] sm:$0xff]  ;;  %vm943_vm3 = vcmask 1022976   ;;  %vm1120_vm4 = vcmask 1014784   ;;  %vm1474_vm5 = vcmask 998400  }
  0x69   : > { %v4907_v33 = vld [vmem:[%s4789_s26 + $0x10] sm:$0xff]  ;;  %v4910_v34 = vld [vmem:[%s4782_s11 + $0x28] sm:$0xff]  ;;  %v4913_v36 = vld [vmem:[%s4782_s11 + $0x20] sm:$0xff]  ;;  %vm1911_vm12 = vcmask 523264   ;;  %s7656_s15 = scalar_lea.vmem [#allocation7], %s3965_s0  ;;  %s8244_s0 = sld [smem:[#allocation13_spill]] }
  0x6a   : > { %v4922_v40 = vld [vmem:[%s4789_s26 + $0x18] sm:$0xff]  ;;  %v4928_v43 = vld [vmem:[%s4782_s11 + $0x30] sm:$0xff]  ;;  %v4937_v48 = vld [vmem:[%s4789_s26 + $0x20] sm:$0xff]  ;;  %s8245_s20 = sld [smem:[#allocation14_spill]]  ;;  %s3827_s28 = sshll.u32 %s7656_s15, 4  ;;  %s3828_s28 = int_to_ptr.vmem [resolvable:$true] %s3827_s28 }
  0x6b   : > { %v4925_v41 = vld [vmem:[%s4782_s11 + $0x38] sm:$0xff]  ;;  %v4940_v49 = vld [vmem:[%s4782_s11 + $0x48] sm:$0xff]  ;;  %v4943_v50 = vld [vmem:[%s4782_s11 + $0x40] sm:$0xff]  ;;  %s3813_s12 = scalar_lea.sflag [#allocation4], %s4776_s16 }
  0x6c   : > { %v4952_v55 = vld [vmem:[%s4789_s26 + $0x28] sm:$0xff]  ;;  %v4955_v56 = vld [vmem:[%s4782_s11 + $0x58] sm:$0xff]  ;;  %v4958_v57 = vld [vmem:[%s4782_s11 + $0x50] sm:$0xff] }
  0x6d   : > { %v4967_v62 = vld [vmem:[%s4789_s26 + $0x30] sm:$0xff]  ;;  %v4970_v63 = vld [vmem:[%s4782_s11 + $0x68] sm:$0xff] }
  0x6e   : > { %416 = vperm.xlu2 %4171, %v4819_v4  }
  0x6f   : > { %406 = vperm.xlu1 %4170, %v4824_v5   ;;  %396 = vperm.xlu0 %4169, %v4829_v6   ;;  %s4033_s24 = sshll.u32 %s8244_s0, 1 }
  0x76   : > { %4172 = vset.pattern.permute.xlu2 %v4544_v9 }
  0x77   : > { %426 = vperm.xlu1 %4170, %v4837_v7   ;;  %421 = vperm.xlu0 %4169, %v4842_v8  }
  0x78   : > { %462 = vperm.xlu2 %4172, %v4811_v3  }
  0x7f   : > { %4174 = vset.pattern.permute.xlu1 %v4544_v9  ;;  %4173 = vset.pattern.permute.xlu0 %v4544_v9  ;;  %v4973_v9 = vld [vmem:[%s4782_s11 + $0x60] sm:$0xff] }
  0x80   : > { %470 = vperm.xlu1 %4174, %v4806_v2   ;;  %466 = vperm.xlu0 %4173, %v4829_v6  }
  0x81   : > { %474 = vperm.xlu2 %4172, %v4824_v5  }
  0x88   : > { %478 = vperm.xlu1 %4174, %v4801_v1   ;;  %486 = vperm.xlu0 %4173, %v4842_v8  }
  0x89   : > { %482 = vperm.xlu2 %4172, %v4819_v4  }
  0x90   : > { %490 = vperm.xlu1 %4174, %v4837_v7   ;;  %4176 = vset.pattern.permute.xlu0 %v4545_v10 }
  0x91   : > { %643 = vperm.xlu0 %4176, %v4829_v6   ;;  %4175 = vset.pattern.permute.xlu2 %v4545_v10 }
  0x92   : > { %639 = vperm.xlu2 %4175, %v4811_v3  }
  0x98   : > { %4177 = vset.pattern.permute.xlu1 %v4545_v10 }
  0x99   : > { %647 = vperm.xlu1 %4177, %v4806_v2  }
  0x9a   : > { %651 = vperm.xlu2 %4175, %v4824_v5  }
  0xa1   : > { %655 = vperm.xlu1 %4177, %v4801_v1  }
  0xa2   : > { %659 = vperm.xlu2 %4175, %v4819_v4  }
  0xc0   : > { %v4860_v11 = vpop.permute.xlu2 %411 }
  0xc1   : > { %7904 = vst [vmem:[#allocation22_spill] sm:$0xff] %v4860_v11 }
  0xc8   : > { %v4862_v12 = vpop.permute.xlu2 %416 }
  0xc9   : > { %7905 = vst [vmem:[#allocation23_spill] sm:$0xff] %v4862_v12 }
  0xd2   : > { %v463_v15 = vpop.permute.xlu2 %462 }
  0xd3   : > { %v495_v17 = vmul.f32 %v463_v15, %v4865_v13  ;;  %v494_v18 = vmul.f32 %v463_v15, %v4868_v14  ;;  %v493_v19 = vmul.f32 %v463_v15, %v4871_v16 }
  0xd5   : > { %545 = vrot.lane.b32.xlu1 %v495_v17, %s4546_s29  ;;  %543 = vrot.lane.b32.xlu0 %v494_v18, %s4546_s29 }
  0xd6   : > { %541 = vrot.lane.b32.xlu2 %v493_v19, %s4546_s29  ;;  %v4982_v19 = vld [vmem:[%s4789_s26 + $0x38] sm:$0xff] }
  0xd9   : > { %v4879_v20 = vpop.permute.xlu0 %391  ;;  %v4881_v21 = vpop.permute.xlu1 %401 }
  0xda   : > { %7906 = vst [vmem:[#allocation24_spill] sm:$0xff] %v4879_v20 }
  0xdb   : > { %v475_v42 = vpop.permute.xlu2 %474 }
  0xdc   : > { %v504_v44 = vmul.f32 %v475_v42, %v4922_v40  ;;  %v503_v45 = vmul.f32 %v475_v42, %v4925_v41  ;;  %v502_v46 = vmul.f32 %v475_v42, %v4928_v43 }
  0xe1   : > { %v4883_v22 = vpop.permute.xlu0 %396  ;;  %v4885_v23 = vpop.permute.xlu1 %406 }
  0xe2   : > { %7907 = vst [vmem:[#allocation25_spill] sm:$0xff] %v4885_v23 }
  0xe3   : > { %v483_v54 = vpop.permute.xlu2 %482 }
  0xe4   : > { %v510_v58 = vmul.f32 %v483_v54, %v4952_v55  ;;  %v509_v59 = vmul.f32 %v483_v54, %v4955_v56  ;;  %v508_v60 = vmul.f32 %v483_v54, %v4958_v57 }
  0xe9   : > { %v4887_v24 = vpop.permute.xlu0 %421  ;;  %v4889_v25 = vpop.permute.xlu1 %426 }
  0xea   : > { %7908 = vst [vmem:[#allocation26_spill] sm:$0xff] %v4887_v24 }
  0xeb   : > { %7909 = vst [vmem:[#allocation27_spill] sm:$0xff] %v4889_v25 }
  0xf2   : > { %v467_v29 = vpop.permute.xlu0 %466  ;;  %v471_v35 = vpop.permute.xlu1 %470 }
  0xf3   : > { %v498_v30 = vmul.f32 %v467_v29, %v4892_v26  ;;  %v497_v31 = vmul.f32 %v467_v29, %v4898_v28  ;;  %v496_v32 = vmul.f32 %v467_v29, %v4895_v27  ;;  %v501_v37 = vmul.f32 %v471_v35, %v4907_v33  ;;  %v4985_v29 = vld [vmem:[%s4782_s11 + $0x78] sm:$0xff] }
  0xf4   : > { %v500_v38 = vmul.f32 %v471_v35, %v4910_v34  ;;  %v499_v39 = vmul.f32 %v471_v35, %v4913_v36 }
  0xf5   : > { %551 = vrot.lane.b32.xlu1 %v498_v30, %s4546_s29  ;;  %549 = vrot.lane.b32.xlu0 %v497_v31, %s4546_s29  ;;  %v4988_v30 = vld [vmem:[%s4782_s11 + $0x70] sm:$0xff] }
  0xf6   : > { %547 = vrot.lane.b32.xlu2 %v496_v32, %s4546_s29 }
  0xfa   : > { %v479_v47 = vpop.permute.xlu1 %478  ;;  %v487_v61 = vpop.permute.xlu0 %486 }
  0xfb   : > { %v507_v51 = vmul.f32 %v479_v47, %v4937_v48  ;;  %v506_v52 = vmul.f32 %v479_v47, %v4940_v49  ;;  %v505_v53 = vmul.f32 %v479_v47, %v4943_v50  ;;  %v513_v10 = vmul.f32 %v487_v61, %v4967_v62 }
  0xfc   : > { %v512_v15 = vmul.f32 %v487_v61, %v4970_v63  ;;  %v511_v17 = vmul.f32 %v487_v61, %v4973_v9 }
  0xfd   : > { %557 = vrot.lane.b32.xlu1 %v501_v37, %s4546_s29  ;;  %555 = vrot.lane.b32.xlu0 %v500_v38, %s4546_s29  ;;  %v640_v37 = vpop.permute.xlu2 %639 }
  0xfe   : > { %553 = vrot.lane.b32.xlu2 %v499_v39, %s4546_s29  ;;  %v670_v38 = vmul.f32 %v640_v37, %v4871_v16  ;;  %v672_v39 = vmul.f32 %v640_v37, %v4865_v13  ;;  %v671_v42 = vmul.f32 %v640_v37, %v4868_v14 }
 0x102   : > { %v491_v18 = vpop.permute.xlu1 %490 }
 0x103   : > { %v516_v31 = vmul.f32 %v491_v18, %v4982_v19  ;;  %v515_v32 = vmul.f32 %v491_v18, %v4985_v29  ;;  %v514_v35 = vmul.f32 %v491_v18, %v4988_v30 }
 0x105   : > { %563 = vrot.lane.b32.xlu1 %v504_v44, %s4546_s29  ;;  %561 = vrot.lane.b32.xlu0 %v503_v45, %s4546_s29  ;;  %v644_v44 = vpop.permute.xlu0 %643 }
 0x106   : > { %559 = vrot.lane.b32.xlu2 %v502_v46, %s4546_s29  ;;  %v673_v45 = vmul.f32 %v644_v44, %v4895_v27  ;;  %v675_v47 = vmul.f32 %v644_v44, %v4892_v26 }
 0x10b   : > { %v648_v46 = vpop.permute.xlu1 %647 }
 0x10c   : > { %v678_v54 = vmul.f32 %v648_v46, %v4907_v33 }
 0x10d   : > { %569 = vrot.lane.b32.xlu1 %v507_v51, %s4546_s29  ;;  %567 = vrot.lane.b32.xlu0 %v506_v52, %s4546_s29  ;;  %v674_v51 = vmul.f32 %v644_v44, %v4898_v28  ;;  %v676_v52 = vmul.f32 %v648_v46, %v4913_v36 }
 0x10e   : > { %565 = vrot.lane.b32.xlu2 %v505_v53, %s4546_s29  ;;  %v652_v53 = vpop.permute.xlu2 %651 }
 0x10f   : > { %v681_v61 = vmul.f32 %v652_v53, %v4922_v40 }
 0x115   : > { %575 = vrot.lane.b32.xlu1 %v510_v58, %s4546_s29  ;;  %573 = vrot.lane.b32.xlu0 %v509_v59, %s4546_s29  ;;  %v677_v58 = vmul.f32 %v648_v46, %v4910_v34  ;;  %v679_v59 = vmul.f32 %v652_v53, %v4928_v43 }
 0x116   : > { %571 = vrot.lane.b32.xlu2 %v508_v60, %s4546_s29  ;;  %v656_v60 = vpop.permute.xlu1 %655 }
 0x117   : > { %v684_v18 = vmul.f32 %v656_v60, %v4937_v48 }
 0x11d   : > { %581 = vrot.lane.b32.xlu1 %v513_v10, %s4546_s29  ;;  %579 = vrot.lane.b32.xlu0 %v512_v15, %s4546_s29  ;;  %v680_v10 = vmul.f32 %v652_v53, %v4925_v41  ;;  %v682_v15 = vmul.f32 %v656_v60, %v4943_v50 }
 0x11e   : > { %577 = vrot.lane.b32.xlu2 %v511_v17, %s4546_s29  ;;  %v660_v17 = vpop.permute.xlu2 %659 }
 0x11f   : > { %v686_v37 = vmul.f32 %v660_v17, %v4955_v56 }
 0x125   : > { %587 = vrot.lane.b32.xlu1 %v516_v31, %s4546_s29  ;;  %585 = vrot.lane.b32.xlu0 %v515_v32, %s4546_s29  ;;  %v683_v31 = vmul.f32 %v656_v60, %v4940_v49  ;;  %v685_v32 = vmul.f32 %v660_v17, %v4958_v57 }
 0x126   : > { %583 = vrot.lane.b32.xlu2 %v514_v35, %s4546_s29  ;;  %v687_v35 = vmul.f32 %v660_v17, %v4952_v55  ;;  %v4548_v17 = vmov 3  }
 0x127   : > { %4178 = vset.pattern.permute.xlu2 %v4548_v17 }
 0x12d   : > { %667 = vperm.xlu1 %4177, %v4837_v7   ;;  %663 = vperm.xlu0 %4176, %v4842_v8  }
 0x12e   : > { %718 = vrot.lane.b32.xlu2 %v670_v38, %s4547_s5 }
 0x135   : > { %722 = vrot.lane.b32.xlu1 %v672_v39, %s4547_s5  ;;  %720 = vrot.lane.b32.xlu0 %v671_v42, %s4547_s5 }
 0x136   : > { %724 = vrot.lane.b32.xlu2 %v673_v45, %s4547_s5  ;;  %4180 = vset.pattern.permute.xlu1 %v4548_v17 }
 0x137   : > { %4179 = vset.pattern.permute.xlu0 %v4548_v17 }
 0x13d   : > { %728 = vrot.lane.b32.xlu1 %v675_v47, %s4547_s5  ;;  %726 = vrot.lane.b32.xlu0 %v674_v51, %s4547_s5  ;;  %v5046_v47 = vpop.permute.xlu2 %541 }
 0x13e   : > { %730 = vrot.lane.b32.xlu2 %v676_v52, %s4547_s5 }
 0x145   : > { %734 = vrot.lane.b32.xlu1 %v678_v54, %s4547_s5  ;;  %732 = vrot.lane.b32.xlu0 %v677_v58, %s4547_s5 }
 0x146   : > { %736 = vrot.lane.b32.xlu2 %v679_v59, %s4547_s5 }
 0x147   : > { %v5034_v38 = vpop.permute.xlu1 %545  ;;  %v5036_v39 = vpop.permute.xlu0 %543 }
 0x148   : > { %7910 = vst [vmem:[#allocation28_spill] sm:$0xff] %v5034_v38 }
 0x14d   : > { %740 = vrot.lane.b32.xlu1 %v681_v61, %s4547_s5  ;;  %738 = vrot.lane.b32.xlu0 %v680_v10, %s4547_s5 }
 0x14e   : > { %742 = vrot.lane.b32.xlu2 %v682_v15, %s4547_s5 }
 0x150   : > { %v5056_v58 = vpop.permute.xlu2 %547 }
 0x155   : > { %746 = vrot.lane.b32.xlu1 %v684_v18, %s4547_s5  ;;  %744 = vrot.lane.b32.xlu0 %v683_v31, %s4547_s5 }
 0x156   : > { %748 = vrot.lane.b32.xlu2 %v685_v32, %s4547_s5 }
 0x158   : > { %v5062_v61 = vpop.permute.xlu2 %553 }
 0x15d   : > { %752 = vrot.lane.b32.xlu1 %v687_v35, %s4547_s5  ;;  %750 = vrot.lane.b32.xlu0 %v686_v37, %s4547_s5 }
 0x160   : > { %v5068_v18 = vpop.permute.xlu2 %559 }
 0x161   : > { %7920 = vst [vmem:[#allocation38_spill] sm:$0xff] %v5068_v18 }
 0x167   : > { %v5038_v42 = vpop.permute.xlu1 %551  ;;  %v5040_v44 = vpop.permute.xlu0 %549 }
 0x168   : > { %v5074_v35 = vpop.permute.xlu2 %565 }
 0x169   : > { %7923 = vst [vmem:[#allocation41_spill] sm:$0xff] %v5074_v35 }
 0x16f   : > { %v5042_v45 = vpop.permute.xlu1 %557  ;;  %v5044_v46 = vpop.permute.xlu0 %555 }
 0x170   : > { %7911 = vst [vmem:[#allocation29_spill] sm:$0xff] %v5042_v45 }
 0x177   : > { %v5048_v51 = vpop.permute.xlu1 %563  ;;  %v5050_v52 = vpop.permute.xlu0 %561 }
 0x178   : > { %7912 = vst [vmem:[#allocation30_spill] sm:$0xff] %v5048_v51 }
 0x179   : > { %7913 = vst [vmem:[#allocation31_spill] sm:$0xff] %v5050_v52 }
 0x17f   : > { %v5052_v53 = vpop.permute.xlu1 %569  ;;  %v5054_v54 = vpop.permute.xlu0 %567 }
 0x180   : > { %7914 = vst [vmem:[#allocation32_spill] sm:$0xff] %v5052_v53 }
 0x181   : > { %7915 = vst [vmem:[#allocation33_spill] sm:$0xff] %v5054_v54 }
 0x187   : > { %v5058_v59 = vpop.permute.xlu1 %575  ;;  %v5060_v60 = vpop.permute.xlu0 %573 }
 0x188   : > { %7916 = vst [vmem:[#allocation34_spill] sm:$0xff] %v5058_v59 }
 0x189   : > { %7917 = vst [vmem:[#allocation35_spill] sm:$0xff] %v5060_v60 }
 0x18f   : > { %v5064_v10 = vpop.permute.xlu0 %579  ;;  %v5066_v15 = vpop.permute.xlu1 %581 }
 0x190   : > { %7918 = vst [vmem:[#allocation36_spill] sm:$0xff] %v5064_v10 }
 0x191   : > { %7919 = vst [vmem:[#allocation37_spill] sm:$0xff] %v5066_v15  ;;  %v5084_v15 = vpop.permute.xlu2 %571 }
 0x192   : > { %7924 = vst [vmem:[#allocation42_spill] sm:$0xff] %v5084_v15 }
 0x197   : > { %v5070_v31 = vpop.permute.xlu0 %585  ;;  %v5072_v32 = vpop.permute.xlu1 %587 }
 0x198   : > { %7921 = vst [vmem:[#allocation39_spill] sm:$0xff] %v5070_v31 }
 0x199   : > { %7922 = vst [vmem:[#allocation40_spill] sm:$0xff] %v5072_v32 }
 0x19f   : > { %v664_v37 = vpop.permute.xlu0 %663  ;;  %v668_v17 = vpop.permute.xlu1 %667 }
 0x1a0   : > { %v690_v0 = vmul.f32 %v664_v37, %v4967_v62  ;;  %v689_v25 = vmul.f32 %v664_v37, %v4970_v63  ;;  %v688_v24 = vmul.f32 %v664_v37, %v4973_v9  ;;  %v693_v31 = vmul.f32 %v668_v17, %v4982_v19 }
 0x1a1   : > { %v692_v32 = vmul.f32 %v668_v17, %v4985_v29  ;;  %v691_v10 = vmul.f32 %v668_v17, %v4988_v30 }
 0x1a2   : > { %758 = vrot.lane.b32.xlu1 %v690_v0, %s4547_s5  ;;  %756 = vrot.lane.b32.xlu0 %v689_v25, %s4547_s5  ;;  %v5092_v0 = vpop.permute.xlu2 %577 }
 0x1a3   : > { %754 = vrot.lane.b32.xlu2 %v688_v24, %s4547_s5  ;;  %7925 = vst [vmem:[#allocation43_spill] sm:$0xff] %v5092_v0 }
 0x1a7   : > { %v5110_v37 = vpop.permute.xlu1 %722 }
 0x1a8   : > { %7929 = vst [vmem:[#allocation47_spill] sm:$0xff] %v5110_v37 }
 0x1aa   : > { %764 = vrot.lane.b32.xlu1 %v693_v31, %s4547_s5  ;;  %762 = vrot.lane.b32.xlu0 %v692_v32, %s4547_s5  ;;  %v5098_v24 = vpop.permute.xlu2 %583  ;;  %v5108_v32 = vpop.permute.xlu0 %720 }
 0x1ab   : > { %760 = vrot.lane.b32.xlu2 %v691_v10, %s4547_s5  ;;  %7926 = vst [vmem:[#allocation44_spill] sm:$0xff] %v5098_v24 }
 0x1ac   : > { %7928 = vst [vmem:[#allocation46_spill] sm:$0xff] %v5108_v32 }
 0x1af   : > { %v5116_v12 = vpop.permute.xlu1 %728 }
 0x1b2   : > { %824 = vperm.xlu1 %4180, %v4806_v2   ;;  %820 = vperm.xlu0 %4179, %v4829_v6   ;;  %v5102_v25 = vpop.permute.xlu2 %718  ;;  %v5114_v0 = vpop.permute.xlu0 %726 }
 0x1b3   : > { %816 = vperm.xlu2 %4178, %v4811_v3   ;;  %7927 = vst [vmem:[#allocation45_spill] sm:$0xff] %v5102_v25 }
 0x1b7   : > { %v5122_v15 = vpop.permute.xlu1 %734 }
 0x1b8   : > { %7932 = vst [vmem:[#allocation50_spill] sm:$0xff] %v5122_v15 }
 0x1ba   : > { %832 = vperm.xlu1 %4180, %v4801_v1   ;;  %840 = vperm.xlu0 %4179, %v4842_v8   ;;  %v5104_v10 = vpop.permute.xlu2 %724  ;;  %v5120_v59 = vpop.permute.xlu0 %732 }
 0x1bb   : > { %828 = vperm.xlu2 %4178, %v4824_v5  }
 0x1bf   : > { %v5128_v18 = vpop.permute.xlu1 %740 }
 0x1c0   : > { %7935 = vst [vmem:[#allocation53_spill] sm:$0xff] %v5128_v18 }
 0x1c2   : > { %844 = vperm.xlu1 %4180, %v4837_v7   ;;  %v5106_v31 = vpop.permute.xlu2 %730  ;;  %v5126_v53 = vpop.permute.xlu0 %738 }
 0x1c3   : > { %836 = vperm.xlu2 %4178, %v4819_v4   ;;  %7934 = vst [vmem:[#allocation52_spill] sm:$0xff] %v5126_v53 }
 0x1ca   : > { %v5112_v17 = vpop.permute.xlu2 %736  ;;  %v5132_v35 = vpop.permute.xlu0 %744 }
 0x1cb   : > { %7930 = vst [vmem:[#allocation48_spill] sm:$0xff] %v5112_v17  ;;  %v5134_v17 = vpop.permute.xlu1 %746 }
 0x1cc   : > { %7937 = vst [vmem:[#allocation55_spill] sm:$0xff] %v5132_v35 }
 0x1cd   : > { %7938 = vst [vmem:[#allocation56_spill] sm:$0xff] %v5134_v17 }
 0x1d2   : > { %v5118_v24 = vpop.permute.xlu2 %742  ;;  %v5138_v23 = vpop.permute.xlu0 %750 }
 0x1d3   : > { %7931 = vst [vmem:[#allocation49_spill] sm:$0xff] %v5118_v24  ;;  %v5140_v52 = vpop.permute.xlu1 %752 }
 0x1d4   : > { %7940 = vst [vmem:[#allocation58_spill] sm:$0xff] %v5138_v23 }
 0x1d5   : > { %7941 = vst [vmem:[#allocation59_spill] sm:$0xff] %v5140_v52 }
 0x1da   : > { %v5124_v60 = vpop.permute.xlu2 %748 }
 0x1db   : > { %7933 = vst [vmem:[#allocation51_spill] sm:$0xff] %v5124_v60 }
 0x1fd   : > { %v5130_v11 = vpop.permute.xlu2 %754 }
 0x1fe   : > { %7936 = vst [vmem:[#allocation54_spill] sm:$0xff] %v5130_v11 }
 0x205   : > { %v5136_v54 = vpop.permute.xlu2 %760 }
 0x206   : > { %7939 = vst [vmem:[#allocation57_spill] sm:$0xff] %v5136_v54 }
 0x20d   : > { %v817_v24 = vpop.permute.xlu2 %816 }
 0x20e   : > { %v849_v51 = vmul.f32 %v817_v24, %v4865_v13  ;;  %v848_v60 = vmul.f32 %v817_v24, %v4868_v14  ;;  %v847_v53 = vmul.f32 %v817_v24, %v4871_v16 }
 0x210   : > { %899 = vrot.lane.b32.xlu1 %v849_v51, %s4549_s17  ;;  %897 = vrot.lane.b32.xlu0 %v848_v60, %s4549_s17 }
 0x211   : > { %895 = vrot.lane.b32.xlu2 %v847_v53, %s4549_s17 }
 0x214   : > { %v5148_v11 = vpop.permute.xlu0 %756  ;;  %v5150_v54 = vpop.permute.xlu1 %758 }
 0x215   : > { %7942 = vst [vmem:[#allocation60_spill] sm:$0xff] %v5148_v11 }
 0x216   : > { %7943 = vst [vmem:[#allocation61_spill] sm:$0xff] %v5150_v54 }
 0x21c   : > { %v5152_v23 = vpop.permute.xlu0 %762  ;;  %v5154_v52 = vpop.permute.xlu1 %764 }
 0x21d   : > { %7944 = vst [vmem:[#allocation62_spill] sm:$0xff] %v5152_v23 }
 0x21e   : > { %7945 = vst [vmem:[#allocation63_spill] sm:$0xff] %v5154_v52 }
 0x224   : > { %v821_v17 = vpop.permute.xlu0 %820  ;;  %v825_v51 = vpop.permute.xlu1 %824 }
 0x225   : > { %v852_v35 = vmul.f32 %v821_v17, %v4892_v26  ;;  %v851_v24 = vmul.f32 %v821_v17, %v4898_v28  ;;  %v850_v18 = vmul.f32 %v821_v17, %v4895_v27  ;;  %v855_v53 = vmul.f32 %v825_v51, %v4907_v33  ;;  %v829_v17 = vpop.permute.xlu2 %828 }
 0x226   : > { %v854_v60 = vmul.f32 %v825_v51, %v4910_v34  ;;  %v853_v52 = vmul.f32 %v825_v51, %v4913_v36  ;;  %v4550_v51 = vmov 4  }
 0x227   : > { %905 = vrot.lane.b32.xlu1 %v852_v35, %s4549_s17  ;;  %903 = vrot.lane.b32.xlu0 %v851_v24, %s4549_s17  ;;  %v858_v35 = vmul.f32 %v829_v17, %v4922_v40  ;;  %v857_v24 = vmul.f32 %v829_v17, %v4925_v41 }
 0x228   : > { %901 = vrot.lane.b32.xlu2 %v850_v18, %s4549_s17  ;;  %v856_v18 = vmul.f32 %v829_v17, %v4928_v43  ;;  %4183 = vset.pattern.permute.xlu1 %v4550_v51 }
 0x229   : > { %4182 = vset.pattern.permute.xlu0 %v4550_v51  ;;  %4181 = vset.pattern.permute.xlu2 %v4550_v51 }
 0x22c   : > { %v841_v51 = vpop.permute.xlu0 %840 }
 0x22d   : > { %v837_v17 = vpop.permute.xlu2 %836 }
 0x22f   : > { %911 = vrot.lane.b32.xlu1 %v855_v53, %s4549_s17  ;;  %909 = vrot.lane.b32.xlu0 %v854_v60, %s4549_s17  ;;  %v833_v53 = vpop.permute.xlu1 %832 }
 0x230   : > { %907 = vrot.lane.b32.xlu2 %v853_v52, %s4549_s17  ;;  %v861_v52 = vmul.f32 %v833_v53, %v4937_v48  ;;  %v860_v60 = vmul.f32 %v833_v53, %v4940_v49  ;;  %v859_v23 = vmul.f32 %v833_v53, %v4943_v50  ;;  %v867_v53 = vmul.f32 %v841_v51, %v4967_v62 }
 0x237   : > { %917 = vrot.lane.b32.xlu1 %v858_v35, %s4549_s17  ;;  %915 = vrot.lane.b32.xlu0 %v857_v24, %s4549_s17  ;;  %v864_v35 = vmul.f32 %v837_v17, %v4952_v55  ;;  %v863_v24 = vmul.f32 %v837_v17, %v4955_v56 }
 0x238   : > { %913 = vrot.lane.b32.xlu2 %v856_v18, %s4549_s17  ;;  %v862_v18 = vmul.f32 %v837_v17, %v4958_v57 }
 0x23f   : > { %923 = vrot.lane.b32.xlu1 %v861_v52, %s4549_s17  ;;  %921 = vrot.lane.b32.xlu0 %v860_v60, %s4549_s17  ;;  %v866_v52 = vmul.f32 %v841_v51, %v4970_v63  ;;  %v845_v60 = vpop.permute.xlu1 %844 }
 0x240   : > { %919 = vrot.lane.b32.xlu2 %v859_v23, %s4549_s17  ;;  %v865_v23 = vmul.f32 %v841_v51, %v4973_v9  ;;  %v870_v17 = vmul.f32 %v845_v60, %v4982_v19 }
 0x247   : > { %929 = vrot.lane.b32.xlu1 %v864_v35, %s4549_s17  ;;  %927 = vrot.lane.b32.xlu0 %v863_v24, %s4549_s17  ;;  %v869_v35 = vmul.f32 %v845_v60, %v4985_v29  ;;  %v868_v24 = vmul.f32 %v845_v60, %v4988_v30 }
 0x248   : > { %925 = vrot.lane.b32.xlu2 %v862_v18, %s4549_s17 }
 0x24f   : > { %935 = vrot.lane.b32.xlu1 %v867_v53, %s4549_s17  ;;  %933 = vrot.lane.b32.xlu0 %v866_v52, %s4549_s17 }
 0x250   : > { %931 = vrot.lane.b32.xlu2 %v865_v23, %s4549_s17 }
 0x257   : > { %941 = vrot.lane.b32.xlu1 %v870_v17, %s4549_s17  ;;  %939 = vrot.lane.b32.xlu0 %v869_v35, %s4549_s17 }
 0x258   : > { %937 = vrot.lane.b32.xlu2 %v868_v24, %s4549_s17 }
 0x25f   : > { %1001 = vperm.xlu1 %4183, %v4806_v2   ;;  %997 = vperm.xlu0 %4182, %v4829_v6  }
 0x260   : > { %993 = vperm.xlu2 %4181, %v4811_v3  }
 0x267   : > { %1009 = vperm.xlu1 %4183, %v4801_v1   ;;  %1017 = vperm.xlu0 %4182, %v4842_v8  }
 0x268   : > { %1005 = vperm.xlu2 %4181, %v4824_v5  }
 0x26b   : > { %v5206_v18 = vpop.permute.xlu2 %895 }
 0x26c   : > { %7946 = vst [vmem:[#allocation64_spill] sm:$0xff] %v5206_v18 }
 0x26f   : > { %1021 = vperm.xlu1 %4183, %v4837_v7  }
 0x270   : > { %1013 = vperm.xlu2 %4181, %v4819_v4  }
 0x282   : > { %v5208_v51 = vpop.permute.xlu2 %901  ;;  %v5212_v52 = vpop.permute.xlu1 %899 }
 0x283   : > { %7947 = vst [vmem:[#allocation65_spill] sm:$0xff] %v5212_v52  ;;  %v5214_v23 = vpop.permute.xlu0 %897 }
 0x284   : > { %7948 = vst [vmem:[#allocation66_spill] sm:$0xff] %v5214_v23 }
 0x28a   : > { %v5210_v53 = vpop.permute.xlu2 %907 }
 0x292   : > { %v5216_v60 = vpop.permute.xlu2 %913 }
 0x293   : > { %7949 = vst [vmem:[#allocation67_spill] sm:$0xff] %v5216_v60 }
 0x299   : > { %v5218_v17 = vpop.permute.xlu1 %905  ;;  %v5220_v35 = vpop.permute.xlu0 %903 }
 0x29a   : > { %v5222_v24 = vpop.permute.xlu2 %919 }
 0x29b   : > { %7950 = vst [vmem:[#allocation68_spill] sm:$0xff] %v5222_v24 }
 0x2a1   : > { %v5224_v54 = vpop.permute.xlu1 %911  ;;  %v5226_v11 = vpop.permute.xlu0 %909 }
 0x2a2   : > { %7951 = vst [vmem:[#allocation69_spill] sm:$0xff] %v5224_v54  ;;  %v5228_v37 = vpop.permute.xlu2 %925 }
 0x2a3   : > { %7952 = vst [vmem:[#allocation70_spill] sm:$0xff] %v5228_v37 }
 0x2a9   : > { %v5230_v38 = vpop.permute.xlu1 %917  ;;  %v5232_v18 = vpop.permute.xlu0 %915 }
 0x2aa   : > { %7953 = vst [vmem:[#allocation71_spill] sm:$0xff] %v5230_v38  ;;  %v5234_v52 = vpop.permute.xlu2 %931 }
 0x2ab   : > { %7954 = vst [vmem:[#allocation72_spill] sm:$0xff] %v5232_v18 }
 0x2ac   : > { %7955 = vst [vmem:[#allocation73_spill] sm:$0xff] %v5234_v52 }
 0x2b1   : > { %v5236_v23 = vpop.permute.xlu1 %923  ;;  %v5238_v60 = vpop.permute.xlu0 %921 }
 0x2b2   : > { %7956 = vst [vmem:[#allocation74_spill] sm:$0xff] %v5236_v23  ;;  %v5240_v15 = vpop.permute.xlu2 %937 }
 0x2b3   : > { %7957 = vst [vmem:[#allocation75_spill] sm:$0xff] %v5238_v60 }
 0x2b4   : > { %7958 = vst [vmem:[#allocation76_spill] sm:$0xff] %v5240_v15 }
 0x2b9   : > { %v5242_v25 = vpop.permute.xlu1 %929  ;;  %v5244_v24 = vpop.permute.xlu0 %927 }
 0x2ba   : > { %7959 = vst [vmem:[#allocation77_spill] sm:$0xff] %v5242_v25  ;;  %v994_v54 = vpop.permute.xlu2 %993  ;;  %v4552_v25 = vmov 5  }
 0x2bb   : > { %7960 = vst [vmem:[#allocation78_spill] sm:$0xff] %v5244_v24  ;;  %v1026_v32 = vmul.f32 %v994_v54, %v4865_v13  ;;  %v1025_v37 = vmul.f32 %v994_v54, %v4868_v14  ;;  %v1024_v38 = vmul.f32 %v994_v54, %v4871_v16  ;;  %4184 = vset.pattern.permute.xlu1 %v4552_v25 }
 0x2bc   : > { %4186 = vset.pattern.permute.xlu0 %v4552_v25  ;;  %4185 = vset.pattern.permute.xlu2 %v4552_v25 }
 0x2bd   : > { %1076 = vrot.lane.b32.xlu1 %v1026_v32, %s4551_s6  ;;  %1074 = vrot.lane.b32.xlu0 %v1025_v37, %s4551_s6 }
 0x2be   : > { %1072 = vrot.lane.b32.xlu2 %v1024_v38, %s4551_s6 }
 0x2c1   : > { %v5252_v52 = vpop.permute.xlu0 %933  ;;  %v5254_v15 = vpop.permute.xlu1 %935 }
 0x2c2   : > { %7961 = vst [vmem:[#allocation79_spill] sm:$0xff] %v5252_v52 }
 0x2c3   : > { %7962 = vst [vmem:[#allocation80_spill] sm:$0xff] %v5254_v15 }
 0x2c9   : > { %v5256_v24 = vpop.permute.xlu0 %939  ;;  %v5258_v23 = vpop.permute.xlu1 %941 }
 0x2ca   : > { %7963 = vst [vmem:[#allocation81_spill] sm:$0xff] %v5256_v24 }
 0x2cb   : > { %7964 = vst [vmem:[#allocation82_spill] sm:$0xff] %v5258_v23 }
 0x2d1   : > { %v998_v54 = vpop.permute.xlu0 %997  ;;  %v1002_v38 = vpop.permute.xlu1 %1001 }
 0x2d2   : > { %v1029_v60 = vmul.f32 %v998_v54, %v4892_v26  ;;  %v1028_v32 = vmul.f32 %v998_v54, %v4898_v28  ;;  %v1027_v37 = vmul.f32 %v998_v54, %v4895_v27  ;;  %v1032_v15 = vmul.f32 %v1002_v38, %v4907_v33  ;;  %v5272_v54 = vpop.permute.xlu2 %1005 }
 0x2d3   : > { %v1031_v24 = vmul.f32 %v1002_v38, %v4910_v34  ;;  %v1030_v23 = vmul.f32 %v1002_v38, %v4913_v36 }
 0x2d4   : > { %1082 = vrot.lane.b32.xlu1 %v1029_v60, %s4551_s6  ;;  %1080 = vrot.lane.b32.xlu0 %v1028_v32, %s4551_s6  ;;  %v1034_v60 = vmul.f32 %v5272_v54, %v4925_v41  ;;  %v1033_v32 = vmul.f32 %v5272_v54, %v4928_v43 }
 0x2d5   : > { %1078 = vrot.lane.b32.xlu2 %v1027_v37, %s4551_s6 }
 0x2dc   : > { %1088 = vrot.lane.b32.xlu1 %v1032_v15, %s4551_s6  ;;  %1086 = vrot.lane.b32.xlu0 %v1031_v24, %s4551_s6  ;;  %v4553_v15 = vmov 6  }
 0x2dd   : > { %1084 = vrot.lane.b32.xlu2 %v1030_v23, %s4551_s6  ;;  %v5298_v23 = vpop.permute.xlu2 %1013 }
 0x2e4   : > { %1170 = vperm.xlu1 %4184, %v4811_v3   ;;  %1092 = vrot.lane.b32.xlu0 %v1034_v60, %s4551_s6 }
 0x2e5   : > { %1090 = vrot.lane.b32.xlu2 %v1033_v32, %s4551_s6 }
 0x2ec   : > { %1178 = vperm.xlu0 %4186, %v4806_v2   ;;  %4187 = vset.pattern.permute.xlu1 %v4553_v15 }
 0x2ed   : > { %1347 = vperm.xlu1 %4187, %v4811_v3   ;;  %1174 = vperm.xlu2 %4185, %v4829_v6  }
 0x2f4   : > { %1186 = vperm.xlu0 %4186, %v4801_v1  }
 0x2f5   : > { %4189 = vset.pattern.permute.xlu1 %v4552_v25  ;;  %4188 = vset.pattern.permute.xlu2 %v4553_v15 }
 0x2f6   : > { %1182 = vperm.xlu1 %4189, %v4824_v5   ;;  %1351 = vperm.xlu2 %4188, %v4829_v6  }
 0x2fc   : > { %4192 = vset.pattern.permute.xlu0 %v4553_v15 }
 0x2fd   : > { %1363 = vperm.xlu0 %4192, %v4801_v1   ;;  %v5296_v1 = vpop.permute.xlu1 %1009 }
 0x2fe   : > { %1355 = vperm.xlu2 %4188, %v4806_v2   ;;  %4190 = vset.pattern.permute.xlu1 %v4553_v15 }
 0x2ff   : > { %1359 = vperm.xlu1 %4190, %v4824_v5  }
 0x305   : > { %1375 = vperm.xlu0 %4192, %v4837_v7   ;;  %v5302_v24 = vpop.permute.xlu1 %1021 }
 0x306   : > { %4191 = vset.pattern.permute.xlu2 %v4552_v25 }
 0x307   : > { %4193 = vset.pattern.permute.xlu1 %v4552_v25  ;;  %1190 = vperm.xlu2 %4191, %v4819_v4   ;;  %v5304_v25 = vpop.permute.xlu0 %1017 }
 0x308   : > { %1194 = vperm.xlu1 %4193, %v4842_v8  }
 0x30f   : > { %4194 = vset.pattern.permute.xlu2 %v4553_v15 }
 0x310   : > { %1198 = vperm.xlu1 %4193, %v4837_v7   ;;  %1367 = vperm.xlu2 %4194, %v4819_v4  }
 0x318   : > { %1371 = vperm.xlu2 %4194, %v4842_v8   ;;  %v5300_v5 = vpop.permute.xlu2 %1072 }
 0x319   : > { %7965 = vst [vmem:[#allocation83_spill] sm:$0xff] %v5300_v5 }
 0x32f   : > { %v5306_v37 = vpop.permute.xlu1 %1076  ;;  %v5308_v38 = vpop.permute.xlu2 %1078 }
 0x330   : > { %7966 = vst [vmem:[#allocation84_spill] sm:$0xff] %v5306_v37  ;;  %v5310_v60 = vpop.permute.xlu0 %1074 }
 0x331   : > { %7967 = vst [vmem:[#allocation85_spill] sm:$0xff] %v5310_v60 }
 0x337   : > { %v5316_v8 = vpop.permute.xlu2 %1084 }
 0x338   : > { %7968 = vst [vmem:[#allocation86_spill] sm:$0xff] %v5316_v8 }
 0x33f   : > { %v5322_v52 = vpop.permute.xlu2 %1090 }
 0x340   : > { %7970 = vst [vmem:[#allocation88_spill] sm:$0xff] %v5322_v52 }
 0x346   : > { %v5312_v7 = vpop.permute.xlu1 %1082  ;;  %v5314_v4 = vpop.permute.xlu0 %1080 }
 0x34e   : > { %v5318_v32 = vpop.permute.xlu1 %1088  ;;  %v5320_v15 = vpop.permute.xlu0 %1086 }
 0x34f   : > { %7969 = vst [vmem:[#allocation87_spill] sm:$0xff] %v5318_v32  ;;  %v1175_v32 = vpop.permute.xlu2 %1174 }
 0x350   : > { %v1204_v20 = vmul.f32 %v1175_v32, %v4895_v27  ;;  %v1206_v52 = vmul.f32 %v1175_v32, %v4892_v26  ;;  %v1205_v8 = vmul.f32 %v1175_v32, %v4898_v28 }
 0x356   : > { %v1171_v18 = vpop.permute.xlu1 %1170  ;;  %v5329_v60 = vpop.permute.xlu0 %1092 }
 0x357   : > { %v1201_v5 = vmul.f32 %v1171_v18, %v4871_v16  ;;  %v1203_v37 = vmul.f32 %v1171_v18, %v4865_v13  ;;  %v1202_v45 = vmul.f32 %v1171_v18, %v4868_v14 }
 0x359   : > { %1249 = vrot.lane.b32.xlu1 %v1201_v5, %s4554_s14  ;;  %1253 = vrot.lane.b32.xlu0 %v1203_v37, %s4554_s14 }
 0x35a   : > { %1251 = vrot.lane.b32.xlu2 %v1202_v45, %s4554_s14  ;;  %v1035_v45 = vmul.f32 %v5272_v54, %v4922_v40  ;;  %v1352_v54 = vpop.permute.xlu2 %1351 }
 0x35e   : > { %v1179_v18 = vpop.permute.xlu0 %1178 }
 0x35f   : > { %v1208_v5 = vmul.f32 %v1179_v18, %v4910_v34  ;;  %v1207_v37 = vmul.f32 %v1179_v18, %v4913_v36  ;;  %v1348_v32 = vpop.permute.xlu1 %1347 }
 0x361   : > { %1259 = vrot.lane.b32.xlu0 %v1206_v52, %s4554_s14  ;;  %1255 = vrot.lane.b32.xlu1 %v1204_v20, %s4554_s14  ;;  %v1209_v52 = vmul.f32 %v1179_v18, %v4907_v33  ;;  %v1379_v20 = vmul.f32 %v1348_v32, %v4868_v14  ;;  %v1382_v18 = vmul.f32 %v1352_v54, %v4898_v28 }
 0x362   : > { %1257 = vrot.lane.b32.xlu2 %v1205_v8, %s4554_s14  ;;  %v1378_v8 = vmul.f32 %v1348_v32, %v4871_v16  ;;  %v1381_v14 = vmul.f32 %v1352_v54, %v4895_v27  ;;  %v1383_v16 = vmul.f32 %v1352_v54, %v4892_v26  ;;  %v1038_v26 = vmul.f32 %v5296_v1, %v4937_v48 }
 0x369   : > { %1094 = vrot.lane.b32.xlu1 %v1035_v45, %s4551_s6  ;;  %1263 = vrot.lane.b32.xlu0 %v1208_v5, %s4554_s14  ;;  %v4556_v45 = vmov 7   ;;  %v1380_v5 = vmul.f32 %v1348_v32, %v4865_v13  ;;  %v1183_v13 = vpop.permute.xlu1 %1182 }
 0x36a   : > { %1261 = vrot.lane.b32.xlu2 %v1207_v37, %s4554_s14  ;;  %4196 = vset.pattern.permute.xlu0 %v4556_v45  ;;  %v1037_v37 = vmul.f32 %v5296_v1, %v4940_v49  ;;  %v1211_v32 = vmul.f32 %v1183_v13, %v4925_v41  ;;  %v1212_v54 = vmul.f32 %v1183_v13, %v4922_v40 }
 0x36b   : > { %4195 = vset.pattern.permute.xlu2 %v4556_v45  ;;  %4197 = vset.pattern.permute.xlu1 %v4556_v45 }
 0x371   : > { %1265 = vrot.lane.b32.xlu1 %v1209_v52, %s4554_s14  ;;  %1428 = vrot.lane.b32.xlu0 %v1379_v20, %s4555_s21  ;;  %v1036_v52 = vmul.f32 %v5296_v1, %v4943_v50  ;;  %v1210_v20 = vmul.f32 %v1183_v13, %v4928_v43 }
 0x372   : > { %1426 = vrot.lane.b32.xlu2 %v1378_v8, %s4555_s21  ;;  %v1356_v8 = vpop.permute.xlu2 %1355 }
 0x373   : > { %v1385_v45 = vmul.f32 %v1356_v8, %v4910_v34 }
 0x379   : > { %1430 = vrot.lane.b32.xlu1 %v1380_v5, %s4555_s21  ;;  %1434 = vrot.lane.b32.xlu0 %v1382_v18, %s4555_s21  ;;  %v1384_v5 = vmul.f32 %v1356_v8, %v4913_v36  ;;  %v1386_v18 = vmul.f32 %v1356_v8, %v4907_v33  ;;  %v1041_v33 = vmul.f32 %v5298_v23, %v4952_v55 }
 0x37a   : > { %1432 = vrot.lane.b32.xlu2 %v1381_v14, %s4555_s21  ;;  %v1191_v1 = vpop.permute.xlu2 %1190  ;;  %v1187_v14 = vpop.permute.xlu0 %1186  ;;  %v1042_v8 = vmul.f32 %v5304_v25, %v4973_v9 }
 0x381   : > { %1436 = vrot.lane.b32.xlu1 %v1383_v16, %s4555_s21  ;;  %1098 = vrot.lane.b32.xlu0 %v1037_v37, %s4551_s6  ;;  %v1039_v16 = vmul.f32 %v5298_v23, %v4958_v57  ;;  %v1214_v37 = vmul.f32 %v1187_v14, %v4940_v49 }
 0x382   : > { %1096 = vrot.lane.b32.xlu2 %v1036_v52, %s4551_s6  ;;  %v1040_v52 = vmul.f32 %v5298_v23, %v4955_v56  ;;  %v5387_v13 = vpop.permute.xlu2 %1367 }
 0x389   : > { %1100 = vrot.lane.b32.xlu1 %v1038_v26, %s4551_s6  ;;  %1269 = vrot.lane.b32.xlu0 %v1211_v32, %s4554_s14  ;;  %v1213_v32 = vmul.f32 %v1187_v14, %v4943_v50 }
 0x38a   : > { %1267 = vrot.lane.b32.xlu2 %v1210_v20, %s4554_s14  ;;  %v5399_v20 = vpop.permute.xlu2 %1371 }
 0x391   : > { %1271 = vrot.lane.b32.xlu1 %v1212_v54, %s4554_s14  ;;  %1440 = vrot.lane.b32.xlu0 %v1385_v45, %s4555_s21  ;;  %v1216_v54 = vmul.f32 %v1191_v1, %v4958_v57  ;;  %v1044_v57 = vmul.f32 %v5304_v25, %v4967_v62 }
 0x392   : > { %1438 = vrot.lane.b32.xlu2 %v1384_v5, %s4555_s21  ;;  %v1364_v5 = vpop.permute.xlu0 %1363 }
 0x399   : > { %1442 = vrot.lane.b32.xlu1 %v1386_v18, %s4555_s21  ;;  %1528 = vperm.xlu0 %4196, %v4829_v6   ;;  %v1360_v6 = vpop.permute.xlu1 %1359 }
 0x39a   : > { %1524 = vperm.xlu2 %4195, %v4811_v3   ;;  %v1388_v3 = vmul.f32 %v1360_v6, %v4925_v41  ;;  %v1387_v26 = vmul.f32 %v1360_v6, %v4928_v43  ;;  %v1215_v41 = vmul.f32 %v1187_v14, %v4937_v48  ;;  %v1389_v45 = vmul.f32 %v1360_v6, %v4922_v40  ;;  %v5424_v40 = vpop.permute.xlu0 %1375  ;;  %v5440_v6 = vld [vmem:[%s7783_s2 + $0x18] sm:$0xff] }
 0x39b   : > { %v1390_v14 = vmul.f32 %v1364_v5, %v4943_v50  ;;  %v1217_v50 = vmul.f32 %v1191_v1, %v4955_v56  ;;  %v431_v56 = vmul.f32 %v4883_v22, %v4895_v27  ;;  %v770_v27 = vsel %vm766_vm2, %v5114_v0, %v5116_v12 }
 0x39c   : > { %v1047_v12 = vmul.f32 %v5302_v24, %v4982_v19  ;;  %v433_v19 = vmul.f32 %v4881_v21, %v4913_v36  ;;  %v948_v36 = vsel %vm943_vm3, %v5210_v53, %v5226_v11  ;;  %v7972_v53 = vld [vmem:[#allocation24_spill] sm:$0xff] }
 0x3a1   : > { %1102 = vrot.lane.b32.xlu1 %v1039_v16, %s4551_s6  ;;  %1275 = vrot.lane.b32.xlu0 %v1214_v37, %s4554_s14  ;;  %v5412_v18 = vpop.permute.xlu1 %1194  ;;  %v1043_v16 = vmul.f32 %v5304_v25, %v4970_v63  ;;  %v592_v25 = vsel %vm589_vm0, %v5056_v58, %v5040_v44  ;;  %v432_v58 = vmul.f32 %v4883_v22, %v4898_v28 }
 0x3a2   : > { %1104 = vrot.lane.b32.xlu2 %v1040_v52, %s4551_s6  ;;  %v1218_v52 = vmul.f32 %v1191_v1, %v4952_v55  ;;  %v593_v1 = vsel %vm589_vm0, %v5040_v44, %v5038_v42  ;;  %v946_v28 = vsel %vm943_vm3, %v5208_v51, %v5220_v35  ;;  %v1392_v51 = vmul.f32 %v1364_v5, %v4937_v48 }
 0x3a3   : > { %v625_v44 = vadd.f32 %v593_v1, %v432_v58  ;;  %v1046_v1 = vmul.f32 %v5302_v24, %v4985_v29  ;;  %v7971_v58 = vld [vmem:[#allocation86_spill] sm:$0xff] }
 0x3a9   : > { %1106 = vrot.lane.b32.xlu1 %v1041_v33, %s4551_s6  ;;  %1446 = vrot.lane.b32.xlu0 %v1388_v3, %s4555_s21  ;;  %v5427_v37 = vpop.permute.xlu1 %1198  ;;  %v769_v3 = vsel %vm766_vm2, %v5104_v10, %v5114_v0  ;;  %v947_v10 = vsel %vm943_vm3, %v5220_v35, %v5218_v17  ;;  %v1391_v0 = vmul.f32 %v1364_v5, %v4940_v49 }
 0x3aa   : > { %1273 = vrot.lane.b32.xlu2 %v1213_v32, %s4554_s14  ;;  %v594_v49 = vsel %vm589_vm0, %v5062_v61, %v5044_v46 }
 0x3b1   : > { %1277 = vrot.lane.b32.xlu1 %v1215_v41, %s4554_s14  ;;  %1108 = vrot.lane.b32.xlu0 %v1042_v8, %s4551_s6  ;;  %v802_v41 = vadd.f32 %v770_v27, %v625_v44  ;;  %v7975_v44 = vld [vmem:[#allocation45_spill] sm:$0xff] }
 0x3b2   : > { %1444 = vrot.lane.b32.xlu2 %v1387_v26, %s4555_s21  ;;  %v624_v26 = vadd.f32 %v592_v25, %v431_v56  ;;  %v1045_v56 = vmul.f32 %v5302_v24, %v4988_v30 }
 0x3b4   : > { %v5408_v23 = vpop.permute.xlu2 %1251  ;;  %v801_v22 = vadd.f32 %v769_v3, %v624_v26  ;;  %v1125_v3 = vsel %vm1120_vm4, %v7971_v58, %v5320_v15  ;;  %v7985_v58 = vld [vmem:[#allocation65_spill] sm:$0xff] }
 0x3b9   : > { %1448 = vrot.lane.b32.xlu1 %v1389_v45, %s4555_s21  ;;  %1279 = vrot.lane.b32.xlu0 %v1216_v54, %s4554_s14  ;;  %v1123_v54 = vsel %vm1120_vm4, %v5308_v38, %v5314_v4  ;;  %v1124_v45 = vsel %vm1120_vm4, %v5314_v4, %v5312_v7  ;;  %v771_v7 = vsel %vm766_vm2, %v5106_v31, %v5120_v59 }
 0x3ba   : > { %1532 = vperm.xlu2 %4195, %v4806_v2   ;;  %v1221_v31 = vmul.f32 %v5412_v18, %v4967_v62  ;;  %v7973_v62 = vld [vmem:[#allocation29_spill] sm:$0xff] }
 0x3bb   : > { %v595_v30 = vsel %vm589_vm0, %v5044_v46, %v7973_v62  ;;  %v7978_v46 = vld [vmem:[#allocation64_spill] sm:$0xff] }
 0x3bc   : > { %v1258_v43 = vpop.permute.xlu2 %1257 }
 0x3c1   : > { %1110 = vrot.lane.b32.xlu1 %v1043_v16, %s4551_s6  ;;  %1450 = vrot.lane.b32.xlu0 %v1390_v14, %s4555_s21  ;;  %v978_v14 = vadd.f32 %v946_v28, %v801_v22  ;;  %v979_v16 = vadd.f32 %v947_v10, %v802_v41  ;;  %v434_v22 = vmul.f32 %v4881_v21, %v4910_v34 }
 0x3c2   : > { %1112 = vrot.lane.b32.xlu2 %v1044_v57, %s4551_s6  ;;  %v626_v57 = vadd.f32 %v594_v49, %v433_v19  ;;  %v7979_v19 = vld [vmem:[#allocation69_spill] sm:$0xff] }
 0x3c3   : > { %v1155_v17 = vadd.f32 %v1123_v54, %v978_v14  ;;  %v1156_v35 = vadd.f32 %v1124_v45, %v979_v16  ;;  %v7977_v45 = vld [vmem:[#allocation66_spill] sm:$0xff]  ;;  %v627_v21 = vadd.f32 %v595_v30, %v434_v22  ;;  %v5583_v22 = vld [vmem:[%s4782_s11 + $0x50] sm:$0xff] }
 0x3c4   : > { %v5429_v2 = vpop.permute.xlu2 %1261  ;;  %v803_v25 = vadd.f32 %v771_v7, %v626_v57 }
 0x3c6   : > { %v980_v27 = vadd.f32 %v948_v36, %v803_v25  ;;  %v7983_v36 = vld [vmem:[#allocation87_spill] sm:$0xff]  ;;  %v1220_v25 = vmul.f32 %v5412_v18, %v4970_v63 }
 0x3c8   : > { %v1157_v10 = vadd.f32 %v1125_v3, %v980_v27  ;;  %v945_v3 = vsel %vm943_vm3, %v7977_v45, %v7985_v58  ;;  %v7992_v58 = vld [vmem:[#allocation71_spill] sm:$0xff] }
 0x3c9   : > { %1281 = vrot.lane.b32.xlu1 %v1217_v50, %s4554_s14  ;;  %1536 = vperm.xlu0 %4196, %v5440_v6  }
 0x3ca   : > { %1283 = vrot.lane.b32.xlu2 %v1218_v52, %s4554_s14 }
 0x3cb   : > { %v5454_v33 = vpop.permute.xlu1 %1249  ;;  %v1254_v32 = vpop.permute.xlu0 %1253 }
 0x3cc   : > { %v5459_v8 = vpop.permute.xlu2 %1426  ;;  %v5463_v42 = vsel %vm1297_vm1, %v5408_v23, %v1254_v32  ;;  %v4286_v32 = vld [vmem:[%s4782_s11] sm:$0xff] }
 0x3cd   : > { %v429_v26 = vmul.f32 %v4286_v32, %v7972_v53 }
 0x3d1   : > { %1452 = vrot.lane.b32.xlu1 %v1391_v0, %s4555_s21  ;;  %1118 = vrot.lane.b32.xlu0 %v1047_v12, %s4551_s6  ;;  %v7976_v0 = vld [vmem:[#allocation50_spill] sm:$0xff] }
 0x3d2   : > { %1454 = vrot.lane.b32.xlu2 %v1392_v51, %s4555_s21  ;;  %v772_v54 = vsel %vm766_vm2, %v5120_v59, %v7976_v0  ;;  %v944_v51 = vsel %vm943_vm3, %v7978_v46, %v7977_v45  ;;  %v7981_v59 = vld [vmem:[#allocation83_spill] sm:$0xff] }
 0x3d3   : > { %v1256_v38 = vpop.permute.xlu1 %1255  ;;  %v1260_v48 = vpop.permute.xlu0 %1259 }
 0x3d4   : > { %v1300_v4 = vsel %vm1297_vm1, %v1256_v38, %v1258_v43  ;;  %v5493_v5 = vpop.permute.xlu2 %1432  ;;  %v1301_v61 = vsel %vm1297_vm1, %v1258_v43, %v1260_v48  ;;  %v590_v43 = vsel %vm589_vm0, %v5046_v47, %v5036_v39  ;;  %v7974_v47 = vld [vmem:[#allocation46_spill] sm:$0xff]  ;;  %v804_v48 = vadd.f32 %v772_v54, %v627_v21 }
 0x3d5   : > { %v5496_v50 = vadd.f32 %v1300_v4, %v1155_v17  ;;  %v5498_v52 = vadd.f32 %v1301_v61, %v1156_v35  ;;  %v767_v24 = vsel %vm766_vm2, %v7975_v44, %v7974_v47  ;;  %v622_v28 = vadd.f32 %v590_v43, %v429_v26  ;;  %v7980_v35 = vld [vmem:[#allocation85_spill] sm:$0xff]  ;;  %v7982_v61 = vld [vmem:[#allocation28_spill] sm:$0xff] }
 0x3d6   : > { %v949_v17 = vsel %vm943_vm3, %v5226_v11, %v7979_v19  ;;  %v1121_v38 = vsel %vm1120_vm4, %v7981_v59, %v7980_v35  ;;  %v1395_v4 = vmul.f32 %v5387_v13, %v4952_v55  ;;  %v591_v57 = vsel %vm589_vm0, %v5036_v39, %v7982_v61  ;;  %v7984_v39 = vld [vmem:[#allocation47_spill] sm:$0xff]  ;;  %v4293_v61 = vld [vmem:[%s4789_s26 + $0x38] sm:$0xff] }
 0x3d7   : > { %v799_v34 = vadd.f32 %v767_v24, %v622_v28  ;;  %v1126_v11 = vsel %vm1120_vm4, %v5320_v15, %v7983_v36  ;;  %v981_v43 = vadd.f32 %v949_v17, %v804_v48  ;;  %v768_v15 = vsel %vm766_vm2, %v7974_v47, %v7984_v39  ;;  %v7986_v47 = vld [vmem:[#allocation84_spill] sm:$0xff]  ;;  %v7990_v39 = vld [vmem:[#allocation53_spill] sm:$0xff] }
 0x3d8   : > { %v1122_v44 = vsel %vm1120_vm4, %v7980_v35, %v7986_v47  ;;  %v1393_v28 = vmul.f32 %v5583_v22, %v5387_v13  ;;  %v5610_v17 = vld [vmem:[%s4782_s11 + $0x70] sm:$0xff] }
 0x3d9   : > { %1114 = vrot.lane.b32.xlu1 %v1045_v56, %s4551_s6  ;;  %1289 = vrot.lane.b32.xlu0 %v1221_v31, %s4554_s14  ;;  %v976_v7 = vadd.f32 %v944_v51, %v799_v34  ;;  %v1298_v56 = vsel %vm1297_vm1, %v5454_v33, %v5408_v23  ;;  %v4287_v31 = vld [vmem:[%s4782_s11 + $0x8] sm:$0xff]  ;;  %v1399_v36 = vmul.f32 %v5610_v17, %v5424_v40 }
 0x3da   : > { %1116 = vrot.lane.b32.xlu2 %v1046_v1, %s4551_s6  ;;  %v430_v55 = vmul.f32 %v4287_v31, %v7972_v53  ;;  %v5605_v34 = vld [vmem:[%s4782_s11 + $0x68] sm:$0xff]  ;;  %v7989_v31 = vld [vmem:[#allocation25_spill] sm:$0xff]  ;;  %s8246_s6 = sld [smem:[#allocation105_spill]] }
 0x3db   : > { %v5528_v41 = vpop.permute.xlu1 %1094  ;;  %v1264_v12 = vpop.permute.xlu0 %1263  ;;  %v1397_v19 = vmul.f32 %v5605_v34, %v5399_v20 }
 0x3dc   : > { %v5536_v14 = vpop.permute.xlu2 %1096  ;;  %v1302_v16 = vsel %vm1297_vm1, %v5429_v2, %v1264_v12  ;;  %v1219_v2 = vmul.f32 %v5412_v18, %v4973_v9  ;;  %v1153_v9 = vadd.f32 %v1121_v38, %v976_v7  ;;  %v623_v63 = vadd.f32 %v591_v57, %v430_v55 }
 0x3dd   : > { %v5540_v49 = vadd.f32 %v1302_v16, %v1157_v10  ;;  %v1158_v18 = vadd.f32 %v1126_v11, %v981_v43  ;;  %v1223_v10 = vmul.f32 %v5427_v37, %v4985_v29  ;;  %v1224_v57 = vmul.f32 %v4293_v61, %v5427_v37  ;;  %v5637_v11 = vld [vmem:[%s4782_s11 + $0x60] sm:$0xff] }
 0x3de   : > { %v1330_v23 = vadd.f32 %v1298_v56, %v1153_v9  ;;  %v800_v27 = vadd.f32 %v768_v15, %v623_v63  ;;  %v7991_v15 = vld [vmem:[#allocation52_spill] sm:$0xff]  ;;  %v1128_v47 = vsel %vm1120_vm4, %v5329_v60, %v5528_v41 }
 0x3df   : > { %v774_v63 = vsel %vm766_vm2, %v7991_v15, %v7990_v39  ;;  %v8000_v39 = vld [vmem:[#allocation75_spill] sm:$0xff] }
 0x3e0   : > { %v977_v24 = vadd.f32 %v945_v3, %v800_v27  ;;  %v7993_v3 = vld [vmem:[#allocation72_spill] sm:$0xff]  ;;  %s4426_s8 = scalar_lea.hbm %s8246_s6, 512 }
 0x3e1   : > { %1285 = vrot.lane.b32.xlu1 %v1219_v2, %s4554_s14  ;;  %1460 = vrot.lane.b32.xlu0 %v1395_v4, %s4555_s21  ;;  %v4296_v27 = vld [vmem:[%s4789_s26 + $0x30] sm:$0xff] }
 0x3e2   : > { %1287 = vrot.lane.b32.xlu2 %v1220_v25, %s4554_s14  ;;  %v1154_v0 = vadd.f32 %v1122_v44, %v977_v24  ;;  %v1396_v25 = vmul.f32 %v5637_v11, %v5399_v20  ;;  %v5678_v24 = vld [vmem:[%s7783_s2 + $0x28] sm:$0xff] }
 0x3e3   : > { %v1266_v33 = vpop.permute.xlu1 %1265  ;;  %v1429_v1 = vpop.permute.xlu0 %1428 }
 0x3e4   : > { %v1303_v32 = vsel %vm1297_vm1, %v1264_v12, %v1266_v33  ;;  %v1268_v53 = vpop.permute.xlu2 %1267  ;;  %v1475_v26 = vsel %vm1474_vm5, %v5459_v8, %v1429_v1  ;;  %v5590_v12 = vld [vmem:[%s4782_s11 + $0x58] sm:$0xff]  ;;  %v1331_v54 = vadd.f32 %v5463_v42, %v1154_v0  ;;  %v1222_v42 = vmul.f32 %v5610_v17, %v5427_v37 }
 0x3e5   : > { %v5577_v62 = vadd.f32 %v1303_v32, %v1158_v18  ;;  %v1507_v30 = vadd.f32 %v1475_v26, %v1330_v23  ;;  %v1394_v8 = vmul.f32 %v5590_v12, %v5387_v13  ;;  %v4295_v37 = vld [vmem:[%s4782_s11 + $0x38] sm:$0xff]  ;;  %v951_v32 = vsel %vm943_vm3, %v7993_v3, %v7992_v58  ;;  %v4301_v58 = vld [vmem:[%s4782_s11 + $0x30] sm:$0xff] }
 0x3e6   : > { %v436_v55 = vmul.f32 %v4295_v37, %v7989_v31 }
 0x3e9   : > { %1456 = vrot.lane.b32.xlu1 %v1393_v28, %s4555_s21  ;;  %1293 = vrot.lane.b32.xlu0 %v1223_v10, %s4554_s14 }
 0x3ea   : > { %1458 = vrot.lane.b32.xlu2 %v1394_v8, %s4555_s21 }
 0x3eb   : > { %v1431_v45 = vpop.permute.xlu1 %1430  ;;  %v1435_v46 = vpop.permute.xlu0 %1434 }
 0x3ec   : > { %v1476_v51 = vsel %vm1474_vm5, %v1429_v1, %v1431_v45  ;;  %v1439_v29 = vpop.permute.xlu2 %1438  ;;  %v1477_v16 = vsel %vm1474_vm5, %v5493_v5, %v1435_v46  ;;  %v5617_v5 = vld [vmem:[%s7783_s2 + $0x20] sm:$0xff] }
 0x3ed   : > { %v1508_v21 = vadd.f32 %v1476_v51, %v1331_v54  ;;  %v5602_v13 = vadd.f32 %v1477_v16, %v5496_v50  ;;  %v1401_v16 = vmul.f32 %v4293_v61, %v5424_v40  ;;  %v7998_v61 = vld [vmem:[#allocation49_spill] sm:$0xff] }
 0x3f1   : > { %1540 = vperm.xlu1 %4197, %v5617_v5   ;;  %1464 = vrot.lane.b32.xlu0 %v1397_v19, %s4555_s21  ;;  %v7994_v19 = vld [vmem:[#allocation33_spill] sm:$0xff] }
 0x3f2   : > { %1291 = vrot.lane.b32.xlu2 %v1222_v42, %s4554_s14  ;;  %v7995_v42 = vld [vmem:[#allocation41_spill] sm:$0xff] }
 0x3f3   : > { %v1437_v50 = vpop.permute.xlu1 %1436  ;;  %v1099_v35 = vpop.permute.xlu0 %1098 }
 0x3f4   : > { %v1478_v59 = vsel %vm1474_vm5, %v1435_v46, %v1437_v50  ;;  %v1525_v38 = vpop.permute.xlu2 %1524  ;;  %v5625_v48 = vsel %vm1120_vm4, %v5536_v14, %v1099_v35  ;;  %v7988_v14 = vld [vmem:[#allocation31_spill] sm:$0xff]  ;;  %v5687_v46 = vld [vmem:[%s4782_s11 + $0x78] sm:$0xff]  ;;  %v7996_v50 = vld [vmem:[#allocation22_spill] sm:$0xff] }
 0x3f5   : > { %v1510_v7 = vadd.f32 %v1478_v59, %v5498_v52  ;;  %v5628_v4 = vadd.f32 %v1525_v38, %v1507_v30  ;;  %v5630_v2 = vadd.f32 %v1525_v38, %v1508_v21  ;;  %v7987_v52 = vld [vmem:[#allocation30_spill] sm:$0xff]  ;;  %v1398_v30 = vmul.f32 %v4296_v27, %v5399_v20 }
 0x3f6   : > { %v597_v56 = vsel %vm589_vm0, %v7988_v14, %v7987_v52  ;;  %v1400_v51 = vmul.f32 %v5687_v46, %v5424_v40  ;;  %v4557_v21 = vmov 8   ;;  %v7997_v40 = vld [vmem:[#allocation55_spill] sm:$0xff] }
 0x3f7   : > { %v629_v1 = vadd.f32 %v597_v56, %v436_v55 }
 0x3f9   : > { %1295 = vrot.lane.b32.xlu1 %v1224_v57, %s4554_s14  ;;  %1468 = vrot.lane.b32.xlu0 %v1399_v36, %s4555_s21  ;;  %v806_v26 = vadd.f32 %v774_v63, %v629_v1  ;;  %v775_v57 = vsel %vm766_vm2, %v7998_v61, %v7997_v40  ;;  %v8001_v63 = vld [vmem:[#allocation68_spill] sm:$0xff] }
 0x3fa   : > { %1462 = vrot.lane.b32.xlu2 %v1396_v25, %s4555_s21  ;;  %v952_v1 = vsel %vm943_vm3, %v8001_v63, %v8000_v39  ;;  %v8004_v61 = vld [vmem:[#allocation88_spill] sm:$0xff] }
 0x3fb   : > { %v1101_v43 = vpop.permute.xlu1 %1100  ;;  %v1270_v9 = vpop.permute.xlu0 %1269  ;;  %v983_v44 = vadd.f32 %v951_v32, %v806_v26  ;;  %v435_v32 = vmul.f32 %v4301_v58, %v7989_v31  ;;  %v4558_v31 = vmov 9  }
 0x3fc   : > { %v5653_v18 = vsel %vm1120_vm4, %v1099_v35, %v1101_v43  ;;  %v5655_v23 = vpop.permute.xlu2 %1104  ;;  %v5658_v33 = vsel %vm1297_vm1, %v1268_v53, %v1270_v9  ;;  %v5672_v53 = vld [vmem:[%s7783_s2 + $0x30] sm:$0xff]  ;;  %v7999_v43 = vld [vmem:[#allocation38_spill] sm:$0xff] }
 0x3fd   : > { %v1160_v20 = vadd.f32 %v1128_v47, %v983_v44 }
 0x401   : > { %1466 = vrot.lane.b32.xlu1 %v1398_v30, %s4555_s21  ;;  %1548 = vperm.xlu0 %4196, %v5672_v53  }
 0x402   : > { %1544 = vperm.xlu2 %4195, %v5678_v24  }
 0x403   : > { %v1272_v28 = vpop.permute.xlu1 %1271  ;;  %v1441_v41 = vpop.permute.xlu0 %1440 }
 0x404   : > { %v1305_v10 = vsel %vm1297_vm1, %v1270_v9, %v1272_v28  ;;  %v1274_v8 = vpop.permute.xlu2 %1273  ;;  %v1479_v0 = vsel %vm1474_vm5, %v1439_v29, %v1441_v41  ;;  %v598_v29 = vsel %vm589_vm0, %v7995_v42, %v7994_v19  ;;  %v596_v9 = vsel %vm589_vm0, %v7999_v43, %v7988_v14 }
 0x405   : > { %v5683_v54 = vadd.f32 %v1305_v10, %v1160_v20  ;;  %v1511_v45 = vadd.f32 %v1479_v0, %v5540_v49  ;;  %v4300_v49 = vld [vmem:[%s4782_s11 + $0x40] sm:$0xff]  ;;  %v628_v27 = vadd.f32 %v596_v9, %v435_v32  ;;  %v1599_v28 = vmul.f32 %v5628_v4, %v5628_v4  ;;  %v4303_v32 = vld [vmem:[%s4782_s11 + $0x48] sm:$0xff] }
 0x406   : > { %v437_v35 = vmul.f32 %v4300_v49, %v7996_v50 }
 0x408   : > { %v630_v37 = vadd.f32 %v598_v29, %v437_v35 }
 0x409   : > { %1470 = vrot.lane.b32.xlu1 %v1400_v51, %s4555_s21  ;;  %4199 = vset.pattern.permute.xlu0 %v4557_v21  ;;  %v1600_v51 = vmul.f32 %v5630_v2, %v5630_v2 }
 0x40a   : > { %1472 = vrot.lane.b32.xlu2 %v1401_v16, %s4555_s21  ;;  %1728 = vperm.xlu0 %4199, %v5672_v53   ;;  %v807_v26 = vadd.f32 %v775_v57, %v630_v37  ;;  %v1127_v57 = vsel %vm1120_vm4, %v8004_v61, %v5329_v60  ;;  %v8005_v60 = vld [vmem:[#allocation32_spill] sm:$0xff]  ;;  %v8011_v61 = vld [vmem:[#allocation34_spill] sm:$0xff] }
 0x40b   : > { %v1443_v59 = vpop.permute.xlu1 %1442  ;;  %v1529_v38 = vpop.permute.xlu0 %1528  ;;  %4198 = vset.pattern.permute.xlu2 %v4557_v21  ;;  %v599_v58 = vsel %vm589_vm0, %v7994_v19, %v8005_v60  ;;  %v8014_v60 = vld [vmem:[#allocation51_spill] sm:$0xff] }
 0x40c   : > { %v1480_v36 = vsel %vm1474_vm5, %v1441_v41, %v1443_v59  ;;  %v1445_v25 = vpop.permute.xlu2 %1444  ;;  %v5707_v52 = vadd.f32 %v1529_v38, %v5602_v13  ;;  %v5709_v56 = vadd.f32 %v1529_v38, %v1510_v7  ;;  %v8002_v13 = vld [vmem:[#allocation48_spill] sm:$0xff]  ;;  %v984_v30 = vadd.f32 %v952_v1, %v807_v26 }
 0x40d   : > { %v1512_v55 = vadd.f32 %v1480_v36, %v5577_v62  ;;  %v773_v7 = vsel %vm766_vm2, %v8002_v13, %v7991_v15  ;;  %v4302_v62 = vld [vmem:[%s7783_s2 + $0x38] sm:$0xff]  ;;  %v8003_v15 = vld [vmem:[#allocation67_spill] sm:$0xff]  ;;  %v438_v26 = vmul.f32 %v4303_v32, %v7996_v50 }
 0x40e   : > { %v1601_v14 = vmul.f32 %v5707_v52, %v5707_v52  ;;  %v1602_v47 = vmul.f32 %v5709_v56, %v5709_v56  ;;  %v805_v44 = vadd.f32 %v773_v7, %v628_v27  ;;  %v950_v20 = vsel %vm943_vm3, %v8003_v15, %v7993_v3  ;;  %v8015_v32 = vld [vmem:[#allocation59_spill] sm:$0xff] }
 0x40f   : > { %v1161_v41 = vadd.f32 %v5625_v48, %v984_v30  ;;  %v1571_v16 = vadd.f32 %v5707_v52, %v5628_v4  ;;  %v1584_v48 = vadd.f32 %v5709_v56, %v5630_v2  ;;  %v8006_v30 = vld [vmem:[#allocation56_spill] sm:$0xff] }
 0x410   : > { %v982_v38 = vadd.f32 %v950_v20, %v805_v44  ;;  %v1615_v36 = vadd.f32 %v1601_v14, %v1599_v28  ;;  %v1628_v37 = vadd.f32 %v1602_v47, %v1600_v51  ;;  %v776_v14 = vsel %vm766_vm2, %v7997_v40, %v8006_v30  ;;  %v8007_v44 = vld [vmem:[#allocation74_spill] sm:$0xff] }
 0x411   : > { %1552 = vperm.xlu1 %4197, %v4302_v62   ;;  %v953_v15 = vsel %vm943_vm3, %v8000_v39, %v8007_v44  ;;  %v8008_v51 = vmov 0   ;;  %v8016_v30 = vld [vmem:[#allocation78_spill] sm:$0xff] }
 0x412   : > { %1732 = vperm.xlu2 %4198, %v4302_v62   ;;  %4201 = vset.pattern.permute.xlu0 %v4558_v31  ;;  %v1159_v9 = vadd.f32 %v1127_v57, %v982_v38 }
 0x413   : > { %v1103_v10 = vpop.permute.xlu1 %1102  ;;  %v1276_v0 = vpop.permute.xlu0 %1275  ;;  %1772 = vperm.xlu0 %4201, %v5678_v24  }
 0x414   : > { %v5744_v42 = vsel %vm1120_vm4, %v1103_v10, %v5655_v23  ;;  %v1533_v3 = vpop.permute.xlu2 %1532  ;;  %v1306_v29 = vsel %vm1297_vm1, %v1274_v8, %v1276_v0  ;;  %v1336_v13 = vadd.f32 %v5658_v33, %v1159_v9  ;;  %v631_v33 = vadd.f32 %v599_v58, %v438_v26  ;;  %v8013_v9 = vld [vmem:[#allocation58_spill] sm:$0xff] }
 0x415   : > { %v5749_v49 = vadd.f32 %v1533_v3, %v1511_v45  ;;  %v5751_v35 = vadd.f32 %v1533_v3, %v1512_v55  ;;  %v5753_v59 = vadd.f32 %v1306_v29, %v1161_v41  ;;  %v8009_v29 = vld [vmem:[#allocation35_spill] sm:$0xff]  ;;  %v777_v58 = vsel %vm766_vm2, %v8014_v60, %v8013_v9 }
 0x416   : > { %v808_v40 = vadd.f32 %v776_v14, %v631_v33  ;;  %v601_v57 = vsel %vm589_vm0, %v8009_v29, %v8011_v61 }
 0x417   : > { %v5759_v43 = vadd.f32 %v1571_v16, %v5749_v49  ;;  %v5762_v8 = vadd.f32 %v1584_v48, %v5751_v35  ;;  %v1603_v45 = vmul.f32 %v5749_v49, %v5749_v49  ;;  %v1604_v55 = vmul.f32 %v5751_v35, %v5751_v35  ;;  %v8010_v48 = vld [vmem:[#allocation42_spill] sm:$0xff] }
 0x418   : > { %v985_v20 = vadd.f32 %v953_v15, %v808_v40  ;;  %v600_v38 = vsel %vm589_vm0, %v8010_v48, %v8009_v29 }
 0x419   : > { %v5768_v63 = vadd.f32 %v1615_v36, %v1603_v45  ;;  %v5770_v1 = vadd.f32 %v1628_v37, %v1604_v55  ;;  %4200 = vset.pattern.permute.xlu1 %v4558_v31  ;;  %v8012_v36 = vld [vmem:[#allocation23_spill] sm:$0xff]  ;;  %v4305_v55 = vld [vmem:[%s7783_s2 + $0x10] sm:$0xff] }
 0x41a   : > { %1780 = vperm.xlu1 %4200, %v4302_v62   ;;  %1724 = vperm.xlu2 %4198, %v5678_v24   ;;  %v5790_v24 = vld [vmem:[%s7783_s2 + $0x8] sm:$0xff]  ;;  %v439_v37 = vmul.f32 %v5583_v22, %v8012_v36  ;;  %v778_v22 = vsel %vm766_vm2, %v8013_v9, %v8015_v32 }
 0x41b   : > { %v1107_v7 = vpop.permute.xlu1 %1106  ;;  %v1447_v27 = vpop.permute.xlu0 %1446  ;;  %4204 = vset.pattern.permute.xlu0 %v4557_v21 }
 0x41c   : > { %v1132_v47 = vsel %vm1120_vm4, %v5655_v23, %v1107_v7  ;;  %v1113_v19 = vpop.permute.xlu2 %1112  ;;  %v1481_v62 = vsel %vm1474_vm5, %v1445_v25, %v1447_v27  ;;  %1708 = vperm.xlu0 %4204, %v5790_v24   ;;  %v1162_v23 = vadd.f32 %v5653_v18, %v985_v20  ;;  %v632_v7 = vadd.f32 %v600_v38, %v439_v37 }
 0x41d   : > { %v1513_v50 = vadd.f32 %v1481_v62, %v1336_v13  ;;  %v8018_v62 = vld [vmem:[#allocation77_spill] sm:$0xff] }
 0x41e   : > { %v955_v33 = vsel %vm943_vm3, %v8016_v30, %v8018_v62  ;;  %v809_v44 = vadd.f32 %v777_v58, %v632_v7 }
 0x422   : > { %1776 = vperm.xlu1 %4200, %v5672_v53   ;;  %1720 = vperm.xlu2 %4198, %v5617_v5  }
 0x423   : > { %v1278_v25 = vpop.permute.xlu1 %1277  ;;  %v1109_v28 = vpop.permute.xlu0 %1108 }
 0x424   : > { %v1307_v41 = vsel %vm1297_vm1, %v1276_v0, %v1278_v25  ;;  %v1284_v10 = vpop.permute.xlu2 %1283  ;;  %4208 = vset.pattern.permute.xlu0 %v8008_v51 }
 0x425   : > { %v5801_v16 = vadd.f32 %v1307_v41, %v1162_v23 }
 0x42a   : > { %4202 = vset.pattern.permute.xlu1 %v4557_v21  ;;  %4203 = vset.pattern.permute.xlu2 %v4558_v31 }
 0x42b   : > { %v1449_v39 = vpop.permute.xlu1 %1448  ;;  %1716 = vperm.xlu1 %4202, %v5440_v6   ;;  %v1280_v53 = vpop.permute.xlu0 %1279  ;;  %1768 = vperm.xlu2 %4203, %v5617_v5   ;;  %v440_v5 = vmul.f32 %v5590_v12, %v8012_v36 }
 0x42c   : > { %v1482_v18 = vsel %vm1474_vm5, %v1447_v27, %v1449_v39  ;;  %v5808_v3 = vpop.permute.xlu2 %1454 }
 0x42d   : > { %v1514_v0 = vadd.f32 %v1482_v18, %v5683_v54  ;;  %v633_v27 = vadd.f32 %v601_v57, %v440_v5 }
 0x42f   : > { %v810_v15 = vadd.f32 %v778_v22, %v633_v27 }
 0x431   : > { %v987_v20 = vadd.f32 %v955_v33, %v810_v15  ;;  %v8019_v33 = vld [vmem:[#allocation36_spill] sm:$0xff] }
 0x433   : > { %v1111_v45 = vpop.permute.xlu1 %1110  ;;  %1712 = vperm.xlu1 %4202, %v4305_v55   ;;  %v1451_v54 = vpop.permute.xlu0 %1450  ;;  %1764 = vperm.xlu2 %4203, %v5440_v6   ;;  %v8017_v6 = vld [vmem:[#allocation70_spill] sm:$0xff] }
 0x434   : > { %v5832_v26 = vsel %vm1120_vm4, %v1109_v28, %v1111_v45  ;;  %v5835_v12 = vsel %vm1120_vm4, %v1111_v45, %v1113_v19  ;;  %v5837_v13 = vpop.permute.xlu2 %1116  ;;  %v954_v14 = vsel %vm943_vm3, %v8017_v6, %v8016_v30  ;;  %v1164_v19 = vadd.f32 %v1132_v47, %v987_v20  ;;  %v4306_v47 = vld [vmem:[%s7783_s2] sm:$0xff] }
 0x435   : > { %v986_v40 = vadd.f32 %v954_v14, %v809_v44  ;;  %v8020_v44 = vld [vmem:[#allocation43_spill] sm:$0xff] }
 0x437   : > { %v1163_v23 = vadd.f32 %v5744_v42, %v986_v40  ;;  %v8021_v40 = vld [vmem:[#allocation26_spill] sm:$0xff] }
 0x438   : > { %v441_v20 = vmul.f32 %v5637_v11, %v8021_v40 }
 0x43b   : > { %v1282_v25 = vpop.permute.xlu1 %1281  ;;  %4205 = vset.pattern.permute.xlu1 %v4558_v31  ;;  %v1537_v28 = vpop.permute.xlu0 %1536  ;;  %4206 = vset.pattern.permute.xlu2 %v4557_v21 }
 0x43c   : > { %v1308_v41 = vsel %vm1297_vm1, %v1280_v53, %v1282_v25  ;;  %v1309_v39 = vsel %vm1297_vm1, %v1282_v25, %v1284_v10  ;;  %v5850_v18 = vpop.permute.xlu2 %1287  ;;  %v5852_v29 = vadd.f32 %v1537_v28, %v1513_v50  ;;  %v5854_v48 = vadd.f32 %v1537_v28, %v1514_v0  ;;  %1760 = vperm.xlu1 %4205, %v4305_v55  }
 0x43d   : > { %v1340_v38 = vadd.f32 %v1308_v41, %v1163_v23  ;;  %v1341_v42 = vadd.f32 %v1309_v39, %v1164_v19  ;;  %1704 = vperm.xlu2 %4206, %v4306_v47   ;;  %v8023_v39 = vld [vmem:[#allocation60_spill] sm:$0xff] }
 0x43e   : > { %v1573_v21 = vadd.f32 %v5759_v43, %v5852_v29  ;;  %v1586_v10 = vadd.f32 %v5762_v8, %v5854_v48  ;;  %v1605_v50 = vmul.f32 %v5852_v29, %v5852_v29  ;;  %v1606_v53 = vmul.f32 %v5854_v48, %v5854_v48 }
 0x440   : > { %v1617_v0 = vadd.f32 %v5768_v63, %v1605_v50  ;;  %v1630_v61 = vadd.f32 %v5770_v1, %v1606_v53 }
 0x443   : > { %v1453_v57 = vpop.permute.xlu1 %1452  ;;  %v5869_v36 = vpop.permute.xlu0 %1118 }
 0x444   : > { %v1459_v37 = vpop.permute.xlu2 %1458  ;;  %1756 = vperm.xlu1 %4205, %v5790_v24   ;;  %v1483_v60 = vsel %vm1474_vm5, %v1451_v54, %v1453_v57  ;;  %v1484_v58 = vsel %vm1474_vm5, %v1453_v57, %v5808_v3  ;;  %v602_v54 = vsel %vm589_vm0, %v8020_v44, %v8019_v33  ;;  %v442_v57 = vmul.f32 %v5605_v34, %v8021_v40 }
 0x445   : > { %4207 = vset.pattern.permute.xlu2 %v4558_v31  ;;  %v1516_v27 = vadd.f32 %v1484_v58, %v5801_v16  ;;  %v634_v41 = vadd.f32 %v602_v54, %v441_v20 }
 0x446   : > { %1752 = vperm.xlu2 %4207, %v4306_v47  }
 0x44b   : > { %v5873_v43 = vpop.permute.xlu1 %1114  ;;  %v1290_v8 = vpop.permute.xlu0 %1289 }
 0x44c   : > { %v5875_v5 = vpop.permute.xlu2 %1291  ;;  %4209 = vset.pattern.permute.xlu1 %v8008_v51  ;;  %v1311_v40 = vsel %vm1297_vm1, %v5850_v18, %v1290_v8  ;;  %v8032_v8 = vld [vmem:[#allocation27_spill] sm:$0xff] }
 0x44e   : > { %4210 = vset.pattern.permute.xlu2 %v8008_v51  ;;  %v1515_v51 = vadd.f32 %v1483_v60, %v5753_v59  ;;  %v8022_v59 = vld [vmem:[#allocation37_spill] sm:$0xff] }
 0x44f   : > { %v603_v16 = vsel %vm589_vm0, %v8019_v33, %v8022_v59 }
 0x453   : > { %v1286_v63 = vpop.permute.xlu1 %1285  ;;  %v1461_v1 = vpop.permute.xlu0 %1460 }
 0x454   : > { %v1463_v45 = vpop.permute.xlu2 %1462  ;;  %v1486_v31 = vsel %vm1474_vm5, %v1459_v37, %v1461_v1  ;;  %v8026_v1 = vld [vmem:[#allocation73_spill] sm:$0xff] }
 0x455   : > { %v1518_v7 = vadd.f32 %v1486_v31, %v1341_v42 }
 0x45b   : > { %v1457_v55 = vpop.permute.xlu1 %1456  ;;  %v5879_v9 = vpop.permute.xlu0 %1293 }
 0x45c   : > { %v1485_v24 = vsel %vm1474_vm5, %v1457_v55, %v1459_v37  ;;  %v1545_v22 = vpop.permute.xlu2 %1544  ;;  %v8025_v37 = vld [vmem:[#allocation79_spill] sm:$0xff] }
 0x45d   : > { %v1517_v32 = vadd.f32 %v1485_v24, %v1340_v38  ;;  %v5888_v30 = vadd.f32 %v1545_v22, %v1518_v7  ;;  %v8024_v38 = vld [vmem:[#allocation54_spill] sm:$0xff]  ;;  %v956_v55 = vsel %vm943_vm3, %v8026_v1, %v8025_v37  ;;  %v8027_v24 = vld [vmem:[#allocation61_spill] sm:$0xff]  ;;  %v8028_v7 = vld [vmem:[#allocation80_spill] sm:$0xff] }
 0x45e   : > { %v779_v42 = vsel %vm766_vm2, %v8024_v38, %v8023_v39  ;;  %v780_v31 = vsel %vm766_vm2, %v8023_v39, %v8027_v24  ;;  %v8030_v39 = vld [vmem:[#allocation44_spill] sm:$0xff] }
 0x45f   : > { %v5890_v6 = vadd.f32 %v1545_v22, %v1517_v32  ;;  %v1610_v11 = vmul.f32 %v5888_v30, %v5888_v30  ;;  %v811_v60 = vadd.f32 %v779_v42, %v634_v41  ;;  %v8031_v38 = vld [vmem:[#allocation40_spill] sm:$0xff]  ;;  %v444_v42 = vmul.f32 %v5687_v46, %v8032_v8 }
 0x460   : > { %v8037_v46 = vld [vmem:[#allocation76_spill] sm:$0xff] }
 0x461   : > { %v1609_v47 = vmul.f32 %v5890_v6, %v5890_v6 }
 0x463   : > { %v1541_v14 = vpop.permute.xlu1 %1540  ;;  %v1465_v62 = vpop.permute.xlu0 %1464 }
 0x464   : > { %v5895_v15 = vadd.f32 %v1541_v14, %v1515_v51  ;;  %v5897_v3 = vadd.f32 %v1541_v14, %v1516_v27  ;;  %v957_v51 = vsel %vm943_vm3, %v8025_v37, %v8028_v7  ;;  %v988_v27 = vadd.f32 %v956_v55, %v811_v60  ;;  %v8038_v60 = vld [vmem:[#allocation82_spill] sm:$0xff] }
 0x465   : > { %v1310_v14 = vsel %vm1297_vm1, %v1286_v63, %v5850_v18  ;;  %v1487_v54 = vsel %vm1474_vm5, %v1463_v45, %v1465_v62  ;;  %v8029_v63 = vld [vmem:[#allocation39_spill] sm:$0xff] }
 0x466   : > { %v1574_v23 = vadd.f32 %v1573_v21, %v5895_v15  ;;  %v1587_v19 = vadd.f32 %v1586_v10, %v5897_v3  ;;  %v1607_v25 = vmul.f32 %v5895_v15, %v5895_v15  ;;  %v1608_v28 = vmul.f32 %v5897_v3, %v5897_v3 }
 0x467   : > { %v1165_v33 = vadd.f32 %v5832_v26, %v988_v27  ;;  %v604_v26 = vsel %vm589_vm0, %v8030_v39, %v8029_v63  ;;  %v605_v45 = vsel %vm589_vm0, %v8029_v63, %v8031_v38 }
 0x468   : > { %v1618_v21 = vadd.f32 %v1617_v0, %v1607_v25  ;;  %v1631_v50 = vadd.f32 %v1630_v61, %v1608_v28  ;;  %v1575_v10 = vadd.f32 %v1574_v23, %v5890_v6  ;;  %v1588_v53 = vadd.f32 %v1587_v19, %v5888_v30 }
 0x469   : > { %v635_v0 = vadd.f32 %v603_v16, %v442_v57  ;;  %v1342_v20 = vadd.f32 %v1310_v14, %v1165_v33  ;;  %v8035_v57 = vld [vmem:[#allocation63_spill] sm:$0xff]  ;;  %v1136_v14 = vsel %vm1120_vm4, %v5837_v13, %v5869_v36 }
 0x46a   : > { %v1619_v58 = vadd.f32 %v1618_v21, %v1609_v47  ;;  %v1632_v32 = vadd.f32 %v1631_v50, %v1610_v11  ;;  %v8033_v47 = vld [vmem:[#allocation62_spill] sm:$0xff]  ;;  %v8034_v21 = vld [vmem:[#allocation57_spill] sm:$0xff] }
 0x46b   : > { %v1296_v61 = vpop.permute.xlu1 %1295  ;;  %v1469_v22 = vpop.permute.xlu0 %1468  ;;  %v812_v34 = vadd.f32 %v780_v31, %v635_v0  ;;  %v1519_v16 = vadd.f32 %v1487_v54, %v1342_v20  ;;  %v781_v50 = vsel %vm766_vm2, %v8034_v21, %v8033_v47  ;;  %v782_v37 = vsel %vm766_vm2, %v8033_v47, %v8035_v57  ;;  %v8036_v31 = vld [vmem:[#allocation81_spill] sm:$0xff] }
 0x46c   : > { %v959_v0 = vsel %vm943_vm3, %v8036_v31, %v8038_v60  ;;  %v1313_v20 = vsel %vm1297_vm1, %v5879_v9, %v1296_v61 }
 0x46d   : > { %v989_v44 = vadd.f32 %v957_v51, %v812_v34 }
 0x46f   : > { %v1166_v59 = vadd.f32 %v5835_v12, %v989_v44  ;;  %v443_v12 = vmul.f32 %v5610_v17, %v8032_v8  ;;  %v637_v17 = vadd.f32 %v605_v45, %v444_v42 }
 0x471   : > { %v1343_v23 = vadd.f32 %v1311_v40, %v1166_v59  ;;  %v636_v55 = vadd.f32 %v604_v26, %v443_v12  ;;  %v814_v34 = vadd.f32 %v782_v37, %v637_v17 }
 0x473   : > { %v1467_v19 = vpop.permute.xlu1 %1466  ;;  %v1549_v25 = vpop.permute.xlu0 %1548  ;;  %v813_v27 = vadd.f32 %v781_v50, %v636_v55  ;;  %v991_v40 = vadd.f32 %v959_v0, %v814_v34 }
 0x474   : > { %v1488_v28 = vsel %vm1474_vm5, %v1465_v62, %v1467_v19  ;;  %v5938_v41 = vadd.f32 %v1549_v25, %v1519_v16 }
 0x475   : > { %v1520_v18 = vadd.f32 %v1488_v28, %v1343_v23  ;;  %v1168_v59 = vadd.f32 %v1136_v14, %v991_v40  ;;  %v1473_v23 = vpop.permute.xlu2 %1472 }
 0x476   : > { %v1576_v11 = vadd.f32 %v1575_v10, %v5938_v41  ;;  %v1611_v62 = vmul.f32 %v5938_v41, %v5938_v41  ;;  %v958_v10 = vsel %vm943_vm3, %v8037_v46, %v8036_v31 }
 0x477   : > { %v5959_v1 = vadd.f32 %v1549_v25, %v1520_v18  ;;  %v990_v54 = vadd.f32 %v958_v10, %v813_v27 }
 0x478   : > { %v1620_v24 = vadd.f32 %v1619_v58, %v1611_v62  ;;  %v1135_v58 = vsel %vm1120_vm4, %v5873_v43, %v5837_v13  ;;  %v1345_v13 = vadd.f32 %v1313_v20, %v1168_v59 }
 0x479   : > { %v1589_v7 = vadd.f32 %v1588_v53, %v5959_v1  ;;  %v1612_v51 = vmul.f32 %v5959_v1, %v5959_v1  ;;  %v1312_v53 = vsel %vm1297_vm1, %v5875_v5, %v5879_v9  ;;  %v1167_v16 = vadd.f32 %v1135_v58, %v990_v54 }
 0x47b   : > { %v1633_v33 = vadd.f32 %v1632_v32, %v1612_v51  ;;  %v1471_v44 = vpop.permute.xlu1 %1470  ;;  %v1344_v25 = vadd.f32 %v1312_v53, %v1167_v16  ;;  %v1827_v53 = vld [vmem:[%s7784_s3 + $0x60] sm:$0xff] }
 0x47c   : > { %v1489_v36 = vsel %vm1474_vm5, %v1469_v22, %v1471_v44  ;;  %v1490_v19 = vsel %vm1474_vm5, %v1471_v44, %v1473_v23 }
 0x47d   : > { %v1521_v43 = vadd.f32 %v1489_v36, %v1344_v25  ;;  %v1522_v32 = vadd.f32 %v1490_v19, %v1345_v13  ;;  %v5993_v8 = vpop.permute.xlu2 %1732 }
 0x483   : > { %v1553_v28 = vpop.permute.xlu1 %1552 }
 0x484   : > { %v5983_v63 = vadd.f32 %v1553_v28, %v1521_v43  ;;  %v5985_v39 = vadd.f32 %v1553_v28, %v1522_v32 }
 0x485   : > { %v6004_v40 = vpop.permute.xlu2 %1724 }
 0x486   : > { %v1577_v5 = vadd.f32 %v1576_v11, %v5983_v63  ;;  %v1590_v9 = vadd.f32 %v1589_v7, %v5985_v39  ;;  %v1613_v61 = vmul.f32 %v5983_v63, %v5983_v63  ;;  %v1614_v22 = vmul.f32 %v5985_v39, %v5985_v39  ;;  %v1829_v11 = vld [vmem:[%s7784_s3 + $0x70] sm:$0xff] }
 0x487   : > { %1903 = vperm.xlu1 %4209, %v1829_v11  }
 0x488   : > { %v1578_v26 = vrot.slane %v1577_v5, 4  ;;  %v1591_v38 = vrot.slane %v1590_v9, 4  ;;  %v1621_v45 = vadd.f32 %v1620_v24, %v1613_v61  ;;  %v1634_v18 = vadd.f32 %v1633_v33, %v1614_v22 }
 0x48a   : > { %v1579_v12 = vadd.f32 %v1578_v26, %v1577_v5  ;;  %v1592_v42 = vadd.f32 %v1591_v38, %v1590_v9  ;;  %v1622_v62 = vrot.slane %v1621_v45, 4  ;;  %v1635_v47 = vrot.slane %v1634_v18, 4 }
 0x48c   : > { %v1580_v21 = vrot.slane %v1579_v12, 2  ;;  %v1593_v50 = vrot.slane %v1592_v42, 2  ;;  %v1623_v57 = vadd.f32 %v1622_v62, %v1621_v45  ;;  %v1636_v37 = vadd.f32 %v1635_v47, %v1634_v18  ;;  %v5998_v7 = vpop.permute.xlu1 %1780  ;;  %v1825_v45 = vld [vmem:[%s7784_s3 + $0x50] sm:$0xff] }
 0x48e   : > { %v1581_v55 = vadd.f32 %v1580_v21, %v1579_v12  ;;  %v1594_v17 = vadd.f32 %v1593_v50, %v1592_v42  ;;  %v1624_v31 = vrot.slane %v1623_v57, 2  ;;  %v1637_v24 = vrot.slane %v1636_v37, 2 }
 0x48f   : > { %1893 = vperm.xlu1 %4209, %v1827_v53  }
 0x490   : > { %v1582_v46 = vrot.slane %v1581_v55, 1  ;;  %v1595_v10 = vrot.slane %v1594_v17, 1  ;;  %v1625_v60 = vadd.f32 %v1624_v31, %v1623_v57  ;;  %v1638_v0 = vadd.f32 %v1637_v24, %v1636_v37  ;;  %v1818_v37 = vld [vmem:[%s7784_s3 + $0x18] sm:$0xff]  ;;  %v1729_v31 = vpop.permute.xlu0 %1728 }
 0x492   : > { %v1583_v51 = vadd.f32 %v1582_v46, %v1581_v55  ;;  %v1596_v27 = vadd.f32 %v1595_v10, %v1594_v17  ;;  %v1626_v34 = vrot.slane %v1625_v60, 1  ;;  %v1639_v14 = vrot.slane %v1638_v0, 1  ;;  %v1822_v55 = vld [vmem:[%s7784_s3 + $0x38] sm:$0xff] }
 0x494   : > { %v6000_v58 = vmul.f32 0.015625, %v1583_v51  ;;  %v6002_v33 = vmul.f32 0.015625, %v1596_v27  ;;  %v1627_v44 = vadd.f32 %v1626_v34, %v1625_v60  ;;  %v1640_v54 = vadd.f32 %v1639_v14, %v1638_v0  ;;  %v6033_v22 = vpop.permute.xlu1 %1776 }
 0x496   : > { %v1641_v20 = vmul.f32 0.015625, %v1627_v44  ;;  %v1642_v59 = vmul.f32 0.015625, %v1640_v54  ;;  %v1643_v16 = vmul.f32 %v6000_v58, %v6000_v58  ;;  %v1644_v23 = vmul.f32 %v6002_v33, %v6002_v33 }
 0x497   : > { %v1659_v36 = vsub.f32 %v5890_v6, %v6000_v58  ;;  %v1660_v19 = vsub.f32 %v5888_v30, %v6002_v33  ;;  %v1657_v25 = vsub.f32 %v5895_v15, %v6000_v58  ;;  %v1658_v13 = vsub.f32 %v5897_v3, %v6002_v33 }
 0x498   : > { %v1645_v43 = vsub.f32 %v1641_v20, %v1643_v16  ;;  %v1646_v32 = vsub.f32 %v1642_v59, %v1644_v23  ;;  %v1655_v28 = vsub.f32 %v5852_v29, %v6000_v58  ;;  %v1656_v5 = vsub.f32 %v5854_v48, %v6002_v33 }
 0x499   : > { %v1661_v6 = vsub.f32 %v5938_v41, %v6000_v58  ;;  %v1662_v30 = vsub.f32 %v5959_v1, %v6002_v33  ;;  %v1653_v15 = vsub.f32 %v5749_v49, %v6000_v58  ;;  %v1654_v3 = vsub.f32 %v5751_v35, %v6002_v33  ;;  %v1824_v1 = vld [vmem:[%s7784_s3 + $0x48] sm:$0xff]  ;;  %v1830_v49 = vld [vmem:[%s7784_s3 + $0x78] sm:$0xff]  ;;  %v6045_v35 = vpop.permute.xlu2 %1720 }
 0x49a   : > { %v1647_v9 = vmax.f32 %v1645_v43, 0.0  ;;  %v1648_v61 = vmax.f32 %v1646_v32, 0.0  ;;  %v1651_v29 = vsub.f32 %v5707_v52, %v6000_v58  ;;  %v1652_v48 = vsub.f32 %v5709_v56, %v6002_v33  ;;  %1878 = vperm.xlu1 %4209, %v1824_v1   ;;  %1908 = vperm.xlu0 %4208, %v1830_v49   ;;  %v1821_v56 = vld [vmem:[%s7784_s3 + $0x30] sm:$0xff]  ;;  %v1828_v49 = vld [vmem:[%s7784_s3 + $0x68] sm:$0xff] }
 0x49b   : > { %v1649_v16 = vsub.f32 %v5628_v4, %v6000_v58  ;;  %v1650_v23 = vsub.f32 %v5630_v2, %v6002_v33  ;;  %v1663_v43 = vsub.f32 %v5983_v63, %v6000_v58  ;;  %v1664_v4 = vsub.f32 %v5985_v39, %v6002_v33  ;;  %v1773_v63 = vpop.permute.xlu0 %1772  ;;  %1898 = vperm.xlu2 %4210, %v1828_v49  }
 0x49c   : > { %v1665_v41 = vadd.f32 1e-06, %v1647_v9  ;;  %v1666_v26 = vadd.f32 1e-06, %v1648_v61 }
 0x49d   : > { %v6047_v38 = vpop.permute.xlu1 %1716 }
 0x49e   : > { %4217 = vrsqrt.f32 %v1665_v41  ;;  %vm1673_vm8 = vweird.f32 %v1665_v41  ;;  %vm1683_vm9 = vweird.f32 %v1666_v26 }
 0x49f   : > { %4219 = vrsqrt.f32 %v1666_v26 }
 0x4a1   : > { %v6055_v62 = vpop.permute.xlu2 %1768 }
 0x4a2   : > { %1863 = vperm.xlu1 %4209, %v1821_v56   ;;  %1883 = vperm.xlu0 %4208, %v1825_v45  }
 0x4a4   : > { %v4218_v52 = vpop.eup %4217 }
 0x4a5   : > { %v4220_v18 = vpop.eup %4219  ;;  %v1668_v12 = vmul.f32 %v4218_v52, %v1665_v41  ;;  %vm1674_vm6 = vweird.f32 %v4218_v52  ;;  %v1713_v10 = vpop.permute.xlu1 %1712 }
 0x4a6   : > { %v1678_v42 = vmul.f32 %v4220_v18, %v1666_v26  ;;  %vm1684_vm7 = vweird.f32 %v4220_v18  ;;  %vm1675_vm10 = vmor %vm1673_vm8, %vm1674_vm6 }
 0x4a7   : > { %v1669_v47 = vmul.f32 %v4218_v52, %v1668_v12  ;;  %vm1685_vm11 = vmor %vm1683_vm9, %vm1684_vm7 }
 0x4a8   : > { %v1679_v11 = vmul.f32 %v4220_v18, %v1678_v42 }
 0x4a9   : > { %v1670_v21 = vmul.f32 0.5, %v1669_v47  ;;  %v1765_v14 = vpop.permute.xlu2 %1764 }
 0x4aa   : > { %v1680_v50 = vmul.f32 0.5, %v1679_v11  ;;  %1848 = vperm.xlu1 %4209, %v1818_v37   ;;  %1868 = vperm.xlu0 %4208, %v1822_v55   ;;  %v1709_v11 = vpop.permute.xlu0 %1708  ;;  %v1826_v55 = vld [vmem:[%s7784_s3 + $0x58] sm:$0xff] }
 0x4ab   : > { %v1671_v57 = vsub.f32 1.5, %v1670_v21  ;;  %1888 = vperm.xlu2 %4210, %v1826_v55  }
 0x4ac   : > { %v1681_v17 = vsub.f32 1.5, %v1680_v50 }
 0x4ad   : > { %v1672_v24 = vmul.f32 %v4218_v52, %v1671_v57 }
 0x4ae   : > { %v1682_v46 = vmul.f32 %v4220_v18, %v1681_v17  ;;  %v1761_v41 = vpop.permute.xlu1 %1760 }
 0x4af   : > { %v1676_v60 = vsel %vm1675_vm10, %v4218_v52, %v1672_v24 }
 0x4b0   : > { %v1686_v0 = vsel %vm1685_vm11, %v4220_v18, %v1682_v46  ;;  %v1697_v51 = vmul.f32 %v1676_v60, %v1659_v36  ;;  %v1695_v27 = vmul.f32 %v1676_v60, %v1657_v25  ;;  %v1693_v34 = vmul.f32 %v1676_v60, %v1655_v28  ;;  %v1815_v36 = vld [vmem:[%s7784_s3] sm:$0xff] }
 0x4b1   : > { %v1698_v44 = vmul.f32 %v1686_v0, %v1660_v19  ;;  %v1696_v54 = vmul.f32 %v1686_v0, %v1658_v13  ;;  %v1694_v53 = vmul.f32 %v1686_v0, %v1656_v5  ;;  %v1699_v20 = vmul.f32 %v1676_v60, %v1661_v6  ;;  %v1819_v19 = vld [vmem:[%s7784_s3 + $0x20] sm:$0xff]  ;;  %v1705_v33 = vpop.permute.xlu2 %1704 }
 0x4b2   : > { %v1700_v59 = vmul.f32 %v1686_v0, %v1662_v30  ;;  %v1691_v25 = vmul.f32 %v1676_v60, %v1653_v15  ;;  %v1692_v13 = vmul.f32 %v1686_v0, %v1654_v3  ;;  %v1687_v32 = vmul.f32 %v1676_v60, %v1649_v16  ;;  %1833 = vperm.xlu1 %4209, %v1815_v36   ;;  %v1805_v16 = vld [vmem:[%s7785_s4 + $0x30] sm:$0xff]  ;;  %v1808_v36 = vld [vmem:[%s7785_s4 + $0x48] sm:$0xff] }
 0x4b3   : > { %v1688_v28 = vmul.f32 %v1686_v0, %v1650_v23  ;;  %v1689_v5 = vmul.f32 %v1676_v60, %v1651_v29  ;;  %v1690_v2 = vmul.f32 %v1686_v0, %v1652_v48  ;;  %v1701_v6 = vmul.f32 %v1676_v60, %v1663_v43  ;;  %1853 = vperm.xlu0 %4208, %v1819_v19   ;;  %v1806_v23 = vld [vmem:[%s7785_s4 + $0x38] sm:$0xff]  ;;  %v1807_v43 = vld [vmem:[%s7785_s4 + $0x40] sm:$0xff]  ;;  %v1809_v19 = vld [vmem:[%s7785_s4 + $0x50] sm:$0xff] }
 0x4b4   : > { %v1702_v58 = vmul.f32 %v1686_v0, %v1664_v4  ;;  %v1747_v30 = vmul.f32 %v1729_v31, %v1699_v20  ;;  %v1748_v61 = vmul.f32 %v1729_v31, %v1700_v59  ;;  %v1745_v3 = vmul.f32 %v6004_v40, %v1697_v51  ;;  %v1799_v0 = vld [vmem:[%s7785_s4] sm:$0xff]  ;;  %v1804_v59 = vld [vmem:[%s7785_s4 + $0x28] sm:$0xff] }
 0x4b5   : > { %v1749_v9 = vmul.f32 %v5993_v8, %v1701_v6  ;;  %v1746_v39 = vmul.f32 %v6004_v40, %v1698_v44  ;;  %v1743_v48 = vmul.f32 %v6045_v35, %v1695_v27  ;;  %v1744_v52 = vmul.f32 %v6045_v35, %v1696_v54  ;;  %v1823_v27 = vld [vmem:[%s7784_s3 + $0x40] sm:$0xff]  ;;  %v1801_v44 = vld [vmem:[%s7785_s4 + $0x10] sm:$0xff] }
 0x4b6   : > { %v1750_v15 = vmul.f32 %v5993_v8, %v1702_v58  ;;  %v1795_v1 = vadd.f32 %v6033_v22, %v1747_v30  ;;  %v1816_v8 = vld [vmem:[%s7784_s3 + $0x8] sm:$0xff]  ;;  %v1796_v40 = vadd.f32 %v6033_v22, %v1748_v61  ;;  %v1793_v56 = vadd.f32 %v1773_v63, %v1745_v3  ;;  %v1757_v21 = vpop.permute.xlu1 %1756  ;;  %1873 = vperm.xlu2 %4210, %v1823_v27   ;;  %v1817_v54 = vld [vmem:[%s7784_s3 + $0x10] sm:$0xff]  ;;  %v1803_v20 = vld [vmem:[%s7785_s4 + $0x20] sm:$0xff] }
 0x4b7   : > { %v1797_v26 = vadd.f32 %v5998_v7, %v1749_v9  ;;  %v1742_v45 = vmul.f32 %v6047_v38, %v1694_v53  ;;  %v1794_v18 = vadd.f32 %v1773_v63, %v1746_v39  ;;  %v1739_v12 = vmul.f32 %v1713_v10, %v1691_v25  ;;  %v1802_v53 = vld [vmem:[%s7785_s4 + $0x18] sm:$0xff]  ;;  %v1813_v58 = vld [vmem:[%s7785_s4 + $0x70] sm:$0xff] }
 0x4b8   : > { %v1798_v29 = vadd.f32 %v5998_v7, %v1750_v15  ;;  %v1741_v7 = vmul.f32 %v6047_v38, %v1693_v34  ;;  %v1791_v42 = vadd.f32 %v6055_v62, %v1743_v48  ;;  %v1740_v47 = vmul.f32 %v1713_v10, %v1692_v13  ;;  %v1800_v34 = vld [vmem:[%s7785_s4 + $0x8] sm:$0xff]  ;;  %v1810_v13 = vld [vmem:[%s7785_s4 + $0x58] sm:$0xff] }
 0x4b9   : > { %1968 = vmatpush.msra.mxu0 %v1797_v26  ;;  %v1792_v35 = vadd.f32 %v6055_v62, %v1744_v52  ;;  %v1790_v50 = vadd.f32 %v1765_v14, %v1742_v45  ;;  %v1735_v57 = vmul.f32 %v1705_v33, %v1687_v32  ;;  %v1737_v37 = vmul.f32 %v1709_v11, %v1689_v5  ;;  %v1753_v24 = vpop.permute.xlu2 %1752  ;;  %v1812_v5 = vld [vmem:[%s7785_s4 + $0x68] sm:$0xff] }
 0x4ba   : > { %2033 = vmatpush.msra.mxu1 %v1798_v29  ;;  %v1789_v22 = vadd.f32 %v1765_v14, %v1741_v7  ;;  %v1787_v38 = vadd.f32 %v1761_v41, %v1739_v12  ;;  %v1736_v17 = vmul.f32 %v1705_v33, %v1688_v28  ;;  %v1738_v31 = vmul.f32 %v1709_v11, %v1690_v2  ;;  %v1820_v14 = vld [vmem:[%s7784_s3 + $0x28] sm:$0xff]  ;;  %v1811_v28 = vld [vmem:[%s7785_s4 + $0x60] sm:$0xff] }
 0x4bb   : > { %1969 = vmatpush.msra.mxu0 %v1795_v1  ;;  %1838 = vperm.xlu0 %4208, %v1816_v8   ;;  %v1788_v46 = vadd.f32 %v1761_v41, %v1740_v47  ;;  %v1785_v62 = vadd.f32 %v1757_v21, %v1737_v37  ;;  %v1783_v60 = vadd.f32 %v1753_v24, %v1735_v57  ;;  %v1814_v41 = vld [vmem:[%s7785_s4 + $0x78] sm:$0xff] }
 0x4bc   : > { %2034 = vmatpush.msra.mxu1 %v1796_v40  ;;  %v1786_v10 = vadd.f32 %v1757_v21, %v1738_v31  ;;  %v1784_v51 = vadd.f32 %v1753_v24, %v1736_v17 }
 0x4bd   : > { %1970 = vmatpush.msra.mxu0 %v1793_v56 }
 0x4be   : > { %2035 = vmatpush.msra.mxu1 %v1794_v18  ;;  %1858 = vperm.xlu2 %4210, %v1820_v14  }
 0x4bf   : > { %1971 = vmatpush.msra.mxu0 %v1791_v42 }
 0x4c0   : > { %2036 = vmatpush.msra.mxu1 %v1792_v35 }
 0x4c1   : > { %1972 = vmatpush.msra.mxu0 %v1789_v22 }
 0x4c2   : > { %2037 = vmatpush.msra.mxu1 %v1790_v50 }
 0x4c3   : > { %1973 = vmatpush.msra.mxu0 %v1787_v38 }
 0x4c4   : > { %2038 = vmatpush.msra.mxu1 %v1788_v46 }
 0x4c5   : > { %1974 = vmatpush.msra.mxu0 %v1785_v62 }
 0x4c6   : > { %2039 = vmatpush.msra.mxu1 %v1786_v10  ;;  %1843 = vperm.xlu2 %4210, %v1817_v54  }
 0x4c7   : > { %1975 = vmatpush.msra.mxu0 %v1783_v60 }
 0x4c8   : > { %2040 = vmatpush.msra.mxu1 %v1784_v51  ;;  %3968 = vmatmul.msk.f32.vlgmr.msra.gmra.mxu0 %vm1911_vm12, %v1799_v0 }
 0x4c9   : > { %3984 = vmatmul.msk.f32.vlgmr.msra.gmra.mxu1 %vm1911_vm12, %v1799_v0 }
 0x4d0   : > { %3969 = vmatmul.msk.f32.gmra.mxu0 %vm1911_vm12, %v1800_v34 }
 0x4d1   : > { %3985 = vmatmul.msk.f32.gmra.mxu1 %vm1911_vm12, %v1800_v34 }
 0x4d8   : > { %3970 = vmatmul.msk.f32.gmra.mxu0 %vm1911_vm12, %v1801_v44 }
 0x4d9   : > { %3986 = vmatmul.msk.f32.gmra.mxu1 %vm1911_vm12, %v1801_v44 }
 0x4e0   : > { %3971 = vmatmul.msk.f32.gmra.mxu0 %vm1911_vm12, %v1802_v53 }
 0x4e1   : > { %3987 = vmatmul.msk.f32.gmra.mxu1 %vm1911_vm12, %v1802_v53 }
 0x4e8   : > { %3972 = vmatmul.msk.f32.gmra.mxu0 %vm1911_vm12, %v1803_v20 }
 0x4e9   : > { %3988 = vmatmul.msk.f32.gmra.mxu1 %vm1911_vm12, %v1803_v20 }
 0x4f0   : > { %3973 = vmatmul.msk.f32.gmra.mxu0 %vm1911_vm12, %v1804_v59 }
 0x4f1   : > { %3989 = vmatmul.msk.f32.gmra.mxu1 %vm1911_vm12, %v1804_v59 }
 0x4f5   : > { %v6183_v2 = vpop.permute.xlu2 %1898 }
 0x4f8   : > { %3974 = vmatmul.msk.f32.gmra.mxu0 %vm1911_vm12, %v1805_v16 }
 0x4f9   : > { %3990 = vmatmul.msk.f32.gmra.mxu1 %vm1911_vm12, %v1805_v16  ;;  %v6164_v25 = vpop.permute.xlu1 %1903 }
 0x500   : > { %3975 = vmatmul.msk.f32.gmra.mxu0 %vm1911_vm12, %v1806_v23 }
 0x501   : > { %3991 = vmatmul.msk.f32.gmra.mxu1 %vm1911_vm12, %v1806_v23  ;;  %v6173_v4 = vpop.permute.xlu1 %1893 }
 0x505   : > { %v6194_v30 = vpop.permute.xlu2 %1888 }
 0x508   : > { %3976 = vmatmul.msk.f32.gmra.mxu0 %vm1911_vm12, %v1807_v43 }
 0x509   : > { %3992 = vmatmul.msk.f32.gmra.mxu1 %vm1911_vm12, %v1807_v43 }
 0x50c   : > { %v6171_v32 = vpop.permute.xlu0 %1908  ;;  %v6187_v63 = vpop.permute.xlu1 %1878 }
 0x510   : > { %3977 = vmatmul.msk.f32.gmra.mxu0 %vm1911_vm12, %v1808_v36  ;;  %v6207_v15 = vpop.permute.xlu2 %1873 }
 0x511   : > { %3993 = vmatmul.msk.f32.gmra.mxu1 %vm1911_vm12, %v1808_v36 }
 0x514   : > { %v6185_v6 = vpop.permute.xlu0 %1883  ;;  %v6198_v61 = vpop.permute.xlu1 %1863 }
 0x518   : > { %3978 = vmatmul.msk.f32.gmra.mxu0 %vm1911_vm12, %v1809_v19  ;;  %v6209_v29 = vpop.permute.xlu2 %1858 }
 0x519   : > { %3994 = vmatmul.msk.f32.gmra.mxu1 %vm1911_vm12, %v1809_v19 }
 0x51c   : > { %v6196_v9 = vpop.permute.xlu0 %1868  ;;  %v1849_v26 = vpop.permute.xlu1 %1848 }
 0x520   : > { %3979 = vmatmul.msk.f32.gmra.mxu0 %vm1911_vm12, %v1810_v13  ;;  %v1844_v47 = vpop.permute.xlu2 %1843 }
 0x521   : > { %3995 = vmatmul.msk.f32.gmra.mxu1 %vm1911_vm12, %v1810_v13 }
 0x524   : > { %v1834_v1 = vpop.permute.xlu1 %1833 }
 0x525   : > { %v1854_v3 = vpop.permute.xlu0 %1853 }
 0x528   : > { %3980 = vmatmul.msk.f32.gmra.mxu0 %vm1911_vm12, %v1811_v28 }
 0x529   : > { %3996 = vmatmul.msk.f32.gmra.mxu1 %vm1911_vm12, %v1811_v28 }
 0x52d   : > { %v1839_v48 = vpop.permute.xlu0 %1838 }
 0x530   : > { %3981 = vmatmul.msk.f32.gmra.mxu0 %vm1911_vm12, %v1812_v5 }
 0x531   : > { %3997 = vmatmul.msk.f32.gmra.mxu1 %vm1911_vm12, %v1812_v5 }
 0x538   : > { %3982 = vmatmul.msk.f32.gmra.mxu0 %vm1911_vm12, %v1813_v58 }
 0x539   : > { %3998 = vmatmul.msk.f32.gmra.mxu1 %vm1911_vm12, %v1813_v58 }
 0x540   : > { %3983 = vmatmul.msk.f32.gmra.mxu0 %vm1911_vm12, %v1814_v41 }
 0x541   : > { %3999 = vmatmul.msk.f32.gmra.mxu1 %vm1911_vm12, %v1814_v41 }
 0x545   : > { %v1977_v39 = vpop.f32.mrf.mxu0 }
 0x546   : > { %v2042_v33 = vpop.f32.mrf.mxu1  ;;  %v6213_v40 = vadd.f32 %v1977_v39, %v1834_v1 }
 0x547   : > { %v6218_v56 = vadd.f32 %v2042_v33, %v1834_v1 }
 0x548   : > { %8040 = vst [vmem:[#allocation24_spill] sm:$0xff] %v6213_v40  ;;  %v6221_v45 = vmul.f32 0.70710677, %v6213_v40 }
 0x549   : > { %8042 = vst [vmem:[#allocation46_spill] sm:$0xff] %v6218_v56  ;;  %v6226_v12 = vmul.f32 0.70710677, %v6218_v56 }
 0x54a   : > { %8043 = vst [vmem:[#allocation45_spill] sm:$0xff] %v6221_v45  ;;  %v2154_v22 = vmul.f32 %v6221_v45, %v6221_v45 }
 0x54b   : > { %8044 = vst [vmem:[#allocation50_spill] sm:$0xff] %v6226_v12  ;;  %v2194_v57 = vmul.f32 %v6226_v12, %v6226_v12 }
 0x54c   : > { %v6243_v55 = vmin.f32 %v2154_v22, 16.0 }
 0x54d   : > { %v1980_v49 = vpop.f32.mrf.mxu0  ;;  %v6249_v24 = vmin.f32 %v2194_v57, 16.0 }
 0x54e   : > { %v2045_v8 = vpop.f32.mrf.mxu1  ;;  %v6211_v52 = vadd.f32 %v1980_v49, %v1839_v48  ;;  %8048 = vst [vmem:[#allocation85_spill] sm:$0xff] %v6243_v55  ;;  %v2156_v0 = vmul.f32 2.1237322e-06, %v6243_v55 }
 0x54f   : > { %v6228_v42 = vadd.f32 %v2045_v8, %v1839_v48  ;;  %8050 = vst [vmem:[#allocation28_spill] sm:$0xff] %v6249_v24  ;;  %v2196_v44 = vmul.f32 2.1237322e-06, %v6249_v24 }
 0x550   : > { %8039 = vst [vmem:[#allocation86_spill] sm:$0xff] %v6211_v52  ;;  %v6216_v7 = vmul.f32 0.70710677, %v6211_v52  ;;  %v2157_v20 = vadd.f32 0.00028619796, %v2156_v0 }
 0x551   : > { %8045 = vst [vmem:[#allocation66_spill] sm:$0xff] %v6228_v42  ;;  %v6239_v37 = vmul.f32 0.70710677, %v6228_v42  ;;  %v2197_v36 = vadd.f32 0.00028619796, %v2196_v44 }
 0x552   : > { %8041 = vst [vmem:[#allocation29_spill] sm:$0xff] %v6216_v7  ;;  %v2234_v18 = vmul.f32 %v6216_v7, %v6216_v7  ;;  %v2158_v39 = vmul.f32 %v2157_v20, %v6243_v55 }
 0x553   : > { %8047 = vst [vmem:[#allocation69_spill] sm:$0xff] %v6239_v37  ;;  %v2274_v46 = vmul.f32 %v6239_v37, %v6239_v37  ;;  %v2198_v8 = vmul.f32 %v2197_v36, %v6249_v24 }
 0x554   : > { %v6232_v21 = vmin.f32 %v2234_v18, 16.0  ;;  %v2159_v22 = vadd.f32 0.0036580483, %v2158_v39 }
 0x555   : > { %v1983_v11 = vpop.f32.mrf.mxu0  ;;  %v6264_v54 = vmin.f32 %v2274_v46, 16.0 }
 0x556   : > { %v2048_v35 = vpop.f32.mrf.mxu1  ;;  %8046 = vst [vmem:[#allocation64_spill] sm:$0xff] %v6232_v21  ;;  %v6234_v50 = vadd.f32 %v1983_v11, %v1844_v47  ;;  %v2236_v17 = vmul.f32 2.1237322e-06, %v6232_v21  ;;  %v2160_v36 = vmul.f32 %v2159_v22, %v6243_v55 }
 0x557   : > { %v6241_v38 = vadd.f32 %v2048_v35, %v1844_v47  ;;  %8052 = vst [vmem:[#allocation47_spill] sm:$0xff] %v6264_v54  ;;  %v2276_v19 = vmul.f32 2.1237322e-06, %v6264_v54 }
 0x558   : > { %v6247_v31 = vmul.f32 0.70710677, %v6234_v50  ;;  %v2237_v51 = vadd.f32 0.00028619796, %v2236_v17 }
 0x559   : > { %v6254_v10 = vmul.f32 0.70710677, %v6241_v38  ;;  %v2277_v18 = vadd.f32 0.00028619796, %v2276_v19  ;;  %v6366_v45 = vmul.f32 0.5, %v6241_v38 }
 0x55a   : > { %8049 = vst [vmem:[#allocation83_spill] sm:$0xff] %v6247_v31  ;;  %v2314_v34 = vmul.f32 %v6247_v31, %v6247_v31  ;;  %v2238_v59 = vmul.f32 %v2237_v51, %v6232_v21 }
 0x55b   : > { %8051 = vst [vmem:[#allocation87_spill] sm:$0xff] %v6254_v10  ;;  %v2354_v53 = vmul.f32 %v6254_v10, %v6254_v10  ;;  %v2278_v0 = vmul.f32 %v2277_v18, %v6264_v54 }
 0x55c   : > { %v6272_v23 = vmin.f32 %v2314_v34, 16.0  ;;  %v2239_v33 = vadd.f32 0.0036580483, %v2238_v59  ;;  %8069 = vst [vmem:[#allocation68_spill] sm:$0xff] %v6366_v45 }
 0x55d   : > { %v1986_v62 = vpop.f32.mrf.mxu0  ;;  %v6280_v5 = vmin.f32 %v2354_v53, 16.0 }
 0x55e   : > { %v2051_v60 = vpop.f32.mrf.mxu1  ;;  %v6257_v27 = vadd.f32 %v1986_v62, %v1849_v26  ;;  %8053 = vst [vmem:[#allocation65_spill] sm:$0xff] %v6272_v23  ;;  %v2316_v1 = vmul.f32 2.1237322e-06, %v6272_v23  ;;  %v2240_v57 = vmul.f32 %v2239_v33, %v6232_v21 }
 0x55f   : > { %v6261_v14 = vadd.f32 %v2051_v60, %v1849_v26  ;;  %8055 = vst [vmem:[#allocation30_spill] sm:$0xff] %v6280_v5  ;;  %v2356_v47 = vmul.f32 2.1237322e-06, %v6280_v5  ;;  %v2199_v60 = vadd.f32 0.0036580483, %v2198_v8 }
 0x560   : > { %v6270_v16 = vmul.f32 0.70710677, %v6257_v27  ;;  %v2317_v46 = vadd.f32 0.00028619796, %v2316_v1  ;;  %v2241_v19 = vadd.f32 0.05243302, %v2240_v57 }
 0x561   : > { %v6275_v43 = vmul.f32 0.70710677, %v6261_v14  ;;  %v2357_v34 = vadd.f32 0.00028619796, %v2356_v47  ;;  %v2200_v33 = vmul.f32 %v2199_v60, %v6249_v24  ;;  %v2279_v1 = vadd.f32 0.0036580483, %v2278_v0 }
 0x562   : > { %v2394_v13 = vmul.f32 %v6270_v16, %v6270_v16  ;;  %v6334_v0 = vmul.f32 0.5, %v6234_v50 }
 0x563   : > { %8054 = vst [vmem:[#allocation84_spill] sm:$0xff] %v6275_v43  ;;  %v2434_v58 = vmul.f32 %v6275_v43, %v6275_v43  ;;  %v2358_v47 = vmul.f32 %v2357_v34, %v6280_v5  ;;  %v6337_v34 = vadd.f32 0.05243302, %v2200_v33 }
 0x564   : > { %v6287_v48 = vmin.f32 %v2394_v13, 16.0  ;;  %8062 = vst [vmem:[#allocation33_spill] sm:$0xff] %v6334_v0 }
 0x565   : > { %v1989_v28 = vpop.f32.mrf.mxu0  ;;  %v6294_v11 = vmin.f32 %v2434_v58, 16.0  ;;  %v2318_v58 = vmul.f32 %v2317_v46, %v6272_v23  ;;  %v2161_v46 = vadd.f32 0.05243302, %v2160_v36  ;;  %8063 = vst [vmem:[#allocation41_spill] sm:$0xff] %v6337_v34 }
 0x566   : > { %v6284_v41 = vadd.f32 %v1989_v28, %v1854_v3  ;;  %v2054_v26 = vpop.f32.mrf.mxu1  ;;  %8056 = vst [vmem:[#allocation31_spill] sm:$0xff] %v6287_v48  ;;  %v2396_v17 = vmul.f32 2.1237322e-06, %v6287_v48 }
 0x567   : > { %v6290_v49 = vadd.f32 %v2054_v26, %v1854_v3  ;;  %8057 = vst [vmem:[#allocation25_spill] sm:$0xff] %v6294_v11  ;;  %v2436_v44 = vmul.f32 2.1237322e-06, %v6294_v11 }
 0x568   : > { %v6297_v35 = vmul.f32 0.70710677, %v6284_v41  ;;  %v2397_v13 = vadd.f32 0.00028619796, %v2396_v17 }
 0x569   : > { %v6304_v62 = vmul.f32 0.70710677, %v6290_v49  ;;  %v2437_v22 = vadd.f32 0.00028619796, %v2436_v44  ;;  %v2280_v44 = vmul.f32 %v2279_v1, %v6264_v54 }
 0x56a   : > { %v2474_v3 = vmul.f32 %v6297_v35, %v6297_v35 }
 0x56b   : > { %8058 = vst [vmem:[#allocation53_spill] sm:$0xff] %v6304_v62  ;;  %v2514_v20 = vmul.f32 %v6304_v62, %v6304_v62  ;;  %v2438_v56 = vmul.f32 %v2437_v22, %v6294_v11  ;;  %v6358_v22 = vmul.f32 %v2161_v46, %v6243_v55 }
 0x56c   : > { %v6308_v53 = vmin.f32 %v2474_v3, 16.0  ;;  %v2242_v3 = vmul.f32 %v2241_v19, %v6232_v21 }
 0x56d   : > { %v1992_v51 = vpop.f32.mrf.mxu0  ;;  %v6318_v39 = vmin.f32 %v2514_v20, 16.0  ;;  %v2319_v20 = vadd.f32 0.0036580483, %v2318_v58  ;;  %8066 = vst [vmem:[#allocation49_spill] sm:$0xff] %v6358_v22  ;;  %v6406_v22 = vmul.f32 0.5, %v6284_v41  ;;  %v6421_v41 = vmul.f32 0.5, %v6290_v49 }
 0x56e   : > { %8059 = vst [vmem:[#allocation52_spill] sm:$0xff] %v6308_v53  ;;  %v2057_v59 = vpop.f32.mrf.mxu1  ;;  %v6314_v28 = vadd.f32 %v1992_v51, %v6209_v29  ;;  %v2476_v26 = vmul.f32 2.1237322e-06, %v6308_v53  ;;  %v2398_v51 = vmul.f32 %v2397_v13, %v6287_v48  ;;  %v2359_v13 = vadd.f32 0.0036580483, %v2358_v47 }
 0x56f   : > { %8060 = vst [vmem:[#allocation71_spill] sm:$0xff] %v6318_v39  ;;  %v6325_v18 = vadd.f32 %v2057_v59, %v6209_v29  ;;  %v2516_v17 = vmul.f32 2.1237322e-06, %v6318_v39 }
 0x570   : > { %v6322_v8 = vmul.f32 0.70710677, %v6314_v28  ;;  %v2477_v57 = vadd.f32 0.00028619796, %v2476_v26  ;;  %v2399_v33 = vadd.f32 0.0036580483, %v2398_v51 }
 0x571   : > { %v2517_v59 = vadd.f32 0.00028619796, %v2516_v17  ;;  %v6343_v36 = vmul.f32 0.70710677, %v6325_v18  ;;  %v2243_v17 = vadd.f32 0.18741608, %v2242_v3 }
 0x572   : > { %8061 = vst [vmem:[#allocation72_spill] sm:$0xff] %v6322_v8  ;;  %v2554_v60 = vmul.f32 %v6322_v8, %v6322_v8  ;;  %v2478_v29 = vmul.f32 %v2477_v57, %v6308_v53  ;;  %v2281_v51 = vadd.f32 0.05243302, %v2280_v44 }
 0x573   : > { %8065 = vst [vmem:[#allocation55_spill] sm:$0xff] %v6343_v36  ;;  %v2518_v50 = vmul.f32 %v2517_v59, %v6318_v39  ;;  %v2594_v1 = vmul.f32 %v6343_v36, %v6343_v36 }
 0x574   : > { %v6340_v26 = vmin.f32 %v2554_v60, 16.0  ;;  %v2320_v60 = vmul.f32 %v2319_v20, %v6272_v23  ;;  %v2479_v40 = vadd.f32 0.0036580483, %v2478_v29  ;;  %v2360_v20 = vmul.f32 %v2359_v13, %v6280_v5  ;;  %8077 = vst [vmem:[#allocation42_spill] sm:$0xff] %v6406_v22 }
 0x575   : > { %v1995_v19 = vpop.f32.mrf.mxu0  ;;  %v2519_v42 = vadd.f32 0.0036580483, %v2518_v50  ;;  %v2439_v29 = vadd.f32 0.0036580483, %v2438_v56  ;;  %v2400_v50 = vmul.f32 %v2399_v33, %v6287_v48  ;;  %v2244_v56 = vmul.f32 %v2243_v17, %v6232_v21  ;;  %8079 = vst [vmem:[#allocation23_spill] sm:$0xff] %v6421_v41 }
 0x576   : > { %8064 = vst [vmem:[#allocation22_spill] sm:$0xff] %v6340_v26  ;;  %v6348_v58 = vadd.f32 %v1995_v19, %v6198_v61  ;;  %v2060_v57 = vpop.f32.mrf.mxu1  ;;  %v2556_v12 = vmul.f32 2.1237322e-06, %v6340_v26  ;;  %v6360_v19 = vmin.f32 %v2594_v1, 16.0  ;;  %v6375_v1 = vmul.f32 0.5, %v6257_v27 }
 0x577   : > { %v6355_v47 = vadd.f32 %v2060_v57, %v6198_v61  ;;  %v2321_v57 = vadd.f32 0.05243302, %v2320_v60  ;;  %v2480_v44 = vmul.f32 %v2479_v40, %v6308_v53  ;;  %v2520_v13 = vmul.f32 %v2519_v42, %v6318_v39 }
 0x578   : > { %v2557_v59 = vadd.f32 0.00028619796, %v2556_v12  ;;  %8067 = vst [vmem:[#allocation38_spill] sm:$0xff] %v6360_v19  ;;  %v6363_v3 = vmul.f32 0.70710677, %v6348_v58  ;;  %v6386_v52 = vmul.f32 %v2281_v51, %v6264_v54  ;;  %v2440_v27 = vmul.f32 %v2439_v29, %v6294_v11 }
 0x579   : > { %v2596_v46 = vmul.f32 2.1237322e-06, %v6360_v19  ;;  %8070 = vst [vmem:[#allocation48_spill] sm:$0xff] %v6375_v1  ;;  %v6379_v38 = vmul.f32 0.70710677, %v6355_v47 }
 0x57a   : > { %8068 = vst [vmem:[#allocation75_spill] sm:$0xff] %v6363_v3  ;;  %v2558_v61 = vmul.f32 %v2557_v59, %v6340_v26  ;;  %v2634_v12 = vmul.f32 %v6363_v3, %v6363_v3  ;;  %v2361_v60 = vadd.f32 0.05243302, %v2360_v20  ;;  %v2401_v34 = vadd.f32 0.05243302, %v2400_v50 }
 0x57b   : > { %8071 = vst [vmem:[#allocation67_spill] sm:$0xff] %v6379_v38  ;;  %v2597_v33 = vadd.f32 0.00028619796, %v2596_v46  ;;  %v2674_v40 = vmul.f32 %v6379_v38, %v6379_v38  ;;  %v2322_v46 = vmul.f32 %v2321_v57, %v6272_v23  ;;  %v2481_v51 = vadd.f32 0.05243302, %v2480_v44 }
 0x57c   : > { %v6383_v59 = vmin.f32 %v2634_v12, 16.0  ;;  %8073 = vst [vmem:[#allocation32_spill] sm:$0xff] %v6386_v52  ;;  %v2559_v0 = vadd.f32 0.0036580483, %v2558_v61  ;;  %v6397_v12 = vmul.f32 0.5, %v6261_v14  ;;  %v2362_v61 = vmul.f32 %v2361_v60, %v6280_v5 }
 0x57d   : > { %v1998_v37 = vpop.f32.mrf.mxu0  ;;  %v6399_v20 = vmin.f32 %v2674_v40, 16.0  ;;  %v6401_v29 = vadd.f32 1.1283791, %v2244_v56  ;;  %v2521_v7 = vadd.f32 0.05243302, %v2520_v13  ;;  %v2598_v52 = vmul.f32 %v2597_v33, %v6360_v19 }
 0x57e   : > { %8072 = vst [vmem:[#allocation88_spill] sm:$0xff] %v6383_v59  ;;  %v2063_v45 = vpop.f32.mrf.mxu1  ;;  %v2636_v17 = vmul.f32 2.1237322e-06, %v6383_v59  ;;  %v6393_v42 = vadd.f32 %v1998_v37, %v6196_v9  ;;  %v2402_v14 = vmul.f32 %v2401_v34, %v6287_v48  ;;  %v2441_v44 = vadd.f32 0.05243302, %v2440_v27 }
 0x57f   : > { %8074 = vst [vmem:[#allocation56_spill] sm:$0xff] %v6397_v12  ;;  %v2676_v37 = vmul.f32 2.1237322e-06, %v6399_v20  ;;  %v6410_v57 = vadd.f32 %v2063_v45, %v6196_v9  ;;  %v2560_v56 = vmul.f32 %v2559_v0, %v6340_v26  ;;  %v6417_v33 = vadd.f32 0.18741608, %v2322_v46 }
 0x580   : > { %8075 = vst [vmem:[#allocation74_spill] sm:$0xff] %v6399_v20  ;;  %v2637_v50 = vadd.f32 0.00028619796, %v2636_v17  ;;  %v6415_v13 = vmul.f32 0.70710677, %v6393_v42  ;;  %v2482_v60 = vmul.f32 %v2481_v51, %v6308_v53  ;;  %v2522_v9 = vmul.f32 %v2521_v7, %v6318_v39 }
 0x581   : > { %8076 = vst [vmem:[#allocation35_spill] sm:$0xff] %v6401_v29  ;;  %v2599_v45 = vadd.f32 0.0036580483, %v2598_v52  ;;  %v2677_v17 = vadd.f32 0.00028619796, %v2676_v37  ;;  %v6430_v46 = vmul.f32 0.5, %v6314_v28  ;;  %v2442_v7 = vmul.f32 %v2441_v44, %v6294_v11 }
 0x582   : > { %8078 = vst [vmem:[#allocation34_spill] sm:$0xff] %v6417_v33  ;;  %v2638_v40 = vmul.f32 %v2637_v50, %v6383_v59  ;;  %v2714_v34 = vmul.f32 %v6415_v13, %v6415_v13  ;;  %v6427_v27 = vadd.f32 0.18741608, %v2362_v61  ;;  %v6433_v51 = vmul.f32 0.70710677, %v6410_v57 }
 0x583   : > { %8081 = vst [vmem:[#allocation51_spill] sm:$0xff] %v6430_v46  ;;  %v2403_v50 = vadd.f32 0.18741608, %v2402_v14  ;;  %v2561_v52 = vadd.f32 0.05243302, %v2560_v56  ;;  %v6440_v12 = vmul.f32 0.5, %v6325_v18  ;;  %v2678_v14 = vmul.f32 %v2677_v17, %v6399_v20 }
 0x584   : > { %8080 = vst [vmem:[#allocation58_spill] sm:$0xff] %v6427_v27  ;;  %v6437_v37 = vmin.f32 %v2714_v34, 16.0  ;;  %v2639_v61 = vadd.f32 0.0036580483, %v2638_v40  ;;  %v2754_v28 = vmul.f32 %v6433_v51, %v6433_v51  ;;  %v2483_v31 = vadd.f32 0.18741608, %v2482_v60 }
 0x585   : > { %v2001_v0 = vpop.f32.mrf.mxu0  ;;  %8083 = vst [vmem:[#allocation78_spill] sm:$0xff] %v6440_v12  ;;  %v2523_v43 = vadd.f32 0.18741608, %v2522_v9  ;;  %v2404_v34 = vmul.f32 %v2403_v50, %v6287_v48  ;;  %v6457_v24 = vadd.f32 0.18741608, %v2442_v7  ;;  %v2562_v60 = vmul.f32 %v2561_v52, %v6340_v26 }
 0x586   : > { %v2002_v49 = vadd.f32 %v2001_v0, %v6207_v15  ;;  %v2066_v29 = vpop.f32.mrf.mxu1  ;;  %8082 = vst [vmem:[#allocation59_spill] sm:$0xff] %v6437_v37  ;;  %v2600_v0 = vmul.f32 %v2599_v45, %v6360_v19  ;;  %v2716_v44 = vmul.f32 2.1237322e-06, %v6437_v37  ;;  %v6449_v56 = vmin.f32 %v2754_v28, 16.0 }
 0x587   : > { %v6454_v40 = vadd.f32 %v2066_v29, %v6207_v15  ;;  %8085 = vst [vmem:[#allocation77_spill] sm:$0xff] %v6457_v24  ;;  %v6461_v9 = vmul.f32 0.5, %v6348_v58  ;;  %v2640_v45 = vmul.f32 %v2639_v61, %v6383_v59  ;;  %v6465_v17 = vmul.f32 0.5, %v6355_v47 }
 0x588   : > { %v6444_v10 = vmul.f32 0.70710677, %v2002_v49  ;;  %8084 = vst [vmem:[#allocation70_spill] sm:$0xff] %v6449_v56  ;;  %v2717_v28 = vadd.f32 0.00028619796, %v2716_v44  ;;  %v2484_v15 = vmul.f32 %v2483_v31, %v6308_v53  ;;  %v2524_v29 = vmul.f32 %v2523_v43, %v6318_v39 }
 0x589   : > { %8086 = vst [vmem:[#allocation36_spill] sm:$0xff] %v6461_v9  ;;  %v2756_v1 = vmul.f32 2.1237322e-06, %v6449_v56  ;;  %v2601_v50 = vadd.f32 0.05243302, %v2600_v0 }
 0x58a   : > { %v2794_v18 = vmul.f32 %v6444_v10, %v6444_v10  ;;  %8087 = vst [vmem:[#allocation43_spill] sm:$0xff] %v6465_v17  ;;  %v2679_v52 = vadd.f32 0.0036580483, %v2678_v14  ;;  %v2718_v58 = vmul.f32 %v2717_v28, %v6437_v37  ;;  %v6474_v61 = vmul.f32 0.70710677, %v6454_v40 }
 0x58b   : > { %v2757_v55 = vadd.f32 0.00028619796, %v2756_v1  ;;  %v2405_v54 = vadd.f32 1.1283791, %v2404_v34  ;;  %v2563_v44 = vadd.f32 0.18741608, %v2562_v60 }
 0x58c   : > { %v6470_v7 = vmin.f32 %v2794_v18, 16.0  ;;  %v2641_v43 = vadd.f32 0.05243302, %v2640_v45  ;;  %v2719_v0 = vadd.f32 0.0036580483, %v2718_v58  ;;  %v2834_v14 = vmul.f32 %v6474_v61, %v6474_v61 }
 0x58d   : > { %v2004_v41 = vpop.f32.mrf.mxu0  ;;  %v2758_v18 = vmul.f32 %v2757_v55, %v6449_v56  ;;  %v2485_v28 = vadd.f32 1.1283791, %v2484_v15  ;;  %v6484_v1 = vmul.f32 0.5, %v6393_v42  ;;  %v6489_v60 = vadd.f32 1.1283791, %v2524_v29 }
 0x58e   : > { %8088 = vst [vmem:[#allocation26_spill] sm:$0xff] %v6470_v7  ;;  %v2069_v47 = vpop.f32.mrf.mxu1  ;;  %v2796_v24 = vmul.f32 2.1237322e-06, %v6470_v7  ;;  %v6478_v31 = vadd.f32 %v2004_v41, %v6187_v63  ;;  %v2602_v41 = vmul.f32 %v2601_v50, %v6360_v19  ;;  %v2680_v45 = vmul.f32 %v2679_v52, %v6399_v20 }
 0x58f   : > { %8089 = vst [vmem:[#allocation37_spill] sm:$0xff] %v6484_v1  ;;  %v6487_v34 = vadd.f32 %v2069_v47, %v6187_v63  ;;  %v6493_v58 = vmin.f32 %v2834_v14, 16.0  ;;  %v6496_v55 = vmul.f32 0.5, %v6410_v57  ;;  %v2759_v33 = vadd.f32 0.0036580483, %v2758_v18 }
 0x590   : > { %v2797_v27 = vadd.f32 0.00028619796, %v2796_v24  ;;  %8090 = vst [vmem:[#allocation60_spill] sm:$0xff] %v6489_v60  ;;  %v6500_v42 = vmul.f32 0.70710677, %v6478_v31  ;;  %v2564_v63 = vmul.f32 %v2563_v44, %v6340_v26  ;;  %v2642_v24 = vmul.f32 %v2641_v43, %v6383_v59 }
 0x591   : > { %8091 = vst [vmem:[#allocation54_spill] sm:$0xff] %v6493_v58  ;;  %v2720_v29 = vmul.f32 %v2719_v0, %v6437_v37  ;;  %v2836_v50 = vmul.f32 2.1237322e-06, %v6493_v58  ;;  %v6506_v52 = vmul.f32 0.5, %v2002_v49  ;;  %v6511_v18 = vmul.f32 0.70710677, %v6487_v34 }
 0x592   : > { %8092 = vst [vmem:[#allocation79_spill] sm:$0xff] %v6496_v55  ;;  %v2798_v15 = vmul.f32 %v2797_v27, %v6470_v7  ;;  %v2874_v57 = vmul.f32 %v6500_v42, %v6500_v42  ;;  %v6514_v14 = vmul.f32 %v2405_v54, %v6270_v16  ;;  %v2603_v44 = vadd.f32 0.18741608, %v2602_v41 }
 0x593   : > { %8093 = vst [vmem:[#allocation73_spill] sm:$0xff] %v6506_v52  ;;  %v2681_v22 = vadd.f32 0.05243302, %v2680_v45  ;;  %v2837_v43 = vadd.f32 0.00028619796, %v2836_v50  ;;  %v2760_v0 = vmul.f32 %v2759_v33, %v6449_v56  ;;  %v2914_v49 = vmul.f32 %v6511_v18, %v6511_v18 }
 0x594   : > { %v2799_v47 = vadd.f32 0.0036580483, %v2798_v15  ;;  %8094 = vst [vmem:[#allocation61_spill] sm:$0xff] %v6514_v14  ;;  %v6517_v21 = vmin.f32 %v2874_v57, 16.0  ;;  %v6524_v46 = vadd.f32 1.1283791, %v2564_v63  ;;  %v2604_v50 = vmul.f32 %v2603_v44, %v6360_v19 }
 0x595   : > { %v2007_v27 = vpop.f32.mrf.mxu0  ;;  %v2643_v5 = vadd.f32 0.18741608, %v2642_v24  ;;  %v2721_v23 = vadd.f32 0.05243302, %v2720_v29  ;;  %v2838_v54 = vmul.f32 %v2837_v43, %v6493_v58  ;;  %v6529_v45 = vmin.f32 %v2914_v49, 16.0 }
 0x596   : > { %v2072_v12 = vpop.f32.mrf.mxu1  ;;  %v6522_v15 = vadd.f32 %v2007_v27, %v6185_v6  ;;  %8095 = vst [vmem:[#allocation80_spill] sm:$0xff] %v6524_v46  ;;  %v2800_v16 = vmul.f32 %v2799_v47, %v6470_v7  ;;  %v2876_v41 = vmul.f32 2.1237322e-06, %v6517_v21  ;;  %v2682_v57 = vmul.f32 %v2681_v22, %v6399_v20 }
 0x597   : > { %8096 = vst [vmem:[#allocation39_spill] sm:$0xff] %v6529_v45  ;;  %v6532_v33 = vadd.f32 %v2072_v12, %v6185_v6  ;;  %v2839_v27 = vadd.f32 0.0036580483, %v2838_v54  ;;  %v6540_v24 = vmul.f32 %v2485_v28, %v6297_v35  ;;  %v2761_v29 = vadd.f32 0.05243302, %v2760_v0 }
 0x598   : > { %v6537_v63 = vmul.f32 0.70710677, %v6522_v15  ;;  %v2877_v47 = vadd.f32 0.00028619796, %v2876_v41  ;;  %v2916_v43 = vmul.f32 2.1237322e-06, %v6529_v45  ;;  %v2644_v49 = vmul.f32 %v2643_v5, %v6383_v59 }
 0x599   : > { %8097 = vst [vmem:[#allocation44_spill] sm:$0xff] %v6540_v24  ;;  %v2722_v6 = vmul.f32 %v2721_v23, %v6437_v37  ;;  %v2840_v12 = vmul.f32 %v2839_v27, %v6493_v58  ;;  %v2801_v44 = vadd.f32 0.05243302, %v2800_v16  ;;  %v6550_v35 = vmul.f32 0.70710677, %v6532_v33 }
 0x59a   : > { %v2954_v22 = vmul.f32 %v6537_v63, %v6537_v63  ;;  %v2878_v54 = vmul.f32 %v2877_v47, %v6517_v21  ;;  %v2917_v14 = vadd.f32 0.00028619796, %v2916_v43  ;;  %v6552_v0 = vadd.f32 1.1283791, %v2604_v50 }
 0x59b   : > { %v2683_v41 = vadd.f32 0.18741608, %v2682_v57  ;;  %v6555_v5 = vmul.f32 0.5, %v6454_v40  ;;  %v2762_v24 = vmul.f32 %v2761_v29, %v6449_v56  ;;  %v2994_v47 = vmul.f32 %v6550_v35, %v6550_v35 }
 0x59c   : > { %8098 = vst [vmem:[#allocation40_spill] sm:$0xff] %v6552_v0  ;;  %v6557_v23 = vmin.f32 %v2954_v22, 16.0  ;;  %v2879_v17 = vadd.f32 0.0036580483, %v2878_v54  ;;  %v2918_v16 = vmul.f32 %v2917_v14, %v6529_v45  ;;  %v2723_v43 = vadd.f32 0.18741608, %v2722_v6 }
 0x59d   : > { %v2010_v28 = vpop.f32.mrf.mxu0  ;;  %8099 = vst [vmem:[#allocation27_spill] sm:$0xff] %v6555_v5  ;;  %v2841_v36 = vadd.f32 0.05243302, %v2840_v12  ;;  %v6567_v40 = vadd.f32 1.1283791, %v2644_v49  ;;  %v2802_v22 = vmul.f32 %v2801_v44, %v6470_v7  ;;  %v6570_v46 = vmin.f32 %v2994_v47, 16.0 }
 0x59e   : > { %v2075_v27 = vpop.f32.mrf.mxu1  ;;  %v2956_v50 = vmul.f32 2.1237322e-06, %v6557_v23  ;;  %v6565_v57 = vadd.f32 %v2010_v28, %v6194_v30  ;;  %v2919_v0 = vadd.f32 0.0036580483, %v2918_v16  ;;  %v2684_v29 = vmul.f32 %v2683_v41, %v6399_v20  ;;  %v6785_v20 = vld [vmem:[%s7783_s2] sm:$0xff] }
 0x59f   : > { %8100 = vst [vmem:[#allocation62_spill] sm:$0xff] %v6567_v40  ;;  %v6574_v14 = vmul.f32 0.5, %v6478_v31  ;;  %v6577_v6 = vadd.f32 %v2075_v27, %v6194_v30  ;;  %v2763_v12 = vadd.f32 0.18741608, %v2762_v24  ;;  %v2880_v28 = vmul.f32 %v2879_v17, %v6517_v21 }
 0x5a0   : > { %v2957_v54 = vadd.f32 0.00028619796, %v2956_v50  ;;  %v6581_v49 = vmul.f32 0.5, %v6487_v34  ;;  %v2996_v44 = vmul.f32 2.1237322e-06, %v6570_v46  ;;  %v2724_v16 = vmul.f32 %v2723_v43, %v6437_v37 }
 0x5a1   : > { %8101 = vst [vmem:[#allocation57_spill] sm:$0xff] %v6574_v14  ;;  %v2842_v47 = vmul.f32 %v2841_v36, %v6493_v58  ;;  %v6588_v31 = vmul.f32 0.70710677, %v6565_v57  ;;  %v2803_v50 = vadd.f32 0.18741608, %v2802_v22  ;;  %v2920_v30 = vmul.f32 %v2919_v0, %v6529_v45 }
 0x5a2   : > { %8102 = vst [vmem:[#allocation63_spill] sm:$0xff] %v6581_v49  ;;  %v2958_v41 = vmul.f32 %v2957_v54, %v6557_v23  ;;  %v2997_v24 = vadd.f32 0.00028619796, %v2996_v44  ;;  %v6592_v17 = vmul.f32 0.70710677, %v6577_v6  ;;  %v2764_v60 = vmul.f32 %v2763_v12, %v6449_v56 }
 0x5a3   : > { %v6594_v27 = vadd.f32 1.1283791, %v2684_v29  ;;  %v3034_v43 = vmul.f32 %v6588_v31, %v6588_v31  ;;  %v2881_v62 = vadd.f32 0.05243302, %v2880_v28  ;;  %v2725_v44 = vadd.f32 1.1283791, %v2724_v16 }
 0x5a4   : > { %8103 = vst [vmem:[#allocation81_spill] sm:$0xff] %v6592_v17  ;;  %v2959_v8 = vadd.f32 0.0036580483, %v2958_v41  ;;  %v2998_v22 = vmul.f32 %v2997_v24, %v6570_v46  ;;  %v3074_v0 = vmul.f32 %v6592_v17, %v6592_v17  ;;  %v2843_v9 = vadd.f32 0.18741608, %v2842_v47 }
 0x5a5   : > { %v2013_v34 = vpop.f32.mrf.mxu0  ;;  %8104 = vst [vmem:[#allocation76_spill] sm:$0xff] %v6594_v27  ;;  %v6604_v29 = vmul.f32 0.5, %v6522_v15  ;;  %v6606_v41 = vmin.f32 %v3034_v43, 16.0  ;;  %v2804_v11 = vmul.f32 %v2803_v50, %v6470_v7  ;;  %v2921_v27 = vadd.f32 0.05243302, %v2920_v30 }
 0x5a6   : > { %v2014_v36 = vadd.f32 %v2013_v34, %v6173_v4  ;;  %v2078_v54 = vpop.f32.mrf.mxu1  ;;  %v2960_v34 = vmul.f32 %v2959_v8, %v6557_v23  ;;  %v6610_v38 = vmin.f32 %v3074_v0, 16.0  ;;  %v2999_v12 = vadd.f32 0.0036580483, %v2998_v22 }
 0x5a7   : > { %8105 = vst [vmem:[#allocation82_spill] sm:$0xff] %v6604_v29  ;;  %v3036_v28 = vmul.f32 2.1237322e-06, %v6606_v41  ;;  %v2079_v16 = vadd.f32 %v2078_v54, %v6173_v4  ;;  %v2765_v47 = vadd.f32 1.1283791, %v2764_v60  ;;  %v2882_v15 = vmul.f32 %v2881_v62, %v6517_v21 }
 0x5a8   : > { %v6613_v24 = vmul.f32 0.70710677, %v2014_v36  ;;  %v6618_v43 = vmul.f32 0.5, %v6532_v33  ;;  %v3076_v50 = vmul.f32 2.1237322e-06, %v6610_v38  ;;  %v6622_v30 = vmul.f32 %v2725_v44, %v6415_v13 }
 0x5a9   : > { %v2844_v8 = vmul.f32 %v2843_v9, %v6493_v58  ;;  %v3037_v22 = vadd.f32 0.00028619796, %v3036_v28  ;;  %v2805_v55 = vadd.f32 1.1283791, %v2804_v11  ;;  %v2922_v4 = vmul.f32 %v2921_v27, %v6529_v45 }
 0x5aa   : > { %8106 = vst [vmem:[#allocation89_spill] sm:$0xff] %v6618_v43  ;;  %v3114_v0 = vmul.f32 %v6613_v24, %v6613_v24  ;;  %v2961_v60 = vadd.f32 0.05243302, %v2960_v34  ;;  %v3077_v54 = vadd.f32 0.00028619796, %v3076_v50  ;;  %v3000_v33 = vmul.f32 %v2999_v12, %v6570_v46 }
 0x5ab   : > { %8107 = vst [vmem:[#allocation90_spill] sm:$0xff] %v6622_v30  ;;  %v3038_v48 = vmul.f32 %v3037_v22, %v6606_v41  ;;  %v6632_v13 = vmul.f32 0.70710677, %v2079_v16  ;;  %v6635_v9 = vmul.f32 %v2765_v47, %v6433_v51  ;;  %v2883_v28 = vadd.f32 0.18741608, %v2882_v15 }
 0x5ac   : > { %v6630_v40 = vmin.f32 %v3114_v0, 16.0  ;;  %v3078_v11 = vmul.f32 %v3077_v54, %v6610_v38  ;;  %v2845_v34 = vadd.f32 1.1283791, %v2844_v8  ;;  %v6643_v22 = vmul.f32 %v2805_v55, %v6444_v10 }
 0x5ad   : > { %v2016_v62 = vpop.f32.mrf.mxu0  ;;  %8108 = vst [vmem:[#allocation91_spill] sm:$0xff] %v6635_v9  ;;  %v3039_v50 = vadd.f32 0.0036580483, %v3038_v48  ;;  %v3154_v12 = vmul.f32 %v6632_v13, %v6632_v13  ;;  %v2923_v0 = vadd.f32 0.18741608, %v2922_v4  ;;  %v6646_v39 = vmul.f32 0.5, %v6565_v57 }
 0x5ae   : > { %v2081_v44 = vpop.f32.mrf.mxu1  ;;  %v2017_v27 = vadd.f32 %v2016_v62, %v6183_v2  ;;  %v3116_v3 = vmul.f32 2.1237322e-06, %v6630_v40  ;;  %8109 = vst [vmem:[#allocation92_spill] sm:$0xff] %v6643_v22  ;;  %v2962_v47 = vmul.f32 %v2961_v60, %v6557_v23  ;;  %v3001_v15 = vadd.f32 0.05243302, %v3000_v33 }
 0x5af   : > { %8110 = vst [vmem:[#allocation93_spill] sm:$0xff] %v6646_v39  ;;  %v2082_v51 = vadd.f32 %v2081_v44, %v6183_v2  ;;  %v6650_v8 = vmin.f32 %v3154_v12, 16.0  ;;  %v2884_v48 = vmul.f32 %v2883_v28, %v6517_v21  ;;  %v6654_v62 = vmul.f32 0.5, %v6577_v6 }
 0x5b0   : > { %v3117_v54 = vadd.f32 0.00028619796, %v3116_v3  ;;  %v3079_v1 = vadd.f32 0.0036580483, %v3078_v11  ;;  %v6656_v10 = vmul.f32 0.70710677, %v2017_v27  ;;  %v6659_v55 = vmul.f32 %v2845_v34, %v6474_v61 }
 0x5b1   : > { %8111 = vst [vmem:[#allocation94_spill] sm:$0xff] %v6654_v62  ;;  %v3040_v57 = vmul.f32 %v3039_v50, %v6606_v41  ;;  %v3156_v4 = vmul.f32 2.1237322e-06, %v6650_v8  ;;  %v2924_v3 = vmul.f32 %v2923_v0, %v6529_v45  ;;  %v6665_v60 = vmul.f32 0.5, %v2014_v36 }
 0x5b2   : > { %8112 = vst [vmem:[#allocation95_spill] sm:$0xff] %v6659_v55  ;;  %v3118_v2 = vmul.f32 %v3117_v54, %v6630_v40  ;;  %v3194_v6 = vmul.f32 %v6656_v10, %v6656_v10  ;;  %v6669_v33 = vmul.f32 0.70710677, %v2082_v51  ;;  %v2963_v28 = vadd.f32 0.18741608, %v2962_v47 }
 0x5b3   : > { %8113 = vst [vmem:[#allocation96_spill] sm:$0xff] %v6665_v60  ;;  %v3002_v61 = vmul.f32 %v3001_v15, %v6570_v46  ;;  %v3157_v11 = vadd.f32 0.00028619796, %v3156_v4  ;;  %v2885_v12 = vadd.f32 1.1283791, %v2884_v48  ;;  %v3080_v54 = vmul.f32 %v3079_v1, %v6610_v38 }
 0x5b4   : > { %v6676_v0 = vmin.f32 %v3194_v6, 16.0  ;;  %v3234_v36 = vmul.f32 %v6669_v33, %v6669_v33  ;;  %v3041_v9 = vadd.f32 0.05243302, %v3040_v57  ;;  %v3119_v5 = vadd.f32 0.0036580483, %v3118_v2 }
 0x5b5   : > { %v2019_v44 = vpop.f32.mrf.mxu0  ;;  %v6680_v30 = vmul.f32 0.5, %v2079_v16  ;;  %v3158_v47 = vmul.f32 %v3157_v11, %v6650_v8  ;;  %v2925_v15 = vadd.f32 1.1283791, %v2924_v3  ;;  %v2964_v1 = vmul.f32 %v2963_v28, %v6557_v23 }
 0x5b6   : > { %v6673_v34 = vadd.f32 %v2019_v44, %v6164_v25  ;;  %v2084_v50 = vpop.f32.mrf.mxu1  ;;  %v3196_v4 = vmul.f32 2.1237322e-06, %v6676_v0  ;;  %v6684_v44 = vmin.f32 %v3234_v36, 16.0  ;;  %v3003_v6 = vadd.f32 0.18741608, %v3002_v61 }
 0x5b7   : > { %8114 = vst [vmem:[#allocation97_spill] sm:$0xff] %v6680_v30  ;;  %v6687_v48 = vadd.f32 %v2084_v50, %v6164_v25  ;;  %v3159_v55 = vadd.f32 0.0036580483, %v3158_v47  ;;  %v6694_v16 = vmul.f32 %v2885_v12, %v6500_v42  ;;  %v3081_v57 = vadd.f32 0.05243302, %v3080_v54 }
 0x5b8   : > { %v6691_v52 = vmul.f32 0.70710677, %v6673_v34  ;;  %v3197_v2 = vadd.f32 0.00028619796, %v3196_v4  ;;  %v3236_v3 = vmul.f32 2.1237322e-06, %v6684_v44  ;;  %v3042_v11 = vmul.f32 %v3041_v9, %v6606_v41 }
 0x5b9   : > { %8115 = vst [vmem:[#allocation98_spill] sm:$0xff] %v6694_v16  ;;  %v3120_v36 = vmul.f32 %v3119_v5, %v6630_v40  ;;  %v6699_v25 = vmul.f32 0.5, %v2017_v27  ;;  %v3160_v61 = vmul.f32 %v3159_v55, %v6650_v8  ;;  %v6706_v42 = vmul.f32 0.70710677, %v6687_v48 }
 0x5ba   : > { %v3274_v28 = vmul.f32 %v6691_v52, %v6691_v52  ;;  %v3198_v50 = vmul.f32 %v3197_v2, %v6676_v0  ;;  %v3237_v47 = vadd.f32 0.00028619796, %v3236_v3  ;;  %v2965_v54 = vadd.f32 1.1283791, %v2964_v1 }
 0x5bb   : > { %v3004_v4 = vmul.f32 %v3003_v6, %v6570_v46  ;;  %v6709_v9 = vmul.f32 0.5, %v2082_v51  ;;  %v3082_v53 = vmul.f32 %v3081_v57, %v6610_v38  ;;  %v3314_v2 = vmul.f32 %v6706_v42, %v6706_v42 }
 0x5bc   : > { %v6711_v5 = vmin.f32 %v3274_v28, 16.0  ;;  %v3199_v19 = vadd.f32 0.0036580483, %v3198_v50  ;;  %v3238_v55 = vmul.f32 %v3237_v47, %v6684_v44  ;;  %v3043_v3 = vadd.f32 0.18741608, %v3042_v11 }
 0x5bd   : > { %v2022_v12 = vpop.f32.mrf.mxu0  ;;  %v3121_v22 = vadd.f32 0.05243302, %v3120_v36  ;;  %v3161_v51 = vadd.f32 0.05243302, %v3160_v61  ;;  %v6722_v28 = vmin.f32 %v3314_v2, 16.0  ;;  %v6728_v50 = vmul.f32 %v2925_v15, %v6511_v18 }
 0x5be   : > { %v2087_v27 = vpop.f32.mrf.mxu1  ;;  %v3276_v49 = vmul.f32 2.1237322e-06, %v6711_v5  ;;  %v6719_v1 = vadd.f32 %v2022_v12, %v6171_v32  ;;  %v3200_v6 = vmul.f32 %v3199_v19, %v6676_v0  ;;  %v3005_v47 = vadd.f32 1.1283791, %v3004_v4 }
 0x5bf   : > { %v6725_v57 = vadd.f32 %v2087_v27, %v6171_v32  ;;  %8116 = vst [vmem:[#allocation99_spill] sm:$0xff] %v6728_v50  ;;  %v3239_v26 = vadd.f32 0.0036580483, %v3238_v55  ;;  %v6731_v36 = vmul.f32 %v2965_v54, %v6537_v63  ;;  %v3083_v14 = vadd.f32 0.18741608, %v3082_v53 }
 0x5c0   : > { %v3277_v11 = vadd.f32 0.00028619796, %v3276_v49  ;;  %v3316_v12 = vmul.f32 2.1237322e-06, %v6722_v28  ;;  %v6735_v61 = vmul.f32 0.70710677, %v6719_v1  ;;  %v3044_v19 = vmul.f32 %v3043_v3, %v6606_v41 }
 0x5c1   : > { %8117 = vst [vmem:[#allocation100_spill] sm:$0xff] %v6731_v36  ;;  %v3122_v32 = vmul.f32 %v3121_v22, %v6630_v40  ;;  %v6741_v18 = vmul.f32 0.70710677, %v6725_v57  ;;  %v3162_v49 = vmul.f32 %v3161_v51, %v6650_v8  ;;  %v3201_v15 = vadd.f32 0.05243302, %v3200_v6 }
 0x5c2   : > { %v3278_v27 = vmul.f32 %v3277_v11, %v6711_v5  ;;  %v3317_v63 = vadd.f32 0.00028619796, %v3316_v12  ;;  %v3354_v53 = vmul.f32 %v6735_v61, %v6735_v61  ;;  %v3240_v54 = vmul.f32 %v3239_v26, %v6684_v44 }
 0x5c3   : > { %v3394_v55 = vmul.f32 %v6741_v18, %v6741_v18  ;;  %v3084_v22 = vmul.f32 %v3083_v14, %v6610_v38  ;;  %v6751_v2 = vmul.f32 0.5, %v6673_v34  ;;  %v4559_v51 = vmov 10   ;;  %v6765_v14 = vld [vmem:[%s7783_s2 + $0x10] sm:$0xff]  ;;  %v6771_v34 = vld [vmem:[%s7783_s2 + $0x8] sm:$0xff] }
 0x5c4   : > { %v3279_v4 = vadd.f32 0.0036580483, %v3278_v27  ;;  %v3318_v3 = vmul.f32 %v3317_v63, %v6722_v28  ;;  %v6754_v11 = vmin.f32 %v3354_v53, 16.0  ;;  %4213 = vset.pattern.permute.xlu1 %v4559_v51  ;;  %4212 = vset.pattern.permute.xlu0 %v4559_v51  ;;  %v3123_v6 = vadd.f32 0.18741608, %v3122_v32 }
 0x5c5   : > { %v6758_v26 = vmul.f32 0.5, %v6687_v48  ;;  %v6760_v27 = vmin.f32 %v3394_v55, 16.0  ;;  %3515 = vperm.xlu1 %4213, %v6765_v14   ;;  %3511 = vperm.xlu0 %4212, %v6771_v34   ;;  %v3163_v32 = vadd.f32 0.18741608, %v3162_v49  ;;  %v3202_v48 = vmul.f32 %v3201_v15, %v6676_v0 }
 0x5c6   : > { %v3280_v12 = vmul.f32 %v3279_v4, %v6711_v5  ;;  %v3319_v63 = vadd.f32 0.0036580483, %v3318_v3  ;;  %v3356_v53 = vmul.f32 2.1237322e-06, %v6754_v11  ;;  %4211 = vset.pattern.permute.xlu2 %v4559_v51  ;;  %v6777_v4 = vmul.f32 %v3005_v47, %v6550_v35 }
 0x5c7   : > { %v6779_v55 = vadd.f32 1.1283791, %v3044_v19  ;;  %v3241_v50 = vadd.f32 0.05243302, %v3240_v54  ;;  %v3396_v16 = vmul.f32 2.1237322e-06, %v6760_v27  ;;  %3507 = vperm.xlu2 %4211, %v6785_v20   ;;  %v6792_v35 = vmul.f32 %v3123_v6, %v6630_v40 }
 0x5c8   : > { %8118 = vst [vmem:[#allocation101_spill] sm:$0xff] %v6777_v4  ;;  %v6788_v49 = vadd.f32 1.1283791, %v3084_v22  ;;  %v3281_v15 = vadd.f32 0.05243302, %v3280_v12  ;;  %v3320_v3 = vmul.f32 %v3319_v63, %v6722_v28  ;;  %v6797_v43 = vmul.f32 %v3163_v32, %v6650_v8  ;;  %v6808_v32 = vld [vmem:[%s7783_s2 + $0x20] sm:$0xff] }
 0x5c9   : > { %v3357_v51 = vadd.f32 0.00028619796, %v3356_v53  ;;  %v3397_v47 = vadd.f32 0.00028619796, %v3396_v16  ;;  %v3367_v19 = vmul.f32 3.8918573e-05, %v6754_v11  ;;  %v3242_v12 = vmul.f32 %v3241_v50, %v6684_v44 }
 0x5ca   : > { %8119 = vst [vmem:[#allocation102_spill] sm:$0xff] %v6788_v49  ;;  %v3407_v54 = vmul.f32 3.8918573e-05, %v6760_v27  ;;  %v3203_v4 = vadd.f32 0.18741608, %v3202_v48  ;;  %v3282_v6 = vmul.f32 %v3281_v15, %v6711_v5  ;;  %v6814_v50 = vld [vmem:[%s7783_s2 + $0x30] sm:$0xff] }
 0x5cb   : > { %v3321_v29 = vadd.f32 0.05243302, %v3320_v3  ;;  %v3358_v22 = vmul.f32 %v3357_v51, %v6754_v11  ;;  %v3398_v63 = vmul.f32 %v3397_v47, %v6760_v27  ;;  %v3368_v53 = vadd.f32 0.001143296, %v3367_v19 }
 0x5cc   : > { %v3408_v59 = vadd.f32 0.001143296, %v3407_v54  ;;  %v3287_v36 = vmul.f32 3.8918573e-05, %v6711_v5  ;;  %v3327_v47 = vmul.f32 3.8918573e-05, %v6722_v28 }
 0x5cd   : > { %v3359_v16 = vadd.f32 0.0036580483, %v3358_v22  ;;  %v3322_v62 = vmul.f32 %v3321_v29, %v6722_v28  ;;  %v3399_v56 = vadd.f32 0.0036580483, %v3398_v63  ;;  %3523 = vperm.xlu1 %4213, %v6808_v32   ;;  %3531 = vperm.xlu0 %4212, %v6814_v50   ;;  %v3369_v48 = vmul.f32 %v3368_v53, %v6754_v11  ;;  %v6826_v22 = vld [vmem:[%s7783_s2 + $0x18] sm:$0xff] }
 0x5ce   : > { %v3409_v15 = vmul.f32 %v3408_v59, %v6760_v27  ;;  %v3204_v29 = vmul.f32 %v3203_v4, %v6676_v0  ;;  %v3288_v51 = vadd.f32 0.001143296, %v3287_v36  ;;  %v3243_v19 = vadd.f32 0.18741608, %v3242_v12 }
 0x5cf   : > { %v3360_v3 = vmul.f32 %v3359_v16, %v6754_v11  ;;  %v3400_v54 = vmul.f32 %v3399_v56, %v6760_v27  ;;  %3519 = vperm.xlu2 %4211, %v6826_v22   ;;  %v3370_v63 = vadd.f32 0.014752088, %v3369_v48  ;;  %v3283_v59 = vadd.f32 0.18741608, %v3282_v6 }
 0x5d0   : > { %v3410_v53 = vadd.f32 0.014752088, %v3409_v15  ;;  %v3289_v4 = vmul.f32 %v3288_v51, %v6711_v5  ;;  %v3328_v16 = vadd.f32 0.001143296, %v3327_v47  ;;  %v3323_v36 = vadd.f32 0.18741608, %v3322_v62 }
 0x5d1   : > { %v3361_v37 = vadd.f32 0.05243302, %v3360_v3  ;;  %v3401_v58 = vadd.f32 0.05243302, %v3400_v54  ;;  %v3371_v12 = vmul.f32 %v3370_v63, %v6754_v11  ;;  %v3205_v39 = vadd.f32 1.1283791, %v3204_v29 }
 0x5d2   : > { %v3411_v56 = vmul.f32 %v3410_v53, %v6760_v27  ;;  %v3290_v17 = vadd.f32 0.014752088, %v3289_v4  ;;  %v3329_v30 = vmul.f32 %v3328_v16, %v6722_v28  ;;  %v3207_v3 = vmul.f32 3.8918573e-05, %v6676_v0 }
 0x5d3   : > { %v3362_v49 = vmul.f32 %v3361_v37, %v6754_v11  ;;  %v3402_v48 = vmul.f32 %v3401_v58, %v6760_v27  ;;  %v3372_v15 = vadd.f32 0.112945676, %v3371_v12  ;;  %v3244_v51 = vmul.f32 %v3243_v19, %v6684_v44  ;;  %v6843_v37 = vld [vmem:[%s7783_s2 + $0x38] sm:$0xff] }
 0x5d4   : > { %v3412_v6 = vadd.f32 0.112945676, %v3411_v56  ;;  %v3284_v62 = vmul.f32 %v3283_v59, %v6711_v5  ;;  %v3291_v47 = vmul.f32 %v3290_v17, %v6711_v5  ;;  %v3330_v54 = vadd.f32 0.014752088, %v3329_v30  ;;  %v6854_v56 = vld [vmem:[%s7783_s2 + $0x28] sm:$0xff] }
 0x5d5   : > { %v3324_v29 = vmul.f32 %v3323_v36, %v6722_v28  ;;  %3535 = vperm.xlu1 %4213, %v6843_v37   ;;  %v4560_v58 = vmov 11   ;;  %v3373_v63 = vmul.f32 %v3372_v15, %v6754_v11  ;;  %v3208_v53 = vadd.f32 0.001143296, %v3207_v3 }
 0x5d6   : > { %4215 = vset.pattern.permute.xlu0 %v4560_v58  ;;  %v3413_v19 = vmul.f32 %v3412_v6, %v6760_v27  ;;  %v3363_v59 = vadd.f32 0.18741608, %v3362_v49  ;;  %v3292_v17 = vadd.f32 0.112945676, %v3291_v47  ;;  %v3331_v30 = vmul.f32 %v3330_v54, %v6722_v28 }
 0x5d7   : > { %3625 = vperm.xlu0 %4215, %v6771_v34   ;;  %v3247_v4 = vmul.f32 3.8918573e-05, %v6684_v44  ;;  %v3403_v16 = vadd.f32 0.18741608, %v3402_v48  ;;  %v3374_v36 = vadd.f32 0.4994258, %v3373_v63  ;;  %3527 = vperm.xlu2 %4211, %v6854_v56   ;;  %v3209_v15 = vmul.f32 %v3208_v53, %v6676_v0 }
 0x5d8   : > { %v3414_v12 = vadd.f32 0.4994258, %v3413_v19  ;;  %v3285_v49 = vadd.f32 1.1283791, %v3284_v62  ;;  %v3293_v34 = vmul.f32 %v3292_v17, %v6711_v5  ;;  %v3332_v6 = vadd.f32 0.112945676, %v3331_v30 }
 0x5d9   : > { %v3248_v3 = vadd.f32 0.001143296, %v3247_v4  ;;  %v3325_v47 = vadd.f32 1.1283791, %v3324_v29  ;;  %v3375_v54 = vmul.f32 %v3374_v36, %v6754_v11  ;;  %v3210_v63 = vadd.f32 0.014752088, %v3209_v15 }
 0x5da   : > { %v3415_v48 = vmul.f32 %v3414_v12, %v6760_v27  ;;  %v3364_v19 = vmul.f32 %v3363_v59, %v6754_v11  ;;  %v3294_v7 = vadd.f32 0.4994258, %v3293_v34  ;;  %v3333_v60 = vmul.f32 %v3332_v6, %v6722_v28 }
 0x5db   : > { %v3249_v45 = vmul.f32 %v3248_v3, %v6684_v44  ;;  %v3404_v53 = vmul.f32 %v3403_v16, %v6760_v27  ;;  %v6866_v62 = vmul.f32 0.5, %v6719_v1  ;;  %v6868_v17 = vadd.f32 1.0, %v3375_v54 }
 0x5dc   : > { %v6870_v29 = vadd.f32 1.0, %v3415_v48  ;;  %v3295_v30 = vmul.f32 %v3294_v7, %v6711_v5  ;;  %v3334_v4 = vadd.f32 0.4994258, %v3333_v60  ;;  %v3211_v36 = vmul.f32 %v3210_v63, %v6676_v0 }
 0x5dd   : > { %v3250_v11 = vadd.f32 0.014752088, %v3249_v45  ;;  %v6875_v59 = vmul.f32 %v3205_v39, %v6656_v10  ;;  %v6877_v12 = vadd.f32 1.1283791, %v3244_v51  ;;  %4216 = vset.pattern.permute.xlu1 %v4560_v58  ;;  %4221 = vrcp.f32 %v6868_v17 }
 0x5de   : > { %v6881_v1 = vmul.f32 0.5, %v6725_v57  ;;  %v6884_v27 = vmul.f32 %v3285_v49, %v6691_v52  ;;  %v6887_v7 = vmul.f32 %v3325_v47, %v6706_v42  ;;  %v3365_v60 = vadd.f32 1.1283791, %v3364_v19  ;;  %3629 = vperm.xlu1 %4216, %v6765_v14  }
 0x5df   : > { %4223 = vrcp.f32 %v6870_v29  ;;  %3645 = vperm.xlu0 %4215, %v6814_v50   ;;  %v3405_v39 = vadd.f32 1.1283791, %v3404_v53  ;;  %v3388_v45 = vand.u32 2147483648, %v6868_v17  ;;  %v6893_v10 = vadd.f32 1.0, %v3295_v30  ;;  %4214 = vset.pattern.permute.xlu2 %v4560_v58 }
 0x5e0   : > { %v3335_v5 = vmul.f32 %v3334_v4, %v6722_v28  ;;  %v3386_v52 = vand.u32 2147483647, %v6868_v17  ;;  %v3212_v57 = vadd.f32 0.112945676, %v3211_v36  ;;  %v3251_v42 = vmul.f32 %v3250_v11, %v6684_v44  ;;  %3621 = vperm.xlu2 %4214, %v6785_v20  }
 0x5e1   : > { %v3127_v51 = vmul.f32 3.8918573e-05, %v6630_v40  ;;  %v3426_v14 = vand.u32 2147483647, %v6870_v29  ;;  %v3428_v50 = vand.u32 2147483648, %v6870_v29  ;;  %4225 = vrcp.f32 %v6893_v10 }
 0x5e2   : > { %v3308_v16 = vand.u32 2147483648, %v6893_v10  ;;  %v6905_v28 = vmul.f32 %v3365_v60, %v6735_v61  ;;  %v6907_v58 = vadd.f32 1.0, %v3335_v5  ;;  %v3213_v15 = vmul.f32 %v3212_v57, %v6676_v0 }
 0x5e3   : > { %v3252_v49 = vadd.f32 0.112945676, %v3251_v42  ;;  %v4222_v34 = vpop.eup %4221  ;;  %v6911_v6 = vmul.f32 %v3405_v39, %v6741_v18  ;;  %vm3382_vm13 = vweird.f32 %v6868_v17  ;;  %v3389_v20 = vor.u32 1.1754944e-38, %v3388_v45  ;;  %v4315_v39 = vld [vmem:[%s4782_s11 + $0x8] sm:$0xff] }
 0x5e4   : > { %vm3422_vm14 = vweird.f32 %v6870_v29  ;;  %v3378_v47 = vmul.f32 %v4222_v34, %v6868_v17  ;;  %vm6916_vm15 = vcmp.eq.f32.partialorder %v3386_v52, 8.507059e+37  ;;  %v3306_v54 = vand.u32 2147483647, %v6893_v10 }
 0x5e5   : > { %v4224_v3 = vpop.eup %4223  ;;  %4227 = vrcp.f32 %v6907_v58  ;;  %v3128_v48 = vadd.f32 0.001143296, %v3127_v51  ;;  %vm6923_vm0 = vcmp.eq.f32.partialorder %v3426_v14, 8.507059e+37  ;;  %v3429_v19 = vor.u32 1.1754944e-38, %v3428_v50 }
 0x5e6   : > { %v3418_v18 = vmul.f32 %v4224_v3, %v6870_v29  ;;  %v6927_v53 = vor.u32 1.1754944e-38, %v3308_v16  ;;  %v3167_v30 = vmul.f32 3.8918573e-05, %v6650_v8  ;;  %v3379_v4 = vsub.f32 1.0, %v3378_v47  ;;  %3637 = vperm.xlu1 %4216, %v6808_v32   ;;  %v4316_v29 = vld [vmem:[%s4782_s11 + $0x20] sm:$0xff] }
 0x5e7   : > { %vm3302_vm1 = vweird.f32 %v6893_v10  ;;  %v3348_v36 = vand.u32 2147483648, %v6907_v58  ;;  %v3214_v11 = vadd.f32 0.4994258, %v3213_v15  ;;  %v3253_v60 = vmul.f32 %v3252_v49, %v6684_v44  ;;  %3686 = vrot.lane.b32.xlu0 %v4315_v39, %s4549_s17  ;;  %v4226_v45 = vpop.eup %4225 }
 0x5e8   : > { %vm3383_vm2 = vweird.f32 %v4222_v34  ;;  %v3419_v5 = vsub.f32 1.0, %v3418_v18  ;;  %v3346_v52 = vand.u32 2147483647, %v6907_v58  ;;  %v3047_v57 = vmul.f32 3.8918573e-05, %v6606_v41  ;;  %3633 = vperm.xlu2 %4214, %v6826_v22  }
 0x5e9   : > { %v3380_v42 = vmul.f32 %v4222_v34, %v3379_v4  ;;  %v3298_v51 = vmul.f32 %v4226_v45, %v6893_v10  ;;  %vm6939_vm4 = vcmp.eq.f32.partialorder %v3306_v54, 8.507059e+37  ;;  %v3215_v32 = vmul.f32 %v3214_v11, %v6676_v0  ;;  %vm3384_vm7 = vmor %vm3382_vm13, %vm3383_vm2 }
 0x5ea   : > { %v3129_v50 = vmul.f32 %v3128_v48, %v6630_v40  ;;  %v3420_v16 = vmul.f32 %v4224_v3, %v3419_v5  ;;  %vm3423_vm5 = vweird.f32 %v4224_v3  ;;  %vm3342_vm6 = vweird.f32 %v6907_v58  ;;  %v4317_v48 = vld [vmem:[%s4782_s11 + $0x10] sm:$0xff] }
 0x5eb   : > { %v3254_v15 = vadd.f32 0.4994258, %v3253_v60  ;;  %v3168_v49 = vadd.f32 0.001143296, %v3167_v30  ;;  %v4228_v47 = vpop.eup %4227  ;;  %v3381_v18 = vadd.f32 %v4222_v34, %v3380_v42  ;;  %v3299_v4 = vsub.f32 1.0, %v3298_v51  ;;  %vm3424_vm10 = vmor %vm3422_vm14, %vm3423_vm5 }
 0x5ec   : > { %v3349_v39 = vor.u32 1.1754944e-38, %v3348_v36  ;;  %v6947_v54 = vadd.f32 1.0, %v3215_v32  ;;  %v3421_v0 = vadd.f32 %v4224_v3, %v3420_v16  ;;  %vm3303_vm8 = vweird.f32 %v4226_v45 }
 0x5ed   : > { %v3338_v22 = vmul.f32 %v4228_v47, %v6907_v58  ;;  %vm6953_vm9 = vcmp.eq.f32.partialorder %v3346_v52, 8.507059e+37  ;;  %v3255_v30 = vmul.f32 %v3254_v15, %v6684_v44  ;;  %v3385_v11 = vsel %vm3384_vm7, %v4222_v34, %v3381_v18  ;;  %vm3304_vm12 = vmor %vm3302_vm1, %vm3303_vm8 }
 0x5ee   : > { %v3300_v36 = vmul.f32 %v4226_v45, %v3299_v4  ;;  %4229 = vrcp.f32 %v6947_v54  ;;  %v3130_v17 = vadd.f32 0.014752088, %v3129_v50  ;;  %v3390_v60 = vsel %vm6916_vm15, %v3389_v20, %v3385_v11  ;;  %3649 = vperm.xlu1 %4216, %v6843_v37  }
 0x5ef   : > { %v3425_v5 = vsel %vm3424_vm10, %v4224_v3, %v3421_v0  ;;  %v3339_v52 = vsub.f32 1.0, %v3338_v22  ;;  %v3169_v42 = vmul.f32 %v3168_v49, %v6650_v8  ;;  %v3391_v51 = vmul.f32 %v3390_v60, %v6905_v28  ;;  %3692 = vrot.lane.b32.xlu0 %v4316_v29, %s4549_s17 }
 0x5f0   : > { %v3430_v44 = vsel %vm6923_vm0, %v3429_v19, %v3425_v5  ;;  %v3301_v34 = vadd.f32 %v4226_v45, %v3300_v36  ;;  %vm3343_vm11 = vweird.f32 %v4228_v47  ;;  %v3226_v3 = vand.u32 2147483647, %v6947_v54  ;;  %3641 = vperm.xlu2 %4214, %v6854_v56   ;;  %v4318_v5 = vld [vmem:[%s4782_s11 + $0x38] sm:$0xff] }
 0x5f1   : > { %v3431_v32 = vmul.f32 %v3430_v44, %v6911_v6  ;;  %v3340_v20 = vmul.f32 %v4228_v47, %v3339_v52  ;;  %v6976_v28 = vadd.f32 1.0, %v3255_v30  ;;  %v4030_v61 = vclamps-f32 %v3391_v51, 1.0  ;;  %vm3344_vm13 = vmor %vm3342_vm6, %vm3343_vm11 }
 0x5f2   : > { %v3305_v63 = vsel %vm3304_vm12, %v4226_v45, %v3301_v34  ;;  %v3228_v19 = vand.u32 2147483648, %v6947_v54  ;;  %v3048_v50 = vadd.f32 0.001143296, %v3047_v57  ;;  %vm3222_vm14 = vweird.f32 %v6947_v54  ;;  %v4319_v34 = vld [vmem:[%s4782_s11] sm:$0xff] }
 0x5f3   : > { %v4031_v37 = vclamps-f32 %v3431_v32, 1.0  ;;  %v3310_v6 = vsel %vm6939_vm4, %v6927_v53, %v3305_v63  ;;  %v3341_v16 = vadd.f32 %v4228_v47, %v3340_v20  ;;  %4231 = vrcp.f32 %v6976_v28 }
 0x5f4   : > { %v4230_v10 = vpop.eup %4229  ;;  %v3464_v15 = vadd.f32 1.0, %v4030_v61  ;;  %v3311_v49 = vmul.f32 %v3310_v6, %v6884_v27  ;;  %v3131_v56 = vmul.f32 %v3130_v17, %v6630_v40  ;;  %vm6991_vm15 = vcmp.eq.f32.partialorder %v3226_v3, 8.507059e+37 }
 0x5f5   : > { %v3465_v45 = vadd.f32 1.0, %v4031_v37  ;;  %v3345_v57 = vsel %vm3344_vm13, %v4228_v47, %v3341_v16  ;;  %v3218_v14 = vmul.f32 %v4230_v10, %v6947_v54  ;;  %v3229_v4 = vor.u32 1.1754944e-38, %v3228_v19 }
 0x5f6   : > { %v3496_v18 = vmul.f32 %v3464_v15, %v6866_v62  ;;  %v4028_v27 = vclamps-f32 %v3311_v49, 1.0  ;;  %v3350_v58 = vsel %vm6953_vm9, %v3349_v39, %v3345_v57  ;;  %v3266_v47 = vand.u32 2147483647, %v6976_v28  ;;  %3688 = vrot.lane.b32.xlu1 %v4317_v48, %s4549_s17 }
 0x5f7   : > { %v3497_v0 = vmul.f32 %v3465_v45, %v6881_v1  ;;  %v3351_v22 = vmul.f32 %v3350_v58, %v6887_v7  ;;  %v3219_v30 = vsub.f32 1.0, %v3218_v14  ;;  %vm3262_vm0 = vweird.f32 %v6976_v28  ;;  %3698 = vrot.lane.b32.xlu0 %v4318_v5, %s4549_s17 }
 0x5f8   : > { %3538 = vmatpush.msra.mxu2 %v3496_v18  ;;  %v3462_v11 = vadd.f32 1.0, %v4028_v27  ;;  %v3132_v36 = vadd.f32 0.112945676, %v3131_v56  ;;  %v3170_v17 = vadd.f32 0.014752088, %v3169_v42  ;;  %v3049_v62 = vmul.f32 %v3048_v50, %v6606_v41  ;;  %3684 = vrot.lane.b32.xlu2 %v4319_v34, %s4549_s17  ;;  %v4320_v27 = vld [vmem:[%s4782_s11 + $0x28] sm:$0xff] }
 0x5f9   : > { %v4232_v39 = vpop.eup %4231  ;;  %3579 = vmatpush.msra.mxu3 %v3497_v0  ;;  %v4029_v1 = vclamps-f32 %v3351_v22, 1.0  ;;  %v3220_v7 = vmul.f32 %v4230_v10, %v3219_v30  ;;  %vm3223_vm1 = vweird.f32 %v4230_v10  ;;  %v3087_v60 = vmul.f32 3.8918573e-05, %v6610_v38  ;;  %v4321_v0 = vld [vmem:[%s4782_s11 + $0x50] sm:$0xff] }
 0x5fa   : > { %v3494_v52 = vmul.f32 %v3462_v11, %v6751_v2  ;;  %v3258_v42 = vmul.f32 %v4232_v39, %v6976_v28  ;;  %v3268_v51 = vand.u32 2147483648, %v6976_v28  ;;  %v3133_v44 = vmul.f32 %v3132_v36, %v6630_v40  ;;  %vm3224_vm2 = vmor %vm3222_vm14, %vm3223_vm1  ;;  %v4322_v11 = vld [vmem:[%s4782_s11 + $0x18] sm:$0xff] }
 0x5fb   : > { %v3463_v29 = vadd.f32 1.0, %v4029_v1  ;;  %v3221_v32 = vadd.f32 %v4230_v10, %v3220_v7  ;;  %v3171_v20 = vmul.f32 %v3170_v17, %v6650_v8  ;;  %v3050_v3 = vadd.f32 0.014752088, %v3049_v62 }
 0x5fc   : > { %3539 = vmatpush.msra.mxu2 %v3494_v52  ;;  %v3259_v2 = vsub.f32 1.0, %v3258_v42  ;;  %vm3263_vm4 = vweird.f32 %v4232_v39  ;;  %v3134_v61 = vadd.f32 0.4994258, %v3133_v44  ;;  %v3088_v63 = vadd.f32 0.001143296, %v3087_v60 }
 0x5fd   : > { %v3495_v19 = vmul.f32 %v3463_v29, %v6758_v26  ;;  %v3225_v50 = vsel %vm3224_vm2, %v4230_v10, %v3221_v32  ;;  %v3172_v37 = vadd.f32 0.112945676, %v3171_v20  ;;  %v3051_v6 = vmul.f32 %v3050_v3, %v6606_v41  ;;  %vm3264_vm5 = vmor %vm3262_vm0, %vm3263_vm4  ;;  %v4323_v29 = vld [vmem:[%s4782_s11 + $0x40] sm:$0xff]  ;;  %v4324_v3 = vld [vmem:[%s4782_s11 + $0x68] sm:$0xff] }
 0x5fe   : > { %v3230_v16 = vsel %vm6991_vm15, %v3229_v4, %v3225_v50  ;;  %v3260_v15 = vmul.f32 %v4232_v39, %v3259_v2  ;;  %v3135_v49 = vmul.f32 %v3134_v61, %v6630_v40  ;;  %v3089_v54 = vmul.f32 %v3088_v63, %v6610_v38  ;;  %3694 = vrot.lane.b32.xlu1 %v4320_v27, %s4549_s17 }
 0x5ff   : > { %3580 = vmatpush.msra.mxu3 %v3495_v19  ;;  %v3231_v56 = vmul.f32 %v3230_v16, %v6875_v59  ;;  %v3173_v45 = vmul.f32 %v3172_v37, %v6650_v8  ;;  %v3052_v26 = vadd.f32 0.112945676, %v3051_v6  ;;  %v2967_v10 = vmul.f32 3.8918573e-05, %v6557_v23  ;;  %3704 = vrot.lane.b32.xlu0 %v4321_v0, %s4549_s17  ;;  %v4325_v19 = vld [vmem:[%s4782_s11 + $0x30] sm:$0xff] }
 0x600   : > { %v3261_v57 = vadd.f32 %v4232_v39, %v3260_v15  ;;  %v3269_v14 = vor.u32 1.1754944e-38, %v3268_v51  ;;  %v7027_v18 = vadd.f32 1.0, %v3135_v49  ;;  %v3090_v53 = vadd.f32 0.014752088, %v3089_v54  ;;  %3690 = vrot.lane.b32.xlu2 %v4322_v11, %s4549_s17  ;;  %v4326_v11 = vld [vmem:[%s4782_s11 + $0x58] sm:$0xff] }
 0x601   : > { %v4026_v40 = vclamps-f32 %v3231_v56, 1.0  ;;  %v3174_v59 = vadd.f32 0.4994258, %v3173_v45  ;;  %v3053_v58 = vmul.f32 %v3052_v26, %v6606_v41  ;;  %v2968_v4 = vadd.f32 0.001143296, %v2967_v10 }
 0x602   : > { %v3246_v22 = vmul.f32 %v6877_v12, %v6669_v33  ;;  %v3265_v30 = vsel %vm3264_vm5, %v4232_v39, %v3261_v57  ;;  %vm3267_vm6 = vcmp.eq.f32.partialorder %v3266_v47, 8.507059e+37  ;;  %4233 = vrcp.f32 %v7027_v18 }
 0x603   : > { %v3460_v36 = vadd.f32 1.0, %v4026_v40  ;;  %v3270_v28 = vsel %vm3267_vm6, %v3269_v14, %v3265_v30  ;;  %v3175_v17 = vmul.f32 %v3174_v59, %v6650_v8  ;;  %v3007_v62 = vmul.f32 3.8918573e-05, %v6570_v46 }
 0x604   : > { %v3125_v48 = vadd.f32 1.1283791, %v6792_v35  ;;  %v3271_v1 = vmul.f32 %v3270_v28, %v3246_v22  ;;  %v3054_v7 = vadd.f32 0.4994258, %v3053_v58  ;;  %v3091_v60 = vmul.f32 %v3090_v53, %v6610_v38  ;;  %v8134_v22 = vld [vmem:[#allocation39_spill] sm:$0xff] }
 0x605   : > { %v3165_v33 = vadd.f32 1.1283791, %v6797_v43  ;;  %v3492_v12 = vmul.f32 %v3460_v36, %v6699_v25  ;;  %v7048_v47 = vadd.f32 1.0, %v3175_v17  ;;  %v2969_v39 = vmul.f32 %v2968_v4, %v6557_v23 }
 0x606   : > { %v7053_v8 = vmul.f32 %v6779_v55, %v6588_v31  ;;  %v4027_v5 = vclamps-f32 %v3271_v1, 1.0  ;;  %v3055_v35 = vmul.f32 %v3054_v7, %v6606_v41  ;;  %v3092_v52 = vadd.f32 0.112945676, %v3091_v60  ;;  %3700 = vrot.lane.b32.xlu1 %v4323_v29, %s4549_s17  ;;  %v4328_v1 = vld [vmem:[%s4782_s11 + $0x48] sm:$0xff] }
 0x607   : > { %3540 = vmatpush.msra.mxu2 %v3492_v12  ;;  %v3146_v42 = vand.u32 2147483647, %v7027_v18  ;;  %v3148_v43 = vand.u32 2147483648, %v7027_v18  ;;  %4235 = vrcp.f32 %v7048_v47  ;;  %v3008_v25 = vadd.f32 0.001143296, %v3007_v62  ;;  %3710 = vrot.lane.b32.xlu0 %v4324_v3, %s4549_s17 }
 0x608   : > { %v4234_v51 = vpop.eup %4233  ;;  %v3461_v44 = vadd.f32 1.0, %v4027_v5  ;;  %v7059_v34 = vadd.f32 1.0, %v3055_v35  ;;  %v3093_v31 = vmul.f32 %v3092_v52, %v6610_v38  ;;  %v2970_v55 = vadd.f32 0.014752088, %v2969_v39  ;;  %3696 = vrot.lane.b32.xlu2 %v4325_v19, %s4549_s17  ;;  %v4329_v19 = vld [vmem:[%s4782_s11 + $0x70] sm:$0xff] }
 0x609   : > { %v3126_v41 = vmul.f32 %v3125_v48, %v6613_v24  ;;  %v7066_v32 = vmul.f32 %v3165_v33, %v6632_v13  ;;  %v3138_v20 = vmul.f32 %v4234_v51, %v7027_v18  ;;  %vm3142_vm7 = vweird.f32 %v7027_v18  ;;  %v4327_v18 = vld [vmem:[%s4789_s26] sm:$0xff] }
 0x60a   : > { %v3493_v2 = vmul.f32 %v3461_v44, %v6709_v9  ;;  %v3186_v61 = vand.u32 2147483647, %v7048_v47  ;;  %v3188_v63 = vand.u32 2147483648, %v7048_v47  ;;  %4237 = vrcp.f32 %v7059_v34 }
 0x60b   : > { %v3139_v24 = vsub.f32 1.0, %v3138_v20  ;;  %vm7078_vm8 = vcmp.eq.f32.partialorder %v3146_v42, 8.507059e+37  ;;  %v3094_v50 = vadd.f32 0.4994258, %v3093_v31  ;;  %v2971_v37 = vmul.f32 %v2970_v55, %v6557_v23 }
 0x60c   : > { %3581 = vmatpush.msra.mxu3 %v3493_v2  ;;  %v3149_v6 = vor.u32 1.1754944e-38, %v3148_v43  ;;  %vm3182_vm9 = vweird.f32 %v7048_v47  ;;  %v3009_v9 = vmul.f32 %v3008_v25, %v6570_v46  ;;  %v2887_v16 = vmul.f32 3.8918573e-05, %v6517_v21 }
 0x60d   : > { %v4236_v15 = vpop.eup %4235  ;;  %v3140_v49 = vmul.f32 %v4234_v51, %v3139_v24  ;;  %vm3143_vm10 = vweird.f32 %v4234_v51  ;;  %v3095_v54 = vmul.f32 %v3094_v50, %v6610_v38  ;;  %v2972_v56 = vadd.f32 0.112945676, %v2971_v37  ;;  %v8137_v24 = vld [vmem:[#allocation96_spill] sm:$0xff]  ;;  %v8138_v37 = vld [vmem:[#allocation26_spill] sm:$0xff] }
 0x60e   : > { %v3178_v45 = vmul.f32 %v4236_v15, %v7048_v47  ;;  %vm7088_vm11 = vcmp.eq.f32.partialorder %v3186_v61, 8.507059e+37  ;;  %v3189_v10 = vor.u32 1.1754944e-38, %v3188_v63  ;;  %v3010_v57 = vadd.f32 0.014752088, %v3009_v9  ;;  %vm3144_vm12 = vmor %vm3142_vm7, %vm3143_vm10  ;;  %3706 = vrot.lane.b32.xlu1 %v4326_v11, %s4549_s17 }
 0x60f   : > { %v2888_v14 = vadd.f32 0.001143296, %v2887_v16  ;;  %v3141_v53 = vadd.f32 %v4234_v51, %v3140_v49  ;;  %v3066_v27 = vand.u32 2147483647, %v7059_v34  ;;  %v7093_v40 = vadd.f32 1.0, %v3095_v54  ;;  %3748 = vrot.lane.b32.xlu0 %v4327_v18, %s4549_s17  ;;  %v4331_v49 = vld [vmem:[%s4782_s11 + $0x60] sm:$0xff] }
 0x610   : > { %v2973_v59 = vmul.f32 %v2972_v56, %v6557_v23  ;;  %v4238_v38 = vpop.eup %4237  ;;  %v3179_v58 = vsub.f32 1.0, %v3178_v45  ;;  %v3011_v4 = vmul.f32 %v3010_v57, %v6570_v46  ;;  %v2927_v30 = vmul.f32 3.8918573e-05, %v8134_v22  ;;  %3702 = vrot.lane.b32.xlu2 %v4328_v1, %s4549_s17  ;;  %v8142_v1 = vld [vmem:[#allocation93_spill] sm:$0xff] }
 0x611   : > { %v2889_v0 = vmul.f32 %v2888_v14, %v6517_v21  ;;  %v3145_v36 = vsel %vm3144_vm12, %v4234_v51, %v3141_v53  ;;  %v3058_v28 = vmul.f32 %v4238_v38, %v7059_v34  ;;  %vm3062_vm13 = vweird.f32 %v7059_v34 }
 0x612   : > { %4239 = vrcp.f32 %v7093_v40  ;;  %v3150_v17 = vsel %vm7078_vm8, %v3149_v6, %v3145_v36  ;;  %v3180_v62 = vmul.f32 %v4236_v15, %v3179_v58  ;;  %vm3183_vm14 = vweird.f32 %v4236_v15  ;;  %v8140_v36 = vld [vmem:[#allocation81_spill] sm:$0xff] }
 0x613   : > { %v3068_v48 = vand.u32 2147483648, %v7059_v34  ;;  %v3151_v7 = vmul.f32 %v3150_v17, %v3126_v41  ;;  %v3059_v60 = vsub.f32 1.0, %v3058_v28  ;;  %vm7113_vm15 = vcmp.eq.f32.partialorder %v3066_v27, 8.507059e+37  ;;  %vm3184_vm0 = vmor %vm3182_vm9, %vm3183_vm14  ;;  %v8141_v28 = vld [vmem:[#allocation102_spill] sm:$0xff] }
 0x614   : > { %v2974_v12 = vadd.f32 0.4994258, %v2973_v59  ;;  %v3181_v39 = vadd.f32 %v4236_v15, %v3180_v62  ;;  %v3012_v5 = vadd.f32 0.112945676, %v3011_v4  ;;  %v2890_v35 = vadd.f32 0.014752088, %v2889_v0 }
 0x615   : > { %v2928_v52 = vadd.f32 0.001143296, %v2927_v30  ;;  %v4024_v42 = vclamps-f32 %v3151_v7, 1.0  ;;  %v3060_v43 = vmul.f32 %v4238_v38, %v3059_v60  ;;  %vm3063_vm1 = vweird.f32 %v4238_v38 }
 0x616   : > { %v2975_v25 = vmul.f32 %v2974_v12, %v6557_v23  ;;  %v3185_v51 = vsel %vm3184_vm0, %v4236_v15, %v3181_v39  ;;  %v3069_v44 = vor.u32 1.1754944e-38, %v3068_v48  ;;  %v3013_v31 = vmul.f32 %v3012_v5, %v6570_v46  ;;  %vm3064_vm2 = vmor %vm3062_vm13, %vm3063_vm1  ;;  %3712 = vrot.lane.b32.xlu1 %v4329_v19, %s4549_s17  ;;  %v4332_v48 = vld [vmem:[%s4789_s26 + $0x8] sm:$0xff]  ;;  %v4333_v39 = vld [vmem:[%s4789_s26 + $0x30] sm:$0xff] }
 0x617   : > { %v2891_v55 = vmul.f32 %v2890_v35, %v6517_v21  ;;  %v3458_v41 = vadd.f32 1.0, %v4024_v42  ;;  %v3190_v20 = vsel %vm7088_vm11, %v3189_v10, %v3185_v51  ;;  %v3061_v3 = vadd.f32 %v4238_v38, %v3060_v43  ;;  %v4334_v42 = vld [vmem:[%s4782_s11 + $0x78] sm:$0xff]  ;;  %s4034_s11 = sshll.u32 %s8245_s20, 5 }
 0x618   : > { %v4240_v29 = vpop.eup %4239  ;;  %v7124_v47 = vadd.f32 1.0, %v2975_v25  ;;  %v3191_v2 = vmul.f32 %v3190_v20, %v7066_v32  ;;  %v3014_v61 = vadd.f32 0.4994258, %v3013_v31  ;;  %v2929_v63 = vmul.f32 %v2928_v52, %v8134_v22  ;;  %v4330_v32 = vld [vmem:[%s4789_s26 + $0x18] sm:$0xff]  ;;  %3708 = vrot.lane.b32.xlu2 %v4331_v49, %s4549_s17 }
 0x619   : > { %v3098_v23 = vmul.f32 %v4240_v29, %v7093_v40  ;;  %v3490_v13 = vmul.f32 %v3458_v41, %v8137_v24  ;;  %v3065_v50 = vsel %vm3064_vm2, %v4238_v38, %v3061_v3  ;;  %v2807_v6 = vmul.f32 3.8918573e-05, %v8138_v37  ;;  %3754 = vrot.lane.b32.xlu0 %v4330_v32, %s4549_s17  ;;  %v8139_v38 = vld [vmem:[#allocation97_spill] sm:$0xff]  ;;  %v8147_v32 = vld [vmem:[#allocation70_spill] sm:$0xff] }
 0x61a   : > { %4241 = vrcp.f32 %v7124_v47  ;;  %v4025_v34 = vclamps-f32 %v3191_v2, 1.0  ;;  %v3070_v9 = vsel %vm7113_vm15, %v3069_v44, %v3065_v50  ;;  %v3108_v15 = vand.u32 2147483648, %v7093_v40  ;;  %v8145_v44 = vld [vmem:[#allocation54_spill] sm:$0xff]  ;;  %v8146_v50 = vld [vmem:[#allocation59_spill] sm:$0xff] }
 0x61b   : > { %v3099_v16 = vsub.f32 1.0, %v3098_v23  ;;  %3541 = vmatpush.msra.mxu2 %v3490_v13  ;;  %v3071_v54 = vmul.f32 %v3070_v9, %v7053_v8  ;;  %v3106_v56 = vand.u32 2147483647, %v7093_v40  ;;  %v3015_v45 = vmul.f32 %v3014_v61, %v6570_v46  ;;  %v8148_v9 = vld [vmem:[#allocation94_spill] sm:$0xff] }
 0x61c   : > { %v2892_v26 = vadd.f32 0.112945676, %v2891_v55  ;;  %v3459_v10 = vadd.f32 1.0, %v4025_v34  ;;  %vm3103_vm4 = vweird.f32 %v4240_v29  ;;  %v2930_v14 = vadd.f32 0.014752088, %v2929_v63 }
 0x61d   : > { %v3100_v57 = vmul.f32 %v4240_v29, %v3099_v16  ;;  %v4022_v53 = vclamps-f32 %v3071_v54, 1.0  ;;  %vm3102_vm5 = vweird.f32 %v7093_v40  ;;  %v7147_v27 = vadd.f32 1.0, %v3015_v45 }
 0x61e   : > { %v2893_v59 = vmul.f32 %v2892_v26, %v6517_v21  ;;  %v3491_v58 = vmul.f32 %v3459_v10, %v8139_v38  ;;  %v3109_v4 = vor.u32 1.1754944e-38, %v3108_v15  ;;  %v2931_v0 = vmul.f32 %v2930_v14, %v8134_v22  ;;  %vm3104_vm6 = vmor %vm3102_vm5, %vm3103_vm4  ;;  %3750 = vrot.lane.b32.xlu1 %v4332_v48, %s4549_s17  ;;  %v8151_v10 = vld [vmem:[#allocation100_spill] sm:$0xff] }
 0x61f   : > { %v3101_v8 = vadd.f32 %v4240_v29, %v3100_v57  ;;  %v3456_v30 = vadd.f32 1.0, %v4022_v53  ;;  %v2986_v11 = vand.u32 2147483647, %v7124_v47  ;;  %4243 = vrcp.f32 %v7147_v27 }
 0x620   : > { %v4242_v46 = vpop.eup %4241  ;;  %v2808_v40 = vadd.f32 0.001143296, %v2807_v6  ;;  %v3086_v18 = vmul.f32 %v8141_v28, %v8140_v36  ;;  %3582 = vmatpush.msra.mxu3 %v3491_v58  ;;  %vm3107_vm7 = vcmp.eq.f32.partialorder %v3106_v56, 8.507059e+37  ;;  %v2988_v33 = vand.u32 2147483648, %v7124_v47  ;;  %3714 = vrot.lane.b32.xlu2 %v4334_v42, %s4549_s17  ;;  %v4335_v56 = vld [vmem:[%s4789_s26 + $0x20] sm:$0xff]  ;;  %v4337_v42 = vld [vmem:[%s4789_s26 + $0x38] sm:$0xff] }
 0x621   : > { %v3105_v17 = vsel %vm3104_vm6, %v4240_v29, %v3101_v8  ;;  %v2978_v62 = vmul.f32 %v4242_v46, %v7124_v47  ;;  %v3488_v7 = vmul.f32 %v3456_v30, %v8142_v1  ;;  %v2894_v12 = vadd.f32 0.4994258, %v2893_v59  ;;  %3760 = vrot.lane.b32.xlu0 %v4333_v39, %s4549_s17  ;;  %v8154_v39 = vld [vmem:[#allocation101_spill] sm:$0xff] }
 0x622   : > { %v3110_v60 = vsel %vm3107_vm7, %v3109_v4, %v3105_v17  ;;  %vm2982_vm8 = vweird.f32 %v7124_v47  ;;  %v2932_v52 = vadd.f32 0.112945676, %v2931_v0  ;;  %vm7166_vm9 = vcmp.eq.f32.partialorder %v2986_v11, 8.507059e+37  ;;  %v4336_v4 = vld [vmem:[%s4789_s26 + $0x10] sm:$0xff] }
 0x623   : > { %v3111_v5 = vmul.f32 %v3110_v60, %v3086_v18  ;;  %v2979_v35 = vsub.f32 1.0, %v2978_v62  ;;  %3542 = vmatpush.msra.mxu2 %v3488_v7  ;;  %v2895_v25 = vmul.f32 %v2894_v12, %v6517_v21  ;;  %v2809_v51 = vmul.f32 %v2808_v40, %v8138_v37  ;;  %v8152_v7 = vld [vmem:[#allocation88_spill] sm:$0xff] }
 0x624   : > { %v2847_v31 = vmul.f32 3.8918573e-05, %v8145_v44  ;;  %vm2983_vm10 = vweird.f32 %v4242_v46  ;;  %v2933_v41 = vmul.f32 %v2932_v52, %v8134_v22  ;;  %v2989_v3 = vor.u32 1.1754944e-38, %v2988_v33  ;;  %v8153_v33 = vld [vmem:[#allocation82_spill] sm:$0xff] }
 0x625   : > { %v4023_v55 = vclamps-f32 %v3111_v5, 1.0  ;;  %v2980_v29 = vmul.f32 %v4242_v46, %v2979_v35  ;;  %v4244_v20 = vpop.eup %4243  ;;  %v3026_v2 = vand.u32 2147483647, %v7147_v27  ;;  %v7175_v23 = vadd.f32 1.0, %v2895_v25  ;;  %vm2984_vm11 = vmor %vm2982_vm8, %vm2983_vm10 }
 0x626   : > { %v2810_v61 = vadd.f32 0.014752088, %v2809_v51  ;;  %v3018_v21 = vmul.f32 %v4244_v20, %v7147_v27  ;;  %v2848_v24 = vadd.f32 0.001143296, %v2847_v31  ;;  %v3028_v13 = vand.u32 2147483648, %v7147_v27  ;;  %3756 = vrot.lane.b32.xlu1 %v4335_v56, %s4549_s17 }
 0x627   : > { %v3457_v63 = vadd.f32 1.0, %v4023_v55  ;;  %v2981_v19 = vadd.f32 %v4242_v46, %v2980_v29  ;;  %4245 = vrcp.f32 %v7175_v23  ;;  %v2727_v6 = vmul.f32 3.8918573e-05, %v8146_v50 }
 0x628   : > { %v2767_v34 = vmul.f32 3.8918573e-05, %v8147_v32  ;;  %v3019_v49 = vsub.f32 1.0, %v3018_v21  ;;  %v2934_v54 = vadd.f32 0.4994258, %v2933_v41  ;;  %vm3023_vm12 = vweird.f32 %v4244_v20  ;;  %3752 = vrot.lane.b32.xlu2 %v4336_v4, %s4549_s17 }
 0x629   : > { %v3489_v16 = vmul.f32 %v3457_v63, %v8148_v9  ;;  %v2985_v15 = vsel %vm2984_vm11, %v4242_v46, %v2981_v19  ;;  %vm7189_vm13 = vcmp.eq.f32.partialorder %v3026_v2, 8.507059e+37  ;;  %v2811_v26 = vmul.f32 %v2810_v61, %v8138_v37  ;;  %v4338_v63 = vld [vmem:[%s4789_s26 + $0x28] sm:$0xff]  ;;  %s3824_s26 = sadd.s32 %s4034_s11, %s4033_s24 }
 0x62a   : > { %v2990_v47 = vsel %vm7166_vm9, %v2989_v3, %v2985_v15  ;;  %v3020_v14 = vmul.f32 %v4244_v20, %v3019_v49  ;;  %v2935_v53 = vmul.f32 %v2934_v54, %v8134_v22  ;;  %v2849_v59 = vmul.f32 %v2848_v24, %v8145_v44  ;;  %v8155_v15 = vld [vmem:[#allocation89_spill] sm:$0xff]  ;;  %s4035_s10 = sshll.u32 %s3824_s26, 3 }
 0x62b   : > { %3583 = vmatpush.msra.mxu3 %v3489_v16  ;;  %v2991_v57 = vmul.f32 %v2990_v47, %v8151_v10  ;;  %vm3022_vm14 = vweird.f32 %v7147_v27  ;;  %v2812_v38 = vadd.f32 0.112945676, %v2811_v26  ;;  %v2728_v58 = vadd.f32 0.001143296, %v2727_v6  ;;  %v8157_v26 = vld [vmem:[#allocation98_spill] sm:$0xff]  ;;  %s3826_s14 = scalar_lea.hbm %s8246_s6, %s4035_s10 }
 0x62c   : > { %v2768_v8 = vadd.f32 0.001143296, %v2767_v34  ;;  %v3021_v46 = vadd.f32 %v4244_v20, %v3020_v14  ;;  %v3029_v30 = vor.u32 1.1754944e-38, %v3028_v13  ;;  %v7200_v11 = vadd.f32 1.0, %v2935_v53  ;;  %vm3024_vm15 = vmor %vm3022_vm14, %vm3023_vm12  ;;  %s3829_s9 = sshll.u32 %s3826_s14, 4  ;;  %s3830_s9 = int_to_ptr.hbm [resolvable:$true] %s3829_s9 }
 0x62d   : > { %v4020_v0 = vclamps-f32 %v2991_v57, 1.0  ;;  %v4246_v40 = vpop.eup %4245  ;;  %v2908_v22 = vand.u32 2147483648, %v7175_v23  ;;  %v2813_v36 = vmul.f32 %v2812_v38, %v8138_v37  ;;  %v2850_v27 = vadd.f32 0.014752088, %v2849_v59  ;;  %s4420_s13 = sshra.s32 %s3830_s9, 4  ;;  %s4421_s13 = int_to_ptr.hbm [resolvable:$true] %s4420_s13 }
 0x62e   : > { %v2729_v28 = vmul.f32 %v2728_v58, %v8146_v50  ;;  %v3025_v17 = vsel %vm3024_vm15, %v4244_v20, %v3021_v46  ;;  %v2898_v62 = vmul.f32 %v4246_v40, %v7175_v23  ;;  %v2769_v48 = vmul.f32 %v2768_v8, %v8147_v32  ;;  %3762 = vrot.lane.b32.xlu1 %v4337_v42, %s4549_s17  ;;  %s4422_s18 = scalar_lea.hbm %s4421_s13, 128  ;;  %p4427_p1 = scmp.lt.s32.totalorder %s4421_s13, %s8246_s6 }
 0x62f   : > { %v3454_v18 = vadd.f32 1.0, %v4020_v0  ;;  %v3030_v1 = vsel %vm7189_vm13, %v3029_v30, %v3025_v17  ;;  %vm2902_vm0 = vweird.f32 %v7175_v23  ;;  %4247 = vrcp.f32 %v7200_v11  ;;  %p4423_p7 = scmp.ne.s32.totalorder %s4421_s13, %s4422_s18  ;;  %p4428_p3 = scmp.lt.s32.totalorder %s4426_s8, %s4422_s18 }
 0x630   : > { %v2647_v60 = vmul.f32 3.8918573e-05, %v8152_v7  ;;  %v3031_v5 = vmul.f32 %v3030_v1, %v8154_v39  ;;  %v2899_v35 = vsub.f32 1.0, %v2898_v62  ;;  %v2906_v52 = vand.u32 2147483647, %v7175_v23  ;;  %3758 = vrot.lane.b32.xlu2 %v4338_v63, %s4549_s17  ;;  %v8156_v23 = vld [vmem:[#allocation74_spill] sm:$0xff] }
 0x631   : > { %v3486_v12 = vmul.f32 %v3454_v18, %v8153_v33  ;;  %v2909_v43 = vor.u32 1.1754944e-38, %v2908_v22  ;;  %v2814_v25 = vadd.f32 0.4994258, %v2813_v36  ;;  %v2851_v51 = vmul.f32 %v2850_v27, %v8145_v44  ;;  %v8160_v33 = vld [vmem:[#allocation57_spill] sm:$0xff]  ;;  %s8242_s17 = sld [smem:[#allocation104_spill]]  ;;  %p4424_p13 = pnand %p4423_p7, %p4730_p4 }
 0x632   : > { %v2730_v31 = vadd.f32 0.014752088, %v2729_v28  ;;  %v4021_v55 = vclamps-f32 %v3031_v5, 1.0  ;;  %v2900_v29 = vmul.f32 %v4246_v40, %v2899_v35  ;;  %vm2903_vm1 = vweird.f32 %v4246_v40  ;;  %p4429_p5 = por %p4428_p3, %p4427_p1 }
 0x633   : > { %3543 = vmatpush.msra.mxu2 %v3486_v12  ;;  %v2770_v41 = vadd.f32 0.014752088, %v2769_v48  ;;  %v2815_v20 = vmul.f32 %v2814_v25, %v8138_v37  ;;  %v2852_v3 = vadd.f32 0.112945676, %v2851_v51  ;;  %v2648_v61 = vadd.f32 0.001143296, %v2647_v60  ;;  %vm2904_vm2 = vmor %vm2902_vm0, %vm2903_vm1  ;;  %p4425_p0 = pneg %p4424_p13 }
 0x634   : > { %v2731_v2 = vmul.f32 %v2730_v31, %v8146_v50  ;;  %v3455_v19 = vadd.f32 1.0, %v4021_v55  ;;  %v2901_v21 = vadd.f32 %v4246_v40, %v2900_v29  ;;  %v2946_v24 = vand.u32 2147483647, %v7200_v11 }
 0x635   : > { %v2771_v13 = vmul.f32 %v2770_v41, %v8147_v32  ;;  %v4248_v6 = vpop.eup %4247  ;;  %v7227_v34 = vadd.f32 1.0, %v2815_v20  ;;  %v2853_v37 = vmul.f32 %v2852_v3, %v8145_v44  ;;  %v2649_v16 = vmul.f32 %v2648_v61, %v8152_v7  ;;  %p4430_p6 = pnand %p4429_p5, %p4425_p0 }
 0x636   : > { %v2732_v9 = vadd.f32 0.112945676, %v2731_v2  ;;  %v3487_v49 = vmul.f32 %v3455_v19, %v8155_v15  ;;  %v2905_v54 = vsel %vm2904_vm2, %v4246_v40, %v2901_v21  ;;  %vm2907_vm4 = vcmp.eq.f32.partialorder %v2906_v52, 8.507059e+37  ;;  %v8164_v19 = vld [vmem:[#allocation22_spill] sm:$0xff]  ;;  %v8165_v15 = vld [vmem:[#allocation63_spill] sm:$0xff] }
 0x637   : > { %v2938_v56 = vmul.f32 %v4248_v6, %v7200_v11  ;;  %v2910_v47 = vsel %vm2907_vm4, %v2909_v43, %v2905_v54  ;;  %vm2942_vm5 = vweird.f32 %v7200_v11  ;;  %4249 = vrcp.f32 %v7227_v34 }
 0x638   : > { %v2687_v45 = vmul.f32 3.8918573e-05, %v8156_v23  ;;  %3584 = vmatpush.msra.mxu3 %v3487_v49  ;;  %v2911_v10 = vmul.f32 %v2910_v47, %v8157_v26  ;;  %v2948_v14 = vand.u32 2147483648, %v7200_v11  ;;  %v2854_v53 = vadd.f32 0.4994258, %v2853_v37 }
 0x639   : > { %v2939_v57 = vsub.f32 1.0, %v2938_v56  ;;  %vm7238_vm6 = vcmp.eq.f32.partialorder %v2946_v24, 8.507059e+37  ;;  %v2733_v38 = vmul.f32 %v2732_v9, %v8146_v50  ;;  %v2772_v58 = vadd.f32 0.112945676, %v2771_v13 }
 0x63a   : > { %v2650_v8 = vadd.f32 0.014752088, %v2649_v16  ;;  %v4018_v4 = vclamps-f32 %v2911_v10, 1.0  ;;  %vm2943_vm7 = vweird.f32 %v4248_v6  ;;  %v2855_v46 = vmul.f32 %v2854_v53, %v8145_v44 }
 0x63b   : > { %v2940_v0 = vmul.f32 %v4248_v6, %v2939_v57  ;;  %v2734_v30 = vadd.f32 0.4994258, %v2733_v38  ;;  %v2773_v40 = vmul.f32 %v2772_v58, %v8147_v32  ;;  %v2688_v36 = vadd.f32 0.001143296, %v2687_v45  ;;  %vm2944_vm8 = vmor %vm2942_vm5, %vm2943_vm7 }
 0x63c   : > { %v2651_v22 = vmul.f32 %v2650_v8, %v8152_v7  ;;  %v3452_v27 = vadd.f32 1.0, %v4018_v4  ;;  %v2949_v18 = vor.u32 1.1754944e-38, %v2948_v14  ;;  %v7246_v17 = vadd.f32 1.0, %v2855_v46  ;;  %v8168_v14 = vld [vmem:[#allocation92_spill] sm:$0xff] }
 0x63d   : > { %v2941_v28 = vadd.f32 %v4248_v6, %v2940_v0  ;;  %v4250_v62 = vpop.eup %4249  ;;  %v2735_v48 = vmul.f32 %v2734_v30, %v8146_v50  ;;  %v2774_v1 = vadd.f32 0.4994258, %v2773_v40  ;;  %v2689_v44 = vmul.f32 %v2688_v36, %v8156_v23  ;;  %v8161_v50 = vld [vmem:[#allocation99_spill] sm:$0xff] }
 0x63e   : > { %v2652_v60 = vadd.f32 0.112945676, %v2651_v22  ;;  %v3484_v12 = vmul.f32 %v3452_v27, %v8160_v33  ;;  %v2818_v5 = vmul.f32 %v4250_v62, %v7227_v34  ;;  %vm2822_vm9 = vweird.f32 %v7227_v34 }
 0x63f   : > { %v2945_v39 = vsel %vm2944_vm8, %v4248_v6, %v2941_v28  ;;  %v2826_v52 = vand.u32 2147483647, %v7227_v34  ;;  %v2828_v11 = vand.u32 2147483648, %v7227_v34  ;;  %4251 = vrcp.f32 %v7246_v17 }
 0x640   : > { %v2950_v35 = vsel %vm7238_vm6, %v2949_v18, %v2945_v39  ;;  %3544 = vmatpush.msra.mxu2 %v3484_v12  ;;  %v2819_v43 = vsub.f32 1.0, %v2818_v5  ;;  %vm2823_vm10 = vweird.f32 %v4250_v62  ;;  %v7261_v25 = vadd.f32 1.0, %v2735_v48  ;;  %v8174_v12 = vld [vmem:[#allocation52_spill] sm:$0xff]  ;;  %v8175_v5 = vld [vmem:[#allocation73_spill] sm:$0xff] }
 0x641   : > { %v2951_v42 = vmul.f32 %v2950_v35, %v8161_v50  ;;  %v2866_v51 = vand.u32 2147483647, %v7246_v17  ;;  %v2775_v31 = vmul.f32 %v2774_v1, %v8147_v32  ;;  %v2653_v55 = vmul.f32 %v2652_v60, %v8152_v7  ;;  %vm2824_vm12 = vmor %vm2822_vm9, %vm2823_vm10 }
 0x642   : > { %v2690_v29 = vadd.f32 0.014752088, %v2689_v44  ;;  %v2820_v20 = vmul.f32 %v4250_v62, %v2819_v43  ;;  %v2868_v3 = vand.u32 2147483648, %v7246_v17  ;;  %4253 = vrcp.f32 %v7261_v25  ;;  %v8173_v44 = vld [vmem:[#allocation38_spill] sm:$0xff] }
 0x643   : > { %v4019_v41 = vclamps-f32 %v2951_v42, 1.0  ;;  %vm7268_vm11 = vcmp.eq.f32.partialorder %v2826_v52, 8.507059e+37  ;;  %v2829_v61 = vor.u32 1.1754944e-38, %v2828_v11  ;;  %v7272_v63 = vadd.f32 1.0, %v2775_v31 }
 0x644   : > { %v2567_v21 = vmul.f32 3.8918573e-05, %v8164_v19  ;;  %v2821_v32 = vadd.f32 %v4250_v62, %v2820_v20  ;;  %v2654_v13 = vadd.f32 0.4994258, %v2653_v55  ;;  %v2691_v6 = vmul.f32 %v2690_v29, %v8156_v23 }
 0x645   : > { %v3453_v24 = vadd.f32 1.0, %v4019_v41  ;;  %v4252_v37 = vpop.eup %4251  ;;  %vm2862_vm13 = vweird.f32 %v7246_v17  ;;  %v2746_v9 = vand.u32 2147483647, %v7261_v25  ;;  %v2748_v16 = vand.u32 2147483648, %v7261_v25 }
 0x646   : > { %4255 = vrcp.f32 %v7272_v63  ;;  %v2825_v54 = vsel %vm2824_vm12, %v4250_v62, %v2821_v32  ;;  %v2858_v56 = vmul.f32 %v4252_v37, %v7246_v17  ;;  %vm7285_vm14 = vcmp.eq.f32.partialorder %v2866_v51, 8.507059e+37  ;;  %v8176_v17 = vld [vmem:[#allocation95_spill] sm:$0xff] }
 0x647   : > { %v3485_v49 = vmul.f32 %v3453_v24, %v8165_v15  ;;  %v2869_v45 = vor.u32 1.1754944e-38, %v2868_v3  ;;  %v2830_v34 = vsel %vm7268_vm11, %v2829_v61, %v2825_v54  ;;  %vm2742_vm15 = vweird.f32 %v7261_v25 }
 0x648   : > { %v2786_v26 = vand.u32 2147483647, %v7272_v63  ;;  %v2655_v10 = vmul.f32 %v2654_v13, %v8152_v7  ;;  %v4254_v57 = vpop.eup %4253  ;;  %v2831_v53 = vmul.f32 %v2830_v34, %v8168_v14  ;;  %v2859_v59 = vsub.f32 1.0, %v2858_v56 }
 0x649   : > { %3585 = vmatpush.msra.mxu3 %v3485_v49  ;;  %v2692_v38 = vadd.f32 0.112945676, %v2691_v6  ;;  %v2568_v58 = vadd.f32 0.001143296, %v2567_v21  ;;  %vm2863_vm0 = vweird.f32 %v4252_v37  ;;  %v2738_v8 = vmul.f32 %v4254_v57, %v7261_v25 }
 0x64a   : > { %vm7296_vm1 = vcmp.eq.f32.partialorder %v2746_v9, 8.507059e+37  ;;  %v2749_v0 = vor.u32 1.1754944e-38, %v2748_v16  ;;  %v4016_v46 = vclamps-f32 %v2831_v53, 1.0  ;;  %v2860_v30 = vmul.f32 %v4252_v37, %v2859_v59  ;;  %vm2864_vm6 = vmor %vm2862_vm13, %vm2863_vm0 }
 0x64b   : > { %v2788_v40 = vand.u32 2147483648, %v7272_v63  ;;  %v7301_v7 = vadd.f32 1.0, %v2655_v10  ;;  %v2739_v36 = vsub.f32 1.0, %v2738_v8  ;;  %vm2743_vm2 = vweird.f32 %v4254_v57 }
 0x64c   : > { %v4256_v22 = vpop.eup %4255  ;;  %vm2782_vm4 = vweird.f32 %v7272_v63  ;;  %v2693_v27 = vmul.f32 %v2692_v38, %v8156_v23  ;;  %v3450_v28 = vadd.f32 1.0, %v4016_v46  ;;  %v2861_v18 = vadd.f32 %v4252_v37, %v2860_v30  ;;  %vm2744_vm8 = vmor %vm2742_vm15, %vm2743_vm2  ;;  %v8182_v46 = vld [vmem:[#allocation37_spill] sm:$0xff] }
 0x64d   : > { %v2778_v62 = vmul.f32 %v4256_v22, %v7272_v63  ;;  %vm7306_vm5 = vcmp.eq.f32.partialorder %v2786_v26, 8.507059e+37  ;;  %v2569_v1 = vmul.f32 %v2568_v58, %v8164_v19  ;;  %v2740_v60 = vmul.f32 %v4254_v57, %v2739_v36  ;;  %v8178_v63 = vld [vmem:[#allocation27_spill] sm:$0xff] }
 0x64e   : > { %4257 = vrcp.f32 %v7301_v7  ;;  %v2607_v33 = vmul.f32 3.8918573e-05, %v8173_v44  ;;  %v2487_v39 = vmul.f32 3.8918573e-05, %v8174_v12  ;;  %v3482_v35 = vmul.f32 %v3450_v28, %v8175_v5  ;;  %v8179_v26 = vld [vmem:[#allocation91_spill] sm:$0xff] }
 0x64f   : > { %v2865_v52 = vsel %vm2864_vm6, %v4252_v37, %v2861_v18  ;;  %v2779_v11 = vsub.f32 1.0, %v2778_v62  ;;  %v2789_v50 = vor.u32 1.1754944e-38, %v2788_v40  ;;  %v2741_v43 = vadd.f32 %v4254_v57, %v2740_v60  ;;  %v8177_v37 = vld [vmem:[#allocation90_spill] sm:$0xff]  ;;  %v8183_v62 = vld [vmem:[#allocation71_spill] sm:$0xff] }
 0x650   : > { %v2870_v42 = vsel %vm7285_vm14, %v2869_v45, %v2865_v52  ;;  %vm2783_vm7 = vweird.f32 %v4256_v22  ;;  %v2694_v51 = vadd.f32 0.4994258, %v2693_v27  ;;  %3545 = vmatpush.msra.mxu2 %v3482_v35  ;;  %v2666_v29 = vand.u32 2147483647, %v7301_v7  ;;  %v8184_v60 = vld [vmem:[#allocation75_spill] sm:$0xff] }
 0x651   : > { %v2871_v31 = vmul.f32 %v2870_v42, %v8176_v17  ;;  %v2780_v55 = vmul.f32 %v4256_v22, %v2779_v11  ;;  %v2570_v41 = vadd.f32 0.014752088, %v2569_v1  ;;  %v2745_v20 = vsel %vm2744_vm8, %v4254_v57, %v2741_v43  ;;  %vm2784_vm9 = vmor %vm2782_vm4, %vm2783_vm7  ;;  %v8186_v52 = vld [vmem:[#allocation31_spill] sm:$0xff] }
 0x652   : > { %v2695_v3 = vmul.f32 %v2694_v51, %v8156_v23  ;;  %v2608_v2 = vadd.f32 0.001143296, %v2607_v33  ;;  %v2488_v61 = vadd.f32 0.001143296, %v2487_v39  ;;  %v2750_v24 = vsel %vm7296_vm1, %v2749_v0, %v2745_v20  ;;  %v8185_v33 = vld [vmem:[#allocation62_spill] sm:$0xff] }
 0x653   : > { %v4017_v21 = vclamps-f32 %v2871_v31, 1.0  ;;  %v2781_v32 = vadd.f32 %v4256_v22, %v2780_v55  ;;  %v2668_v13 = vand.u32 2147483648, %v7301_v7  ;;  %v2751_v25 = vmul.f32 %v2750_v24, %v8177_v37  ;;  %v8188_v37 = vld [vmem:[#allocation67_spill] sm:$0xff] }
 0x654   : > { %v4258_v6 = vpop.eup %4257  ;;  %v7333_v9 = vadd.f32 1.0, %v2695_v3  ;;  %v2571_v23 = vmul.f32 %v2570_v41, %v8164_v19  ;;  %v2609_v16 = vmul.f32 %v2608_v2, %v8173_v44  ;;  %v2489_v56 = vmul.f32 %v2488_v61, %v8174_v12 }
 0x655   : > { %v3451_v15 = vadd.f32 1.0, %v4017_v21  ;;  %v2785_v49 = vsel %vm2784_vm9, %v4256_v22, %v2781_v32  ;;  %v2658_v54 = vmul.f32 %v4258_v6, %v7301_v7  ;;  %v4014_v47 = vclamps-f32 %v2751_v25, 1.0  ;;  %v8189_v25 = vld [vmem:[#allocation76_spill] sm:$0xff] }
 0x656   : > { %v2790_v45 = vsel %vm7306_vm5, %v2789_v50, %v2785_v49  ;;  %vm2662_vm10 = vweird.f32 %v7301_v7  ;;  %4259 = vrcp.f32 %v7333_v9  ;;  %vm7345_vm11 = vcmp.eq.f32.partialorder %v2666_v29, 8.507059e+37  ;;  %v8187_v50 = vld [vmem:[#allocation79_spill] sm:$0xff] }
 0x657   : > { %v3483_v34 = vmul.f32 %v3451_v15, %v8178_v63  ;;  %v2791_v10 = vmul.f32 %v2790_v45, %v8179_v26  ;;  %v2659_v57 = vsub.f32 1.0, %v2658_v54  ;;  %v3448_v53 = vadd.f32 1.0, %v4014_v47  ;;  %v8191_v26 = vld [vmem:[#allocation36_spill] sm:$0xff] }
 0x658   : > { %v2669_v59 = vor.u32 1.1754944e-38, %v2668_v13  ;;  %v2572_v38 = vadd.f32 0.112945676, %v2571_v23  ;;  %v2610_v58 = vadd.f32 0.014752088, %v2609_v16  ;;  %vm2663_vm12 = vweird.f32 %v4258_v6  ;;  %v8190_v16 = vld [vmem:[#allocation25_spill] sm:$0xff] }
 0x659   : > { %3586 = vmatpush.msra.mxu3 %v3483_v34  ;;  %v4015_v8 = vclamps-f32 %v2791_v10, 1.0  ;;  %v2660_v4 = vmul.f32 %v4258_v6, %v2659_v57  ;;  %v2490_v0 = vadd.f32 0.014752088, %v2489_v56  ;;  %v3480_v30 = vmul.f32 %v3448_v53, %v8182_v46  ;;  %vm2664_vm13 = vmor %vm2662_vm10, %vm2663_vm12  ;;  %v8192_v53 = vld [vmem:[#allocation53_spill] sm:$0xff] }
 0x65a   : > { %v2706_v40 = vand.u32 2147483647, %v7333_v9  ;;  %v2573_v22 = vmul.f32 %v2572_v38, %v8164_v19  ;;  %v2611_v36 = vmul.f32 %v2610_v58, %v8173_v44  ;;  %v2527_v48 = vmul.f32 3.8918573e-05, %v8183_v62 }
 0x65b   : > { %v3449_v27 = vadd.f32 1.0, %v4015_v8  ;;  %v2661_v28 = vadd.f32 %v4258_v6, %v2660_v4  ;;  %v2491_v18 = vmul.f32 %v2490_v0, %v8174_v12  ;;  %v2646_v39 = vmul.f32 %v8185_v33, %v8184_v60  ;;  %3546 = vmatpush.msra.mxu2 %v3480_v30 }
 0x65c   : > { %v4260_v1 = vpop.eup %4259  ;;  %v2574_v5 = vadd.f32 0.4994258, %v2573_v22  ;;  %v2612_v35 = vadd.f32 0.112945676, %v2611_v36  ;;  %v2407_v11 = vmul.f32 3.8918573e-05, %v8186_v52  ;;  %v2686_v23 = vmul.f32 %v8189_v25, %v8188_v37 }
 0x65d   : > { %v3481_v42 = vmul.f32 %v3449_v27, %v8187_v50  ;;  %v2665_v43 = vsel %vm2664_vm13, %v4258_v6, %v2661_v28  ;;  %v2698_v51 = vmul.f32 %v4260_v1, %v7333_v9  ;;  %v2708_v17 = vand.u32 2147483648, %v7333_v9  ;;  %v8194_v27 = vld [vmem:[#allocation72_spill] sm:$0xff] }
 0x65e   : > { %v2670_v31 = vsel %vm7345_vm11, %v2669_v59, %v2665_v43  ;;  %v2575_v55 = vmul.f32 %v2574_v5, %v8164_v19  ;;  %v2613_v29 = vmul.f32 %v2612_v35, %v8173_v44  ;;  %v2492_v7 = vadd.f32 0.112945676, %v2491_v18  ;;  %v8193_v59 = vld [vmem:[#allocation60_spill] sm:$0xff] }
 0x65f   : > { %3587 = vmatpush.msra.mxu3 %v3481_v42  ;;  %v2671_v41 = vmul.f32 %v2670_v31, %v2646_v39  ;;  %v2699_v20 = vsub.f32 1.0, %v2698_v51  ;;  %v2528_v3 = vadd.f32 0.001143296, %v2527_v48  ;;  %v2408_v2 = vadd.f32 0.001143296, %v2407_v11  ;;  %v8195_v28 = vld [vmem:[#allocation80_spill] sm:$0xff] }
 0x660   : > { %vm2703_vm14 = vweird.f32 %v4260_v1  ;;  %v7367_v61 = vadd.f32 1.0, %v2575_v55  ;;  %v2614_v21 = vadd.f32 0.4994258, %v2613_v29  ;;  %v2493_v24 = vmul.f32 %v2492_v7, %v8174_v12  ;;  %v8196_v48 = vld [vmem:[#allocation55_spill] sm:$0xff] }
 0x661   : > { %v4012_v32 = vclamps-f32 %v2671_v41, 1.0  ;;  %v2700_v13 = vmul.f32 %v4260_v1, %v2699_v20  ;;  %v2529_v6 = vmul.f32 %v2528_v3, %v8183_v62  ;;  %v2409_v19 = vmul.f32 %v2408_v2, %v8186_v52  ;;  %v8200_v29 = vld [vmem:[#allocation43_spill] sm:$0xff] }
 0x662   : > { %vm2702_vm15 = vweird.f32 %v7333_v9  ;;  %4261 = vrcp.f32 %v7367_v61  ;;  %v2447_v15 = vmul.f32 3.8918573e-05, %v8190_v16  ;;  %v2615_v56 = vmul.f32 %v2614_v21, %v8173_v44 }
 0x663   : > { %v3446_v49 = vadd.f32 1.0, %v4012_v32  ;;  %v2701_v54 = vadd.f32 %v4260_v1, %v2700_v13  ;;  %v2494_v47 = vadd.f32 0.4994258, %v2493_v24  ;;  %vm2704_vm0 = vmor %vm2702_vm15, %vm2703_vm14  ;;  %vm2707_vm1 = vcmp.eq.f32.partialorder %v2706_v40, 8.507059e+37 }
 0x664   : > { %v2709_v45 = vor.u32 1.1754944e-38, %v2708_v17  ;;  %v2530_v63 = vadd.f32 0.014752088, %v2529_v6  ;;  %v2410_v34 = vadd.f32 0.014752088, %v2409_v19  ;;  %v7380_v14 = vadd.f32 1.0, %v2615_v56 }
 0x665   : > { %v3478_v10 = vmul.f32 %v3446_v49, %v8191_v26  ;;  %v2705_v57 = vsel %vm2704_vm0, %v4260_v1, %v2701_v54  ;;  %v2495_v9 = vmul.f32 %v2494_v47, %v8174_v12  ;;  %v7385_v38 = vmul.f32 %v8193_v59, %v8192_v53  ;;  %v8197_v1 = vld [vmem:[#allocation40_spill] sm:$0xff]  ;;  %v8203_v49 = vld [vmem:[#allocation65_spill] sm:$0xff] }
 0x666   : > { %v2710_v58 = vsel %vm2707_vm1, %v2709_v45, %v2705_v57  ;;  %v2531_v44 = vmul.f32 %v2530_v63, %v8183_v62  ;;  %v2411_v8 = vmul.f32 %v2410_v34, %v8186_v52  ;;  %v2586_v0 = vand.u32 2147483647, %v7367_v61 }
 0x667   : > { %3547 = vmatpush.msra.mxu2 %v3478_v10  ;;  %v2711_v4 = vmul.f32 %v2710_v58, %v2686_v23  ;;  %4263 = vrcp.f32 %v7380_v14  ;;  %v2448_v46 = vadd.f32 0.001143296, %v2447_v15  ;;  %v2588_v40 = vand.u32 2147483648, %v7367_v61 }
 0x668   : > { %v4262_v30 = vpop.eup %4261  ;;  %v7392_v12 = vadd.f32 1.0, %v2495_v9  ;;  %v2532_v22 = vadd.f32 0.112945676, %v2531_v44  ;;  %v2412_v36 = vadd.f32 0.112945676, %v2411_v8  ;;  %v2566_v18 = vmul.f32 %v8195_v28, %v8194_v27  ;;  %v8206_v44 = vld [vmem:[#allocation30_spill] sm:$0xff] }
 0x669   : > { %v7398_v60 = vmul.f32 %v8197_v1, %v8196_v48  ;;  %v4013_v33 = vclamps-f32 %v2711_v4, 1.0  ;;  %v2578_v39 = vmul.f32 %v4262_v30, %v7367_v61  ;;  %vm2582_vm2 = vweird.f32 %v7367_v61 }
 0x66a   : > { %v2626_v5 = vand.u32 2147483647, %v7380_v14  ;;  %v2628_v35 = vand.u32 2147483648, %v7380_v14  ;;  %4265 = vrcp.f32 %v7392_v12  ;;  %vm7405_vm4 = vcmp.eq.f32.partialorder %v2586_v0, 8.507059e+37 }
 0x66b   : > { %v3447_v11 = vadd.f32 1.0, %v4013_v33  ;;  %v2579_v50 = vsub.f32 1.0, %v2578_v39  ;;  %v2533_v43 = vmul.f32 %v2532_v22, %v8183_v62  ;;  %v2589_v51 = vor.u32 1.1754944e-38, %v2588_v40  ;;  %v8207_v33 = vld [vmem:[#allocation51_spill] sm:$0xff] }
 0x66c   : > { %vm2622_vm5 = vweird.f32 %v7380_v14  ;;  %v2413_v17 = vmul.f32 %v2412_v36, %v8186_v52  ;;  %v2449_v31 = vmul.f32 %v2448_v46, %v8190_v16  ;;  %vm2583_vm6 = vweird.f32 %v4262_v30 }
 0x66d   : > { %v4264_v55 = vpop.eup %4263  ;;  %v3479_v7 = vmul.f32 %v3447_v11, %v8200_v29  ;;  %v2580_v41 = vmul.f32 %v4262_v30, %v2579_v50  ;;  %v2534_v20 = vadd.f32 0.4994258, %v2533_v43  ;;  %vm7415_vm7 = vcmp.eq.f32.partialorder %v2626_v5, 8.507059e+37  ;;  %vm2584_vm9 = vmor %vm2582_vm2, %vm2583_vm6  ;;  %v8208_v11 = vld [vmem:[#allocation64_spill] sm:$0xff] }
 0x66e   : > { %v2618_v3 = vmul.f32 %v4264_v55, %v7380_v14  ;;  %v2629_v21 = vor.u32 1.1754944e-38, %v2628_v35  ;;  %v2414_v24 = vadd.f32 0.4994258, %v2413_v17  ;;  %v2450_v32 = vadd.f32 0.014752088, %v2449_v31 }
 0x66f   : > { %3588 = vmatpush.msra.mxu3 %v3479_v7  ;;  %v2581_v13 = vadd.f32 %v4262_v30, %v2580_v41  ;;  %vm2502_vm8 = vweird.f32 %v7392_v12  ;;  %v2506_v6 = vand.u32 2147483647, %v7392_v12  ;;  %v2535_v19 = vmul.f32 %v2534_v20, %v8183_v62 }
 0x670   : > { %v4266_v37 = vpop.eup %4265  ;;  %v2619_v25 = vsub.f32 1.0, %v2618_v3  ;;  %v2415_v23 = vmul.f32 %v2414_v24, %v8186_v52  ;;  %v2451_v15 = vmul.f32 %v2450_v32, %v8190_v16  ;;  %v2327_v54 = vmul.f32 3.8918573e-05, %v8203_v49  ;;  %v8210_v32 = vld [vmem:[#allocation78_spill] sm:$0xff] }
 0x671   : > { %v2585_v56 = vsel %vm2584_vm9, %v4262_v30, %v2581_v13  ;;  %v2498_v47 = vmul.f32 %v4266_v37, %v7392_v12  ;;  %v2508_v45 = vand.u32 2147483648, %v7392_v12  ;;  %v7429_v63 = vadd.f32 1.0, %v2535_v19 }
 0x672   : > { %v2590_v62 = vsel %vm7405_vm4, %v2589_v51, %v2585_v56  ;;  %v2620_v34 = vmul.f32 %v4264_v55, %v2619_v25  ;;  %vm2623_vm10 = vweird.f32 %v4264_v55  ;;  %v7433_v61 = vadd.f32 1.0, %v2415_v23  ;;  %v8209_v51 = vld [vmem:[#allocation44_spill] sm:$0xff] }
 0x673   : > { %v2591_v26 = vmul.f32 %v2590_v62, %v2566_v18  ;;  %v2499_v52 = vsub.f32 1.0, %v2498_v47  ;;  %vm7435_vm11 = vcmp.eq.f32.partialorder %v2506_v6, 8.507059e+37  ;;  %4267 = vrcp.f32 %v7429_v63  ;;  %vm2624_vm12 = vmor %vm2622_vm5, %vm2623_vm10  ;;  %v8211_v62 = vld [vmem:[#allocation42_spill] sm:$0xff] }
 0x674   : > { %v2621_v57 = vadd.f32 %v4264_v55, %v2620_v34  ;;  %4269 = vrcp.f32 %v7433_v61  ;;  %v2452_v9 = vadd.f32 0.112945676, %v2451_v15  ;;  %v2328_v53 = vadd.f32 0.001143296, %v2327_v54 }
 0x675   : > { %v4010_v59 = vclamps-f32 %v2591_v26, 1.0  ;;  %v2500_v58 = vmul.f32 %v4266_v37, %v2499_v52  ;;  %vm2503_vm13 = vweird.f32 %v4266_v37  ;;  %v2367_v8 = vmul.f32 3.8918573e-05, %v8206_v44 }
 0x676   : > { %v2625_v4 = vsel %vm2624_vm12, %v4264_v55, %v2621_v57  ;;  %v2509_v0 = vor.u32 1.1754944e-38, %v2508_v45  ;;  %v2546_v46 = vand.u32 2147483647, %v7429_v63  ;;  %v2548_v30 = vand.u32 2147483648, %v7429_v63  ;;  %vm2504_vm14 = vmor %vm2502_vm8, %vm2503_vm13 }
 0x677   : > { %v3444_v40 = vadd.f32 1.0, %v4010_v59  ;;  %v2630_v22 = vsel %vm7415_vm7, %v2629_v21, %v2625_v4  ;;  %v2501_v36 = vadd.f32 %v4266_v37, %v2500_v58  ;;  %v2426_v27 = vand.u32 2147483647, %v7433_v61 }
 0x678   : > { %v2631_v14 = vmul.f32 %v2630_v22, %v7398_v60  ;;  %vm2542_vm15 = vweird.f32 %v7429_v63  ;;  %v2428_v28 = vand.u32 2147483648, %v7433_v61  ;;  %v2453_v18 = vmul.f32 %v2452_v9, %v8190_v16 }
 0x679   : > { %v2329_v48 = vmul.f32 %v2328_v53, %v8203_v49  ;;  %v4268_v1 = vpop.eup %4267  ;;  %v3476_v39 = vmul.f32 %v3444_v40, %v8207_v33  ;;  %v2505_v5 = vsel %vm2504_vm14, %v4266_v37, %v2501_v36  ;;  %vm2422_vm0 = vweird.f32 %v7433_v61 }
 0x67a   : > { %v2368_v35 = vadd.f32 0.001143296, %v2367_v8  ;;  %v2247_v60 = vmul.f32 3.8918573e-05, %v8208_v11  ;;  %v4270_v50 = vpop.eup %4269  ;;  %v4011_v12 = vclamps-f32 %v2631_v14, 1.0  ;;  %v2510_v42 = vsel %vm7435_vm11, %v2509_v0, %v2505_v5  ;;  %v8213_v0 = vld [vmem:[#allocation58_spill] sm:$0xff] }
 0x67b   : > { %v2538_v43 = vmul.f32 %v4268_v1, %v7429_v63  ;;  %vm2543_vm1 = vweird.f32 %v4268_v1  ;;  %3548 = vmatpush.msra.mxu2 %v3476_v39  ;;  %v2511_v17 = vmul.f32 %v2510_v42, %v8209_v51  ;;  %v2418_v31 = vmul.f32 %v4270_v50, %v7433_v61  ;;  %v8212_v63 = vld [vmem:[#allocation34_spill] sm:$0xff]  ;;  %v8214_v61 = vld [vmem:[#allocation61_spill] sm:$0xff] }
 0x67c   : > { %vm2423_vm2 = vweird.f32 %v4270_v50  ;;  %v2454_v55 = vadd.f32 0.4994258, %v2453_v18  ;;  %v3445_v29 = vadd.f32 1.0, %v4011_v12  ;;  %v2330_v41 = vadd.f32 0.014752088, %v2329_v48  ;;  %vm2544_vm5 = vmor %vm2542_vm15, %vm2543_vm1  ;;  %v8217_v39 = vld [vmem:[#allocation85_spill] sm:$0xff] }
 0x67d   : > { %v2539_v7 = vsub.f32 1.0, %v2538_v43  ;;  %v2369_v20 = vmul.f32 %v2368_v35, %v8206_v44  ;;  %v4008_v3 = vclamps-f32 %v2511_v17, 1.0  ;;  %v2419_v2 = vsub.f32 1.0, %v2418_v31  ;;  %vm2424_vm6 = vmor %vm2422_vm0, %vm2423_vm2 }
 0x67e   : > { %v2455_v21 = vmul.f32 %v2454_v55, %v8190_v16  ;;  %v2248_v24 = vadd.f32 0.001143296, %v2247_v60  ;;  %v3477_v13 = vmul.f32 %v3445_v29, %v8210_v32  ;;  %v2331_v19 = vmul.f32 %v2330_v41, %v8203_v49 }
 0x67f   : > { %v2540_v6 = vmul.f32 %v4268_v1, %v2539_v7  ;;  %v2370_v37 = vadd.f32 0.014752088, %v2369_v20  ;;  %v3442_v25 = vadd.f32 1.0, %v4008_v3  ;;  %v2420_v23 = vmul.f32 %v4270_v50, %v2419_v2  ;;  %v8218_v7 = vld [vmem:[#allocation23_spill] sm:$0xff] }
 0x680   : > { %v7468_v15 = vadd.f32 1.0, %v2455_v21  ;;  %v2249_v54 = vmul.f32 %v2248_v24, %v8208_v11  ;;  %3589 = vmatpush.msra.mxu3 %v3477_v13  ;;  %vm2547_vm4 = vcmp.eq.f32.partialorder %v2546_v46, 8.507059e+37  ;;  %v2332_v47 = vadd.f32 0.112945676, %v2331_v19  ;;  %v8219_v21 = vld [vmem:[#allocation48_spill] sm:$0xff] }
 0x681   : > { %v2541_v56 = vadd.f32 %v4268_v1, %v2540_v6  ;;  %v2371_v45 = vmul.f32 %v2370_v37, %v8206_v44  ;;  %v3474_v34 = vmul.f32 %v3442_v25, %v8211_v62  ;;  %v2549_v26 = vor.u32 1.1754944e-38, %v2548_v30 }
 0x682   : > { %v2421_v52 = vadd.f32 %v4270_v50, %v2420_v23  ;;  %4271 = vrcp.f32 %v7468_v15  ;;  %vm2427_vm7 = vcmp.eq.f32.partialorder %v2426_v27, 8.507059e+37  ;;  %v2429_v57 = vor.u32 1.1754944e-38, %v2428_v28  ;;  %v8215_v28 = vld [vmem:[#allocation77_spill] sm:$0xff] }
 0x683   : > { %v2545_v10 = vsel %vm2544_vm5, %v4268_v1, %v2541_v56  ;;  %v2333_v9 = vmul.f32 %v2332_v47, %v8203_v49  ;;  %3549 = vmatpush.msra.mxu2 %v3474_v34  ;;  %v2372_v58 = vadd.f32 0.112945676, %v2371_v45  ;;  %v2250_v8 = vadd.f32 0.014752088, %v2249_v54  ;;  %v8216_v1 = vld [vmem:[#allocation47_spill] sm:$0xff]  ;;  %v8220_v34 = vld [vmem:[#allocation28_spill] sm:$0xff] }
 0x684   : > { %v2550_v53 = vsel %vm2547_vm4, %v2549_v26, %v2545_v10  ;;  %v2425_v59 = vsel %vm2424_vm6, %v4270_v50, %v2421_v52  ;;  %v2324_v4 = vmul.f32 %v8212_v63, %v8203_v49  ;;  %v2364_v46 = vmul.f32 %v8213_v0, %v8206_v44  ;;  %v8221_v52 = vld [vmem:[#allocation84_spill] sm:$0xff] }
 0x685   : > { %v2551_v30 = vmul.f32 %v2550_v53, %v7385_v38  ;;  %v2430_v40 = vsel %vm2427_vm7, %v2429_v57, %v2425_v59  ;;  %v2334_v36 = vadd.f32 0.4994258, %v2333_v9  ;;  %v2373_v27 = vmul.f32 %v2372_v58, %v8206_v44  ;;  %v8222_v59 = vld [vmem:[#allocation83_spill] sm:$0xff] }
 0x686   : > { %v2431_v22 = vmul.f32 %v2430_v40, %v8214_v61  ;;  %v2251_v14 = vmul.f32 %v2250_v8, %v8208_v11  ;;  %v2444_v18 = vmul.f32 %v8215_v28, %v8190_v16  ;;  %v2287_v33 = vmul.f32 3.8918573e-05, %v8216_v1  ;;  %v8223_v58 = vld [vmem:[#allocation87_spill] sm:$0xff] }
 0x687   : > { %v4009_v48 = vclamps-f32 %v2551_v30, 1.0  ;;  %v2167_v5 = vmul.f32 3.8918573e-05, %v8217_v39  ;;  %v2335_v38 = vmul.f32 %v2334_v36, %v8203_v49  ;;  %v2374_v50 = vadd.f32 0.4994258, %v2373_v27 }
 0x688   : > { %v4272_v35 = vpop.eup %4271  ;;  %v4006_v60 = vclamps-f32 %v2431_v22, 1.0  ;;  %v2252_v12 = vadd.f32 0.112945676, %v2251_v14  ;;  %v2468_v51 = vand.u32 2147483648, %v7468_v15  ;;  %v2288_v17 = vadd.f32 0.001143296, %v2287_v33 }
 0x689   : > { %v3443_v42 = vadd.f32 1.0, %v4009_v48  ;;  %v2458_v43 = vmul.f32 %v4272_v35, %v7468_v15  ;;  %v7496_v55 = vadd.f32 1.0, %v2335_v38  ;;  %v2375_v16 = vmul.f32 %v2374_v50, %v8206_v44 }
 0x68a   : > { %v3440_v31 = vadd.f32 1.0, %v4006_v60  ;;  %v2253_v29 = vmul.f32 %v2252_v12, %v8208_v11  ;;  %v2289_v49 = vmul.f32 %v2288_v17, %v8216_v1  ;;  %v2168_v3 = vadd.f32 0.001143296, %v2167_v5 }
 0x68b   : > { %v3475_v41 = vmul.f32 %v3443_v42, %v8218_v7  ;;  %v2459_v20 = vsub.f32 1.0, %v2458_v43  ;;  %v2445_v2 = vadd.f32 1.1283791, %v2444_v18  ;;  %v2466_v32 = vand.u32 2147483647, %v7468_v15  ;;  %v8226_v43 = vld [vmem:[#allocation56_spill] sm:$0xff] }
 0x68c   : > { %v3472_v24 = vmul.f32 %v3440_v31, %v8219_v21  ;;  %4273 = vrcp.f32 %v7496_v55  ;;  %vm2463_vm8 = vweird.f32 %v4272_v35  ;;  %v7505_v6 = vadd.f32 1.0, %v2375_v16 }
 0x68d   : > { %3590 = vmatpush.msra.mxu3 %v3475_v41  ;;  %v2460_v13 = vmul.f32 %v4272_v35, %v2459_v20  ;;  %v2254_v44 = vadd.f32 0.4994258, %v2253_v29  ;;  %v2325_v19 = vadd.f32 1.1283791, %v2324_v4  ;;  %v2365_v37 = vadd.f32 1.1283791, %v2364_v46 }
 0x68e   : > { %3550 = vmatpush.msra.mxu2 %v3472_v24  ;;  %v2290_v25 = vadd.f32 0.014752088, %v2289_v49  ;;  %v2169_v23 = vmul.f32 %v2168_v3, %v8217_v39  ;;  %vm2462_vm9 = vweird.f32 %v7468_v15  ;;  %v2469_v56 = vor.u32 1.1754944e-38, %v2468_v51 }
 0x68f   : > { %v2461_v54 = vadd.f32 %v4272_v35, %v2460_v13  ;;  %4275 = vrcp.f32 %v7505_v6  ;;  %vm2464_vm10 = vmor %vm2462_vm9, %vm2463_vm8  ;;  %v2346_v47 = vand.u32 2147483647, %v7496_v55  ;;  %v2255_v45 = vmul.f32 %v2254_v44, %v8208_v11 }
 0x690   : > { %v2291_v62 = vmul.f32 %v2290_v25, %v8216_v1  ;;  %v2207_v26 = vmul.f32 3.8918573e-05, %v8220_v34  ;;  %v2446_v10 = vmul.f32 %v2445_v2, %v8221_v52  ;;  %vm2467_vm11 = vcmp.eq.f32.partialorder %v2466_v32, 8.507059e+37  ;;  %v8230_v52 = vld [vmem:[#allocation32_spill] sm:$0xff] }
 0x691   : > { %v2465_v57 = vsel %vm2464_vm10, %v4272_v35, %v2461_v54  ;;  %v2170_v9 = vadd.f32 0.014752088, %v2169_v23  ;;  %v2326_v15 = vmul.f32 %v2325_v19, %v8222_v59  ;;  %v2366_v8 = vmul.f32 %v2365_v37, %v8223_v58  ;;  %v8231_v58 = vld [vmem:[#allocation29_spill] sm:$0xff] }
 0x692   : > { %v4274_v53 = vpop.eup %4273  ;;  %v2470_v63 = vsel %vm2467_vm11, %v2469_v56, %v2465_v57  ;;  %v7517_v4 = vadd.f32 1.0, %v2255_v45  ;;  %vm2342_vm12 = vweird.f32 %v7496_v55  ;;  %v2292_v46 = vadd.f32 0.112945676, %v2291_v62 }
 0x693   : > { %v2471_v0 = vmul.f32 %v2470_v63, %v2446_v10  ;;  %v2338_v11 = vmul.f32 %v4274_v53, %v7496_v55  ;;  %vm7521_vm13 = vcmp.eq.f32.partialorder %v2346_v47, 8.507059e+37  ;;  %v2348_v40 = vand.u32 2147483648, %v7496_v55  ;;  %v8232_v63 = vld [vmem:[#allocation35_spill] sm:$0xff] }
 0x694   : > { %4277 = vrcp.f32 %v7517_v4  ;;  %v2208_v61 = vadd.f32 0.001143296, %v2207_v26  ;;  %v2293_v14 = vmul.f32 %v2292_v46, %v8216_v1  ;;  %v2171_v28 = vmul.f32 %v2170_v9, %v8217_v39  ;;  %v8229_v26 = vld [vmem:[#allocation49_spill] sm:$0xff] }
 0x695   : > { %v4276_v22 = vpop.eup %4275  ;;  %v4007_v36 = vclamps-f32 %v2471_v0, 1.0  ;;  %v2339_v27 = vsub.f32 1.0, %v2338_v11  ;;  %vm2343_vm14 = vweird.f32 %v4274_v53  ;;  %v2386_v48 = vand.u32 2147483647, %v7505_v6 }
 0x696   : > { %v2378_v18 = vmul.f32 %v4276_v22, %v7505_v6  ;;  %v2388_v33 = vand.u32 2147483648, %v7505_v6  ;;  %v2294_v60 = vadd.f32 0.4994258, %v2293_v14  ;;  %v2172_v38 = vadd.f32 0.112945676, %v2171_v28  ;;  %vm2344_vm0 = vmor %vm2342_vm12, %vm2343_vm14 }
 0x697   : > { %v3441_v5 = vadd.f32 1.0, %v4007_v36  ;;  %v2340_v35 = vmul.f32 %v4274_v53, %v2339_v27  ;;  %v2349_v50 = vor.u32 1.1754944e-38, %v2348_v40  ;;  %vm2382_vm15 = vweird.f32 %v7505_v6  ;;  %v8233_v40 = vld [vmem:[#allocation33_spill] sm:$0xff] }
 0x698   : > { %v2379_v12 = vsub.f32 1.0, %v2378_v18  ;;  %v2209_v42 = vmul.f32 %v2208_v61, %v8220_v34  ;;  %v2295_v31 = vmul.f32 %v2294_v60, %v8216_v1  ;;  %v2173_v16 = vmul.f32 %v2172_v38, %v8217_v39 }
 0x699   : > { %v3473_v51 = vmul.f32 %v3441_v5, %v8226_v43  ;;  %v2341_v17 = vadd.f32 %v4274_v53, %v2340_v35  ;;  %vm2383_vm1 = vweird.f32 %v4276_v22  ;;  %vm7540_vm2 = vcmp.eq.f32.partialorder %v2386_v48, 8.507059e+37  ;;  %v8234_v48 = vld [vmem:[#allocation41_spill] sm:$0xff]  ;;  %v8235_v5 = vld [vmem:[#allocation68_spill] sm:$0xff] }
 0x69a   : > { %v4278_v29 = vpop.eup %4277  ;;  %v2380_v7 = vmul.f32 %v4276_v22, %v2379_v12  ;;  %v2210_v20 = vadd.f32 0.014752088, %v2209_v42  ;;  %v2389_v3 = vor.u32 1.1754944e-38, %v2388_v33  ;;  %v7545_v21 = vadd.f32 1.0, %v2295_v31  ;;  %vm2384_vm4 = vmor %vm2382_vm15, %vm2383_vm1  ;;  %v8236_v31 = vld [vmem:[#allocation86_spill] sm:$0xff] }
 0x69b   : > { %3591 = vmatpush.msra.mxu3 %v3473_v51  ;;  %v2345_v49 = vsel %vm2344_vm0, %v4274_v53, %v2341_v17  ;;  %v2258_v2 = vmul.f32 %v4278_v29, %v7517_v4  ;;  %v2174_v55 = vadd.f32 0.4994258, %v2173_v16  ;;  %v2266_v37 = vand.u32 2147483647, %v7517_v4 }
 0x69c   : > { %v2350_v24 = vsel %vm7521_vm13, %v2349_v50, %v2345_v49  ;;  %v2381_v32 = vadd.f32 %v4276_v22, %v2380_v7  ;;  %v2211_v13 = vmul.f32 %v2210_v20, %v8220_v34  ;;  %4279 = vrcp.f32 %v7545_v21 }
 0x69d   : > { %v2351_v44 = vmul.f32 %v2350_v24, %v2326_v15  ;;  %v2259_v19 = vsub.f32 1.0, %v2258_v2  ;;  %vm2263_vm5 = vweird.f32 %v4278_v29  ;;  %v2268_v23 = vand.u32 2147483648, %v7517_v4  ;;  %v8237_v24 = vld [vmem:[#allocation69_spill] sm:$0xff] }
 0x69e   : > { %v2385_v25 = vsel %vm2384_vm4, %v4276_v22, %v2381_v32  ;;  %v2175_v54 = vmul.f32 %v2174_v55, %v8217_v39  ;;  %v2212_v62 = vadd.f32 0.112945676, %v2211_v13  ;;  %v2163_v6 = vadd.f32 0.18741608, %v8229_v26 }
 0x69f   : > { %v4004_v56 = vclamps-f32 %v2351_v44, 1.0  ;;  %v2390_v47 = vsel %vm7540_vm2, %v2389_v3, %v2385_v25  ;;  %v2260_v45 = vmul.f32 %v4278_v29, %v2259_v19  ;;  %v2283_v10 = vadd.f32 0.18741608, %v8230_v52  ;;  %v8239_v52 = vld [vmem:[#allocation66_spill] sm:$0xff] }
 0x6a0   : > { %v2391_v57 = vmul.f32 %v2390_v47, %v2366_v8  ;;  %v7560_v9 = vadd.f32 1.0, %v2175_v54  ;;  %vm2262_vm6 = vweird.f32 %v7517_v4  ;;  %v2213_v15 = vmul.f32 %v2212_v62, %v8220_v34  ;;  %v8238_v62 = vld [vmem:[#allocation45_spill] sm:$0xff] }
 0x6a1   : > { %v3438_v53 = vadd.f32 1.0, %v4004_v56  ;;  %v2261_v59 = vadd.f32 %v4278_v29, %v2260_v45  ;;  %v2246_v0 = vmul.f32 %v8232_v63, %v8231_v58  ;;  %vm2264_vm7 = vmor %vm2262_vm6, %vm2263_vm5  ;;  %v2269_v46 = vor.u32 1.1754944e-38, %v2268_v23 }
 0x6a2   : > { %v4005_v11 = vclamps-f32 %v2391_v57, 1.0  ;;  %4281 = vrcp.f32 %v7560_v9  ;;  %v4280_v30 = vpop.eup %4279  ;;  %vm2267_vm8 = vcmp.eq.f32.partialorder %v2266_v37, 8.507059e+37  ;;  %v2214_v22 = vadd.f32 0.4994258, %v2213_v15 }
 0x6a3   : > { %v3470_v8 = vmul.f32 %v3438_v53, %v8233_v40  ;;  %v2265_v61 = vsel %vm2264_vm7, %v4278_v29, %v2261_v59  ;;  %v2284_v36 = vmul.f32 %v2283_v10, %v8216_v1  ;;  %v2298_v14 = vmul.f32 %v4280_v30, %v7545_v21 }
 0x6a4   : > { %v3439_v4 = vadd.f32 1.0, %v4005_v11  ;;  %v2270_v27 = vsel %vm2267_vm8, %v2269_v46, %v2265_v61  ;;  %v2215_v18 = vmul.f32 %v2214_v22, %v8220_v34  ;;  %v2202_v33 = vmul.f32 %v8234_v48, %v8220_v34  ;;  %v8241_v22 = vld [vmem:[#allocation50_spill] sm:$0xff] }
 0x6a5   : > { %3551 = vmatpush.msra.mxu2 %v3470_v8  ;;  %v2271_v28 = vmul.f32 %v2270_v27, %v2246_v0  ;;  %v2299_v60 = vsub.f32 1.0, %v2298_v14  ;;  %v2164_v38 = vmul.f32 %v2163_v6, %v8217_v39  ;;  %v2308_v12 = vand.u32 2147483648, %v7545_v21 }
 0x6a6   : > { %v3471_v35 = vmul.f32 %v3439_v4, %v8235_v5  ;;  %v2216_v1 = vadd.f32 1.0, %v2215_v18  ;;  %v2285_v43 = vadd.f32 1.1283791, %v2284_v36  ;;  %vm2303_vm9 = vweird.f32 %v4280_v30 }
 0x6a7   : > { %v4002_v50 = vclamps-f32 %v2271_v28, 1.0  ;;  %v2300_v51 = vmul.f32 %v4280_v30, %v2299_v60  ;;  %v2306_v17 = vand.u32 2147483647, %v7545_v21  ;;  %v2092_v16 = vmul.f32 0.5, %v8236_v31  ;;  %v3498_v28 = vld [vmem:[%s8242_s17] sm:$0xff] }
 0x6a8   : > { %v4282_v42 = vpop.eup %4281  ;;  %3592 = vmatpush.msra.mxu3 %v3471_v35  ;;  %4283 = vrcp.f32 %v2216_v1  ;;  %v2203_v41 = vadd.f32 0.18741608, %v2202_v33  ;;  %vm2302_vm10 = vweird.f32 %v7545_v21  ;;  %v2165_v39 = vadd.f32 1.1283791, %v2164_v38  ;;  %v8243_v33 = vld [vmem:[#allocation46_spill] sm:$0xff]  ;;  %v3499_v38 = vld [vmem:[%s8242_s17 + $0x8] sm:$0xff] }
 0x6a9   : > { %v3436_v29 = vadd.f32 1.0, %v4002_v50  ;;  %v2178_v7 = vmul.f32 %v4282_v42, %v7560_v9  ;;  %v2301_v20 = vadd.f32 %v4280_v30, %v2300_v51  ;;  %vm2304_vm11 = vmor %vm2302_vm10, %vm2303_vm9  ;;  %v2309_v3 = vor.u32 1.1754944e-38, %v2308_v12  ;;  %v3500_v50 = vld [vmem:[%s8242_s17 + $0x10] sm:$0xff]  ;;  %v3501_v12 = vld [vmem:[%s8242_s17 + $0x18] sm:$0xff] }
 0x6aa   : > { %v2286_v32 = vmul.f32 %v2285_v43, %v8237_v24  ;;  %vm2307_vm12 = vcmp.eq.f32.partialorder %v2306_v17, 8.507059e+37  ;;  %v2188_v13 = vand.u32 2147483648, %v7560_v9  ;;  %vm2183_vm13 = vweird.f32 %v4282_v42  ;;  %v7606_v43 = vpop.permute.xlu1 %3515  ;;  %v3503_v51 = vld [vmem:[%s8242_s17 + $0x28] sm:$0xff]  ;;  %v3504_v17 = vld [vmem:[%s8242_s17 + $0x30] sm:$0xff] }
 0x6ab   : > { %v3468_v49 = vmul.f32 %v3436_v29, %v2092_v16  ;;  %v2179_v2 = vsub.f32 1.0, %v2178_v7  ;;  %v2305_v55 = vsel %vm2304_vm11, %v4280_v30, %v2301_v20  ;;  %v2186_v37 = vand.u32 2147483647, %v7560_v9  ;;  %v8240_v30 = vld [vmem:[#allocation24_spill] sm:$0xff]  ;;  %v3512_v29 = vpop.permute.xlu0 %3511  ;;  %v3505_v7 = vld [vmem:[%s8242_s17 + $0x38] sm:$0xff] }
 0x6ac   : > { %v2310_v44 = vsel %vm2307_vm12, %v2309_v3, %v2305_v55  ;;  %v2204_v21 = vmul.f32 %v2203_v41, %v8220_v34  ;;  %vm2182_vm14 = vweird.f32 %v7560_v9  ;;  %v2189_v47 = vor.u32 1.1754944e-38, %v2188_v13 }
 0x6ad   : > { %3552 = vmatpush.msra.mxu2 %v3468_v49  ;;  %v2180_v19 = vmul.f32 %v4282_v42, %v2179_v2  ;;  %v2311_v25 = vmul.f32 %v2310_v44, %v2286_v32  ;;  %vm2184_vm15 = vmor %vm2182_vm14, %vm2183_vm13  ;;  %v2166_v26 = vmul.f32 %v2165_v39, %v8238_v62  ;;  %vm2187_vm0 = vcmp.eq.f32.partialorder %v2186_v37, 8.507059e+37 }
 0x6ae   : > { %v4284_v23 = vpop.eup %4283  ;;  %v2093_v10 = vmul.f32 0.5, %v8239_v52  ;;  %v2205_v15 = vadd.f32 1.1283791, %v2204_v21  ;;  %v2228_v63 = vand.u32 2147483648, %v2216_v1  ;;  %v2226_v9 = vand.u32 2147483647, %v2216_v1 }
 0x6af   : > { %v2181_v54 = vadd.f32 %v4282_v42, %v2180_v19  ;;  %v4003_v56 = vclamps-f32 %v2311_v25, 1.0  ;;  %v2218_v45 = vmul.f32 %v4284_v23, %v2216_v1  ;;  %vm2223_vm1 = vweird.f32 %v4284_v23 }
 0x6b0   : > { %vm2222_vm2 = vweird.f32 %v2216_v1  ;;  %v2090_v40 = vmul.f32 0.5, %v8240_v30  ;;  %v2229_v61 = vor.u32 1.1754944e-38, %v2228_v63  ;;  %v2206_v36 = vmul.f32 %v2205_v15, %v8241_v22  ;;  %v3502_v1 = vld [vmem:[%s8242_s17 + $0x20] sm:$0xff] }
 0x6b1   : > { %v2185_v6 = vsel %vm2184_vm15, %v4282_v42, %v2181_v54  ;;  %v3437_v57 = vadd.f32 1.0, %v4003_v56  ;;  %v2219_v59 = vsub.f32 1.0, %v2218_v45  ;;  %vm2224_vm4 = vmor %vm2222_vm2, %vm2223_vm1  ;;  %vm2227_vm5 = vcmp.eq.f32.partialorder %v2226_v9, 8.507059e+37  ;;  %v3508_v42 = vpop.permute.xlu2 %3507 }
 0x6b2   : > { %v2190_v53 = vsel %vm2187_vm0, %v2189_v47, %v2185_v6  ;;  %v2091_v5 = vmul.f32 0.5, %v8243_v33  ;;  %v7616_v16 = vpop.permute.xlu1 %3523 }
 0x6b3   : > { %v2191_v58 = vmul.f32 %v2190_v53, %v2166_v26  ;;  %v3469_v34 = vmul.f32 %v3437_v57, %v2093_v10  ;;  %v2220_v0 = vmul.f32 %v4284_v23, %v2219_v59  ;;  %v7625_v39 = vpop.permute.xlu0 %3531 }
 0x6b5   : > { %v4000_v11 = vclamps-f32 %v2191_v58, 1.0  ;;  %3593 = vmatpush.msra.mxu3 %v3469_v34  ;;  %v2221_v46 = vadd.f32 %v4284_v23, %v2220_v0 }
 0x6b7   : > { %v3434_v8 = vadd.f32 1.0, %v4000_v11  ;;  %v2225_v4 = vsel %vm2224_vm4, %v4284_v23, %v2221_v46 }
 0x6b8   : > { %v2230_v14 = vsel %vm2227_vm5, %v2229_v61, %v2225_v4 }
 0x6b9   : > { %v3466_v27 = vmul.f32 %v3434_v8, %v2090_v40  ;;  %v2231_v18 = vmul.f32 %v2230_v14, %v2206_v36  ;;  %v7614_v31 = vpop.permute.xlu2 %3519 }
 0x6ba   : > { %v7623_v20 = vpop.permute.xlu1 %3535 }
 0x6bb   : > { %3553 = vmatpush.msra.mxu2 %v3466_v27  ;;  %v4001_v48 = vclamps-f32 %v2231_v18, 1.0  ;;  %v3626_v2 = vpop.permute.xlu0 %3625 }
 0x6bc   : > { %3554 = vmatmul.f32.vlgmr.msra.gmra.mxu2 %v3498_v28 }
 0x6bd   : > { %v3435_v35 = vadd.f32 1.0, %v4001_v48 }
 0x6bf   : > { %v3467_v60 = vmul.f32 %v3435_v35, %v2091_v5 }
 0x6c1   : > { %3594 = vmatpush.msra.mxu3 %v3467_v60  ;;  %v7621_v41 = vpop.permute.xlu2 %3527 }
 0x6c2   : > { %3595 = vmatmul.f32.vlgmr.msra.gmra.mxu3 %v3498_v28  ;;  %v3630_v3 = vpop.permute.xlu1 %3629 }
 0x6c3   : > { %v7631_v55 = vpop.permute.xlu0 %3645 }
 0x6c4   : > { %3557 = vmatmul.f32.gmra.mxu2 %v3499_v38 }
 0x6c9   : > { %v3622_v49 = vpop.permute.xlu2 %3621 }
 0x6ca   : > { %3598 = vmatmul.f32.gmra.mxu3 %v3499_v38  ;;  %v7629_v32 = vpop.permute.xlu1 %3637 }
 0x6cb   : > { %v3687_v19 = vpop.permute.xlu0 %3686 }
 0x6cc   : > { %3560 = vmatmul.f32.gmra.mxu2 %v3500_v50 }
 0x6d1   : > { %v7627_v24 = vpop.permute.xlu2 %3633 }
 0x6d2   : > { %3601 = vmatmul.f32.gmra.mxu3 %v3500_v50  ;;  %v7635_v44 = vpop.permute.xlu1 %3649 }
 0x6d3   : > { %v3693_v23 = vpop.permute.xlu0 %3692 }
 0x6d4   : > { %3563 = vmatmul.f32.gmra.mxu2 %v3501_v12 }
 0x6d9   : > { %v7633_v13 = vpop.permute.xlu2 %3641 }
 0x6da   : > { %3604 = vmatmul.f32.gmra.mxu3 %v3501_v12  ;;  %v3689_v25 = vpop.permute.xlu1 %3688 }
 0x6db   : > { %v7637_v56 = vpop.permute.xlu0 %3698 }
 0x6dc   : > { %3566 = vmatmul.f32.gmra.mxu2 %v3502_v1 }
 0x6e1   : > { %v3685_v37 = vpop.permute.xlu2 %3684 }
 0x6e2   : > { %3607 = vmatmul.f32.gmra.mxu3 %v3502_v1  ;;  %v3695_v54 = vpop.permute.xlu1 %3694  ;;  %v3716_v53 = vsel %vm943_vm3, %v3685_v37, %v3687_v19 }
 0x6e3   : > { %v7641_v62 = vpop.permute.xlu0 %3704  ;;  %v3718_v60 = vsel %vm943_vm3, %v3693_v23, %v3695_v54 }
 0x6e4   : > { %3569 = vmatmul.f32.gmra.mxu2 %v3503_v51 }
 0x6e9   : > { %v3691_v21 = vpop.permute.xlu2 %3690 }
 0x6ea   : > { %3610 = vmatmul.f32.gmra.mxu3 %v3503_v51  ;;  %v7639_v45 = vpop.permute.xlu1 %3700  ;;  %v3717_v61 = vsel %vm943_vm3, %v3689_v25, %v3691_v21 }
 0x6eb   : > { %v7647_v52 = vpop.permute.xlu0 %3710 }
 0x6ec   : > { %3572 = vmatmul.f32.gmra.mxu2 %v3504_v17 }
 0x6f1   : > { %v3697_v47 = vpop.permute.xlu2 %3696 }
 0x6f2   : > { %3613 = vmatmul.f32.gmra.mxu3 %v3504_v17  ;;  %v7645_v6 = vpop.permute.xlu1 %3706 }
 0x6f3   : > { %v3749_v34 = vpop.permute.xlu0 %3748 }
 0x6f4   : > { %3575 = vmatmul.f32.gmra.mxu2 %v3505_v7  ;;  %v3772_v46 = vsel %vm943_vm3, %v3687_v19, %v3749_v34 }
 0x6f9   : > { %v7643_v26 = vpop.permute.xlu2 %3702 }
 0x6fa   : > { %3616 = vmatmul.f32.gmra.mxu3 %v3505_v7  ;;  %v7652_v58 = vpop.permute.xlu1 %3712 }
 0x6fb   : > { %v3755_v23 = vpop.permute.xlu0 %3754 }
 0x701   : > { %v7650_v15 = vpop.permute.xlu2 %3708 }
 0x702   : > { %v3751_v27 = vpop.permute.xlu1 %3750 }
 0x703   : > { %v3773_v48 = vsel %vm943_vm3, %v3691_v21, %v3751_v27 }
 0x709   : > { %v7661_v4 = vpop.permute.xlu2 %3714 }
 0x711   : > { %v3753_v1 = vpop.permute.xlu2 %3752 }
 0x712   : > { %v3774_v7 = vsel %vm943_vm3, %v3695_v54, %v3753_v1 }
 0x73f   : > { %v3555_v10 = vpop.f32.mrf.mxu2 }
 0x740   : > { %v3556_v57 = vadd.f32 %v3555_v10, %v3508_v42  ;;  %v3775_v10 = vsel %vm943_vm3, %v7637_v56, %v3755_v23 }
 0x742   : > { %v3652_v59 = vmul.f32 %v3622_v49, %v3556_v57  ;;  %v3720_v57 = vsel %vm943_vm3, %v7639_v45, %v7643_v26 }
 0x744   : > { %v3780_v63 = vadd.f32 %v3716_v53, %v3652_v59 }
 0x745   : > { %v3596_v0 = vpop.f32.mrf.mxu3 }
 0x746   : > { %3796 = vst [vmem:[%s7656_s15] sm:$0xff] %v3780_v63  ;;  %v3597_v9 = vadd.f32 %v3596_v0, %v3508_v42  ;;  %v3757_v63 = vpop.permute.xlu1 %3756 }
 0x747   : > { %v3558_v11 = vpop.f32.mrf.mxu2 }
 0x748   : > { %v3559_v30 = vadd.f32 %v3558_v11, %v3512_v29  ;;  %v3653_v40 = vmul.f32 %v3622_v49, %v3597_v9  ;;  %v3776_v9 = vsel %vm943_vm3, %v7643_v26, %v3757_v63  ;;  %v3721_v11 = vsel %vm943_vm3, %v7641_v62, %v7645_v6 }
 0x74a   : > { %v3654_v8 = vmul.f32 %v3626_v2, %v3559_v30  ;;  %v3781_v22 = vadd.f32 %v3772_v46, %v3653_v40  ;;  %v3759_v40 = vpop.permute.xlu2 %3758 }
 0x74b   : > { %v3777_v62 = vsel %vm943_vm3, %v7645_v6, %v3759_v40 }
 0x74c   : > { %v3782_v36 = vadd.f32 %v3717_v61, %v3654_v8  ;;  %3797 = vst [vmem:[%s7656_s15 + $0x8] sm:$0xff] %v3781_v22 }
 0x74d   : > { %v3599_v14 = vpop.f32.mrf.mxu3 }
 0x74e   : > { %3798 = vst [vmem:[%s7656_s15 + $0x10] sm:$0xff] %v3782_v36  ;;  %v3600_v28 = vadd.f32 %v3599_v14, %v3512_v29  ;;  %v3722_v36 = vsel %vm943_vm3, %v7650_v15, %v7647_v52 }
 0x74f   : > { %v3561_v18 = vpop.f32.mrf.mxu2 }
 0x750   : > { %v3562_v33 = vadd.f32 %v3561_v18, %v7606_v43  ;;  %v3655_v5 = vmul.f32 %v3626_v2, %v3600_v28  ;;  %v3719_v2 = vsel %vm943_vm3, %v3697_v47, %v7637_v56  ;;  %v3761_v28 = vpop.permute.xlu0 %3760 }
 0x751   : > { %v3778_v15 = vsel %vm943_vm3, %v7647_v52, %v3761_v28  ;;  %v3763_v52 = vpop.permute.xlu1 %3762 }
 0x752   : > { %v3656_v35 = vmul.f32 %v3630_v3, %v3562_v33  ;;  %v3783_v38 = vadd.f32 %v3773_v48, %v3655_v5  ;;  %v3723_v5 = vsel %vm943_vm3, %v7652_v58, %v7661_v4  ;;  %v3779_v58 = vsel %vm943_vm3, %v7661_v4, %v3763_v52 }
 0x754   : > { %v3784_v50 = vadd.f32 %v3718_v60, %v3656_v35  ;;  %3799 = vst [vmem:[%s7656_s15 + $0x18] sm:$0xff] %v3783_v38 }
 0x755   : > { %v3602_v12 = vpop.f32.mrf.mxu3 }
 0x756   : > { %3800 = vst [vmem:[%s7656_s15 + $0x20] sm:$0xff] %v3784_v50  ;;  %v3603_v42 = vadd.f32 %v3602_v12, %v7606_v43 }
 0x757   : > { %v3564_v51 = vpop.f32.mrf.mxu2 }
 0x758   : > { %v3565_v17 = vadd.f32 %v3564_v51, %v7614_v31  ;;  %v3657_v29 = vmul.f32 %v3630_v3, %v3603_v42 }
 0x75a   : > { %v3658_v49 = vmul.f32 %v7627_v24, %v3565_v17  ;;  %v3785_v19 = vadd.f32 %v3774_v7, %v3657_v29 }
 0x75c   : > { %v3786_v37 = vadd.f32 %v3719_v2, %v3658_v49  ;;  %3801 = vst [vmem:[%s7656_s15 + $0x28] sm:$0xff] %v3785_v19 }
 0x75d   : > { %v3605_v25 = vpop.f32.mrf.mxu3 }
 0x75e   : > { %3802 = vst [vmem:[%s7656_s15 + $0x30] sm:$0xff] %v3786_v37  ;;  %v3606_v43 = vadd.f32 %v3605_v25, %v7614_v31 }
 0x75f   : > { %v3567_v21 = vpop.f32.mrf.mxu2 }
 0x760   : > { %v3568_v3 = vadd.f32 %v3567_v21, %v7616_v16  ;;  %v3659_v54 = vmul.f32 %v7627_v24, %v3606_v43 }
 0x762   : > { %v3660_v47 = vmul.f32 %v7629_v32, %v3568_v3  ;;  %v3787_v53 = vadd.f32 %v3775_v10, %v3659_v54 }
 0x764   : > { %v3788_v59 = vadd.f32 %v3720_v57, %v3660_v47  ;;  %3803 = vst [vmem:[%s7656_s15 + $0x38] sm:$0xff] %v3787_v53 }
 0x765   : > { %v3608_v31 = vpop.f32.mrf.mxu3 }
 0x766   : > { %3804 = vst [vmem:[%s7656_s15 + $0x40] sm:$0xff] %v3788_v59  ;;  %v3609_v34 = vadd.f32 %v3608_v31, %v7616_v16 }
 0x767   : > { %v3570_v24 = vpop.f32.mrf.mxu2 }
 0x768   : > { %v3571_v0 = vadd.f32 %v3570_v24, %v7621_v41  ;;  %v3661_v56 = vmul.f32 %v7629_v32, %v3609_v34 }
 0x76a   : > { %v3662_v45 = vmul.f32 %v7633_v13, %v3571_v0  ;;  %v3789_v46 = vadd.f32 %v3776_v9, %v3661_v56 }
 0x76c   : > { %v3790_v30 = vadd.f32 %v3721_v11, %v3662_v45  ;;  %3805 = vst [vmem:[%s7656_s15 + $0x48] sm:$0xff] %v3789_v46 }
 0x76d   : > { %v3611_v16 = vpop.f32.mrf.mxu3 }
 0x76e   : > { %3806 = vst [vmem:[%s7656_s15 + $0x50] sm:$0xff] %v3790_v30  ;;  %v3612_v32 = vadd.f32 %v3611_v16, %v7621_v41 }
 0x76f   : > { %v3573_v8 = vpop.f32.mrf.mxu2 }
 0x770   : > { %v3574_v26 = vadd.f32 %v3573_v8, %v7625_v39  ;;  %v3663_v61 = vmul.f32 %v7633_v13, %v3612_v32 }
 0x772   : > { %v3664_v22 = vmul.f32 %v7631_v55, %v3574_v26  ;;  %v3791_v27 = vadd.f32 %v3777_v62, %v3663_v61 }
 0x774   : > { %v3792_v14 = vadd.f32 %v3722_v36, %v3664_v22  ;;  %3807 = vst [vmem:[%s7656_s15 + $0x58] sm:$0xff] %v3791_v27 }
 0x775   : > { %v3614_v41 = vpop.f32.mrf.mxu3 }
 0x776   : > { %3808 = vst [vmem:[%s7656_s15 + $0x60] sm:$0xff] %v3792_v14  ;;  %v3615_v13 = vadd.f32 %v3614_v41, %v7625_v39 }
 0x777   : > { %v3576_v6 = vpop.f32.mrf.mxu2 }
 0x778   : > { %v3577_v18 = vadd.f32 %v3576_v6, %v7623_v20  ;;  %v3665_v48 = vmul.f32 %v7631_v55, %v3615_v13 }
 0x77a   : > { %v3666_v33 = vmul.f32 %v7635_v44, %v3577_v18  ;;  %v3793_v35 = vadd.f32 %v3778_v15, %v3665_v48 }
 0x77c   : > { %v3794_v39 = vadd.f32 %v3723_v5, %v3666_v33  ;;  %3809 = vst [vmem:[%s7656_s15 + $0x68] sm:$0xff] %v3793_v35 }
 0x77d   : > { %v3617_v55 = vpop.f32.mrf.mxu3 }
 0x77e   : > { %3810 = vst [vmem:[%s7656_s15 + $0x70] sm:$0xff] %v3794_v39  ;;  %v3618_v60 = vadd.f32 %v3617_v55, %v7623_v20 }
 0x780   : > { %v3667_v38 = vmul.f32 %v7635_v44, %v3618_v60 }
 0x782   : > { %v3795_v50 = vadd.f32 %v3779_v58, %v3667_v38 }
 0x784   : > { %3811 = vst [vmem:[%s7656_s15 + $0x78] sm:$0xff] %v3795_v50 }
 0x785   : > { %4433 = shalt.err (!%p4430_p6)
}
 0x786   : > { %s4561_s16 = smov 256   ;;  %s4562_s15 = smov 512  }
 0x787   : > { %s4563_s24 = smov 16  }
 0x788   : > { %4048 = dma.vmem_to_hbm [thread:$0]  (%p4730_p4), %s3828_s28, 2048, %s3830_s9, %s3813_s12, %s4561_s16, %s4562_s15, %s4563_s24  }
 0x789 PF: > { %s8248_s11 = sld [smem:[#allocation11_spill]]  ;;  %p4054_p10 = scmp.ge.s32.totalorder %s4534_s7, 2 }
 0x78b   : > { %p4051_p11 = pnand %p4054_p10, %p4739_p9 }
 0x78d   : > { %p4052_p12 = pneg %p4051_p11 }
 0x78f   : > { %s3844_s10 = sand.u32 1, %s8248_s11  }
 0x790   : > { %s3845_s29 = scalar_lea.sflag [#allocation4], %s3844_s10 }
 0x791   : > { %4487 = dma.done.wait (%p4052_p12), %s3845_s29, 2048  }
 0x792   : > { %4489 = vsyncadd (%p4052_p12), %s3845_s29, 4294965248  ;;  %s25_s7 = sadd.s32 1, %s4534_s7   ;;  %s8250_s5 = sld [smem:[#allocation19_spill]] }
 0x793   : > { %p22_p8 = scmp.ge.s32.totalorder %s25_s7, 6   ;;  %s8251_s14 = sld [smem:[#allocation12_spill]] }
 0x794   : > { %s8252_s26 = sld [smem:[#allocation18_spill]]  ;;  %s8256_s21 = smov %s4498_s22 }
 0x795   : > { %s8253_s27 = sld [smem:[#allocation15_spill]]  ;;  %s8257_s22 = smov %s4502_s23 }
 0x796   : > { %s8254_s29 = sld [smem:[#allocation16_spill]]  ;;  %s8259_s24 = smov %s4510_s25 }
 0x797   : > { %s8255_s9 = sld [smem:[#allocation17_spill]]  ;;  %s8261_s28 = smov %s4530_s30 }
 0x798   : > { %s8258_s23 = smov %s8250_s5 }
 0x799   : > { %s8260_s25 = smov %s8251_s14  ;;  %24 = sbr.rel (!%p22_p8) target bundleno = 15 (0xf), region = 102 }
 0x79d   : > { %s8262_s30 = smov %s8255_s9 }
 0x79e   :  { %3851 = vsyncpa [#allocation3], 1 }
 0x79f   :  { %3853 = vsyncpa [#allocation3 + $0x1], 1 }
 0x7a0   :  { %3854 = vsyncpa [#allocation6], 1 }
 0x7a1   :  { %3856 = vsyncpa [#allocation6 + $0x1], 1 }
 0x7a2   :  { %3857 = vsyncpa [#allocation4], 1 }
 0x7a3   :  { %3859 = vsyncpa [#allocation4 + $0x1], 1 }

</bundles_post_ra>
